<compile_context>
chip_gen: v7x
topology: tpu7x:2x2x1
jax: 0.10.0
libtpu: 0.0.40
codegen_flags: <defaults>
</compile_context>

<pallas_src>
import functools

import jax
import jax.numpy as jnp
from jax.experimental import pallas as pl
from jax.experimental.pallas import tpu as pltpu

_LN_EPS = 1e-5
_LANES = 128


def build_layer_plan(object_dim, hidden_sizes, output_dim, use_layer_norm,
                     include_last):
    """Mirror BasicConvNetwork.__init__'s nn.Sequential layer list exactly."""
    hs = hidden_sizes
    plan = []  # ('conv', c_in, c_out) | ('relu',) | ('ln', dim)
    if len(hs) == 0:
        plan.append(('conv', object_dim, output_dim))
        return plan
    if len(hs) == 1:
        plan.append(('conv', object_dim, hs[0]))
    elif use_layer_norm:
        plan += [('conv', object_dim, hs[0]), ('relu',), ('ln', hs[0])]
        for i in range(len(hs) - 1):
            plan += [('conv', hs[i - 1], hs[i]), ('relu',), ('ln', hs[i])]
        plan += [('conv', hs[-2], hs[-1]), ('relu',)]
    else:
        plan += [('conv', object_dim, hs[0]), ('relu',)]
        for i in range(len(hs) - 1):
            plan += [('conv', hs[i - 1], hs[i]), ('relu',)]
        plan += [('conv', hs[-2], hs[-1]), ('relu',)]
    if include_last:
        plan.append(('conv', hs[-1], output_dim))
    return plan


def _conv_net_kernel(plan, tile_n, seq_len, pad, x_ref, w_ref, b_ref, o_ref):
    rows = tile_n * seq_len
    inv_len = 1.0 / float(seq_len)
    # channels on the lane axis; tile_n*seq_len positions on the sublane axis.
    h = x_ref[...].reshape(rows, pad)
    conv_idx = 0
    for op in plan:
        kind = op[0]
        if kind == 'conv':
            w = w_ref[conv_idx]                    # (pad, pad), zero-padded
            b = b_ref[conv_idx].reshape(1, pad)    # (1, pad),  zero-padded
            conv_idx += 1
            h = jnp.dot(h, w, preferred_element_type=jnp.float32) + b
        elif kind == 'relu':
            h = jnp.maximum(h, 0.0)
        else:  # 'ln' — nn.LayerNorm over the length axis of the (N, C, L) tensor
            h3 = h.reshape(tile_n, seq_len, pad)
            s1 = jnp.sum(h3, axis=1, keepdims=True)
            s2 = jnp.sum(h3 * h3, axis=1, keepdims=True)
            mean = s1 * inv_len
            var = jnp.maximum(s2 * inv_len - mean * mean, 0.0)
            h3 = (h3 - mean) * jax.lax.rsqrt(var + _LN_EPS)
            # TODO(synk): if the LayerNorm affine is ever trained away from its
            # gamma=1/beta=0 defaults, gamma/beta inputs must be added here.
            h = h3.reshape(rows, pad)
    o_ref[...] = h.reshape(tile_n, seq_len, pad)


def _pick_tile_n(batch, seq_len, pad, target_rows=2048, vmem_budget=24 << 20):
    # double-buffered f32 input + output activation blocks
    by_vmem = max(1, vmem_budget // (2 * 2 * seq_len * pad * 4))
    by_rows = max(1, target_rows // seq_len)
    return max(1, min(batch, by_vmem, by_rows))


def basic_conv_forward(x, w_stack, b_stack, plan, tile_n=None):
    """x: (N, object_dim, L) float32 (PyTorch Conv1d layout). Returns (N, C_out, L)."""
    n, c_in, seq_len = x.shape
    pad = w_stack.shape[-1]
    out_channels = [op for op in plan if op[0] == 'conv'][-1][2]

    if tile_n is None:
        tile_n = _pick_tile_n(n, seq_len, pad)
    tile_n = max(1, min(tile_n, n))
    grid_n = pl.cdiv(n, tile_n)
    n_padded = grid_n * tile_n

    # channels-last, zero-pad channels to the lane width and batch to the tile.
    xt = jnp.transpose(x.astype(jnp.float32), (0, 2, 1))
    xt = jnp.pad(xt, ((0, n_padded - n), (0, 0), (0, pad - c_in)))

    block = (tile_n, seq_len, pad)
    block_bytes = tile_n * seq_len * pad * 4
    param_bytes = (w_stack.size + b_stack.size) * 4
    # 2 activation arrays x 2 pipeline buffers + resident params + headroom;
    # stays well inside v7x's 64 MiB physical / 32 MiB scoped VMEM.
    vmem_bytes = int(min(max(4 * block_bytes + param_bytes + (4 << 20), 8 << 20),
                         32 << 20))

    kernel = functools.partial(_conv_net_kernel, plan, tile_n, seq_len, pad)
    out = pl.pallas_call(
        kernel,
        out_shape=jax.ShapeDtypeStruct((n_padded, seq_len, pad), jnp.float32),
        grid=(grid_n,),
        in_specs=[
            pl.BlockSpec(block, lambda i: (i, 0, 0)),
            pl.BlockSpec(w_stack.shape, lambda i: (0, 0, 0)),  # resident params
            pl.BlockSpec(b_stack.shape, lambda i: (0, 0)),
        ],
        out_specs=pl.BlockSpec(block, lambda i: (i, 0, 0)),
        compiler_params=pltpu.CompilerParams(
            dimension_semantics=("parallel",),
            vmem_limit_bytes=vmem_bytes,
        ),
    )(xt, w_stack, b_stack)

    # drop batch/lane padding; back to the PyTorch (N, C_out, L) layout.
    return jnp.transpose(out[:n, :, :out_channels], (0, 2, 1))


def init_params(key, plan, pad):
    """Deterministic conv params (torch-default-style uniform).  Returns the
    unpadded per-layer params (for the reference) plus the stacked, zero-padded
    (n_conv, pad, pad) / (n_conv, pad) kernel inputs (W stored (in, out))."""
    weights, biases, w_pad, b_pad = [], [], [], []
    for op in plan:
        if op[0] != 'conv':
            continue
        _, c_in, c_out = op
        key, kw, kb = jax.random.split(key, 3)
        bound = 1.0 / (c_in ** 0.5)
        w = jax.random.uniform(kw, (c_out, c_in), jnp.float32, -bound, bound)
        b = jax.random.uniform(kb, (c_out,), jnp.float32, -bound, bound)
        weights.append(w)
        biases.append(b)
        w_pad.append(jnp.zeros((pad, pad), jnp.float32).at[:c_in, :c_out].set(w.T))
        b_pad.append(jnp.zeros((pad,), jnp.float32).at[:c_out].set(b))
    return weights, biases, jnp.stack(w_pad), jnp.stack(b_pad)


def reference_forward(x, weights, biases, plan):
    """Pure-JAX reference in the original (N, C, L) layout."""
    h = x.astype(jnp.float32)
    conv_idx = 0
    for op in plan:
        kind = op[0]
        if kind == 'conv':
            w, b = weights[conv_idx], biases[conv_idx]
            conv_idx += 1
            h = jnp.einsum('oi,nil->nol', w, h,
                           precision=jax.lax.Precision.HIGHEST) + b[None, :, None]
        elif kind == 'relu':
            h = jnp.maximum(h, 0.0)
        else:
            mean = jnp.mean(h, axis=-1, keepdims=True)
            var = jnp.mean((h - mean) ** 2, axis=-1, keepdims=True)
            h = (h - mean) * jax.lax.rsqrt(var + _LN_EPS)
    return h


if __name__ == "__main__":
    # Small config consistent with BasicConvNetwork kwargs.  Note: the module's
    # LayerNorm(hs[i]) on a (N, C, L) tensor requires L == hs[i], so seq_len
    # must equal the layer-normed hidden sizes for the original module to run.
    batch = 40
    object_dim = 16
    hidden_sizes = [32, 32]
    output_dim = 16
    seq_len = 32
    use_layer_norm = True
    include_last = True

    plan = build_layer_plan(object_dim, hidden_sizes, output_dim,
                            use_layer_norm, include_last)
    assert all(op[1] == seq_len for op in plan if op[0] == 'ln'), \
        "original module requires L == layer-normed hidden size"
    max_dim = max(max(op[1], op[2]) for op in plan if op[0] == 'conv')
    pad = _LANES * pl.cdiv(max_dim, _LANES)

    key = jax.random.PRNGKey(0)
    key_p, key_x = jax.random.split(key)
    weights, biases, w_stack, b_stack = init_params(key_p, plan, pad)
    x = jax.random.normal(key_x, (batch, object_dim, seq_len), jnp.float32)

    out = basic_conv_forward(x, w_stack, b_stack, plan, tile_n=16)
    out = jax.block_until_ready(out)

    ref = reference_forward(x, weights, biases, plan)
    out_channels = [op for op in plan if op[0] == 'conv'][-1][2]
    assert out.shape == (batch, out_channels, seq_len)
    assert jnp.allclose(out, ref, atol=3e-3, rtol=3e-3), "mismatch vs JAX reference"

    print("KERNEL_OK")
</pallas_src>

<mosaic_0001>
module attributes {stable_mosaic.version = 11 : i64} {
  func.func @_conv_net_kernel(%arg0: i32, %arg1: memref<16x32x128xf32, #tpu.memory_space<vmem>>, %arg2: memref<4x128x128xf32, #tpu.memory_space<vmem>>, %arg3: memref<4x128xf32, #tpu.memory_space<vmem>>, %arg4: memref<16x32x128xf32, #tpu.memory_space<vmem>>) attributes {dimension_semantics = [#tpu.dimension_semantics<parallel>], iteration_bounds = array<i64: 3>, scalar_prefetch = 0 : i64, scratch_operands = 0 : i64, tpu.core_type = #tpu.core_type<tc>, window_params = [{transform_indices = @transform_0, window_bounds = array<i64: 16, 32, 128>}, {pipeline_mode = #tpu.pipeline_mode<synchronous>, transform_indices = @transform_1, window_bounds = array<i64: 4, 128, 128>}, {pipeline_mode = #tpu.pipeline_mode<synchronous>, transform_indices = @transform_2, window_bounds = array<i64: 4, 128>}, {transform_indices = @transform_3, window_bounds = array<i64: 16, 32, 128>}]} {
    %c0 = arith.constant 0 : index
    %c0_0 = arith.constant 0 : index
    %c0_1 = arith.constant 0 : index
    %0 = vector.load %arg1[%c0, %c0_0, %c0_1] : memref<16x32x128xf32, #tpu.memory_space<vmem>>, vector<16x32x128xf32>
    %1 = vector.shape_cast %0 : vector<16x32x128xf32> to vector<512x128xf32>
    %c0_2 = arith.constant 0 : index
    %c0_3 = arith.constant 0 : index
    %c0_4 = arith.constant 0 : index
    %2 = vector.load %arg2[%c0_2, %c0_3, %c0_4] : memref<4x128x128xf32, #tpu.memory_space<vmem>>, vector<1x128x128xf32>
    %3 = vector.shape_cast %2 : vector<1x128x128xf32> to vector<128x128xf32>
    %c0_5 = arith.constant 0 : index
    %c0_6 = arith.constant 0 : index
    %4 = vector.load %arg3[%c0_5, %c0_6] : memref<4x128xf32, #tpu.memory_space<vmem>>, vector<1x128xf32>
    %5 = vector.shape_cast %4 : vector<1x128xf32> to vector<128xf32>
    %6 = vector.shape_cast %5 : vector<128xf32> to vector<1x128xf32>
    %cst = arith.constant dense<0.000000e+00> : vector<512x128xf32>
    %7 = tpu.matmul %1, %3, %cst {dimension_numbers = #tpu.dot_dimension_numbers<[1], [0], [0], [1], [0, 0, 1, 1], [], []>} : vector<512x128xf32>, vector<128x128xf32>, vector<512x128xf32> -> vector<512x128xf32>
    %8 = vector.broadcast %6 : vector<1x128xf32> to vector<512x128xf32>
    %9 = arith.addf %7, %8 : vector<512x128xf32>
    %cst_7 = arith.constant 0.000000e+00 : f32
    %10 = vector.broadcast %cst_7 : f32 to vector<512x128xf32>
    %11 = arith.maximumf %9, %10 : vector<512x128xf32>
    %12 = vector.shape_cast %11 : vector<512x128xf32> to vector<16x32x128xf32>
    %cst_8 = arith.constant dense<0.000000e+00> : vector<16x128xf32>
    %13 = vector.multi_reduction <add>, %12, %cst_8 [1] : vector<16x32x128xf32> to vector<16x128xf32>
    %14 = vector.shape_cast %13 : vector<16x128xf32> to vector<16x1x128xf32>
    %15 = arith.mulf %12, %12 : vector<16x32x128xf32>
    %cst_9 = arith.constant dense<0.000000e+00> : vector<16x128xf32>
    %16 = vector.multi_reduction <add>, %15, %cst_9 [1] : vector<16x32x128xf32> to vector<16x128xf32>
    %17 = vector.shape_cast %16 : vector<16x128xf32> to vector<16x1x128xf32>
    %cst_10 = arith.constant 3.125000e-02 : f32
    %18 = vector.broadcast %cst_10 : f32 to vector<16x1x128xf32>
    %19 = arith.mulf %14, %18 : vector<16x1x128xf32>
    %cst_11 = arith.constant 3.125000e-02 : f32
    %20 = vector.broadcast %cst_11 : f32 to vector<16x1x128xf32>
    %21 = arith.mulf %17, %20 : vector<16x1x128xf32>
    %22 = arith.mulf %19, %19 : vector<16x1x128xf32>
    %23 = arith.subf %21, %22 : vector<16x1x128xf32>
    %cst_12 = arith.constant 0.000000e+00 : f32
    %24 = vector.broadcast %cst_12 : f32 to vector<16x1x128xf32>
    %25 = arith.maximumf %23, %24 : vector<16x1x128xf32>
    %26 = vector.broadcast %19 : vector<16x1x128xf32> to vector<16x32x128xf32>
    %27 = arith.subf %12, %26 : vector<16x32x128xf32>
    %cst_13 = arith.constant 9.99999974E-6 : f32
    %28 = vector.broadcast %cst_13 : f32 to vector<16x1x128xf32>
    %29 = arith.addf %25, %28 : vector<16x1x128xf32>
    %30 = math.rsqrt %29 : vector<16x1x128xf32>
    %31 = vector.broadcast %30 : vector<16x1x128xf32> to vector<16x32x128xf32>
    %32 = arith.mulf %27, %31 : vector<16x32x128xf32>
    %33 = vector.shape_cast %32 : vector<16x32x128xf32> to vector<512x128xf32>
    %c1 = arith.constant 1 : index
    %c0_14 = arith.constant 0 : index
    %c0_15 = arith.constant 0 : index
    %34 = vector.load %arg2[%c1, %c0_14, %c0_15] : memref<4x128x128xf32, #tpu.memory_space<vmem>>, vector<1x128x128xf32>
    %35 = vector.shape_cast %34 : vector<1x128x128xf32> to vector<128x128xf32>
    %c1_16 = arith.constant 1 : index
    %c0_17 = arith.constant 0 : index
    %36 = vector.load %arg3[%c1_16, %c0_17] : memref<4x128xf32, #tpu.memory_space<vmem>>, vector<1x128xf32>
    %37 = vector.shape_cast %36 : vector<1x128xf32> to vector<128xf32>
    %38 = vector.shape_cast %37 : vector<128xf32> to vector<1x128xf32>
    %cst_18 = arith.constant dense<0.000000e+00> : vector<512x128xf32>
    %39 = tpu.matmul %33, %35, %cst_18 {dimension_numbers = #tpu.dot_dimension_numbers<[1], [0], [0], [1], [0, 0, 1, 1], [], []>} : vector<512x128xf32>, vector<128x128xf32>, vector<512x128xf32> -> vector<512x128xf32>
    %40 = vector.broadcast %38 : vector<1x128xf32> to vector<512x128xf32>
    %41 = arith.addf %39, %40 : vector<512x128xf32>
    %cst_19 = arith.constant 0.000000e+00 : f32
    %42 = vector.broadcast %cst_19 : f32 to vector<512x128xf32>
    %43 = arith.maximumf %41, %42 : vector<512x128xf32>
    %44 = vector.shape_cast %43 : vector<512x128xf32> to vector<16x32x128xf32>
    %cst_20 = arith.constant dense<0.000000e+00> : vector<16x128xf32>
    %45 = vector.multi_reduction <add>, %44, %cst_20 [1] : vector<16x32x128xf32> to vector<16x128xf32>
    %46 = vector.shape_cast %45 : vector<16x128xf32> to vector<16x1x128xf32>
    %47 = arith.mulf %44, %44 : vector<16x32x128xf32>
    %cst_21 = arith.constant dense<0.000000e+00> : vector<16x128xf32>
    %48 = vector.multi_reduction <add>, %47, %cst_21 [1] : vector<16x32x128xf32> to vector<16x128xf32>
    %49 = vector.shape_cast %48 : vector<16x128xf32> to vector<16x1x128xf32>
    %cst_22 = arith.constant 3.125000e-02 : f32
    %50 = vector.broadcast %cst_22 : f32 to vector<16x1x128xf32>
    %51 = arith.mulf %46, %50 : vector<16x1x128xf32>
    %cst_23 = arith.constant 3.125000e-02 : f32
    %52 = vector.broadcast %cst_23 : f32 to vector<16x1x128xf32>
    %53 = arith.mulf %49, %52 : vector<16x1x128xf32>
    %54 = arith.mulf %51, %51 : vector<16x1x128xf32>
    %55 = arith.subf %53, %54 : vector<16x1x128xf32>
    %cst_24 = arith.constant 0.000000e+00 : f32
    %56 = vector.broadcast %cst_24 : f32 to vector<16x1x128xf32>
    %57 = arith.maximumf %55, %56 : vector<16x1x128xf32>
    %58 = vector.broadcast %51 : vector<16x1x128xf32> to vector<16x32x128xf32>
    %59 = arith.subf %44, %58 : vector<16x32x128xf32>
    %cst_25 = arith.constant 9.99999974E-6 : f32
    %60 = vector.broadcast %cst_25 : f32 to vector<16x1x128xf32>
    %61 = arith.addf %57, %60 : vector<16x1x128xf32>
    %62 = math.rsqrt %61 : vector<16x1x128xf32>
    %63 = vector.broadcast %62 : vector<16x1x128xf32> to vector<16x32x128xf32>
    %64 = arith.mulf %59, %63 : vector<16x32x128xf32>
    %65 = vector.shape_cast %64 : vector<16x32x128xf32> to vector<512x128xf32>
    %c2 = arith.constant 2 : index
    %c0_26 = arith.constant 0 : index
    %c0_27 = arith.constant 0 : index
    %66 = vector.load %arg2[%c2, %c0_26, %c0_27] : memref<4x128x128xf32, #tpu.memory_space<vmem>>, vector<1x128x128xf32>
    %67 = vector.shape_cast %66 : vector<1x128x128xf32> to vector<128x128xf32>
    %c2_28 = arith.constant 2 : index
    %c0_29 = arith.constant 0 : index
    %68 = vector.load %arg3[%c2_28, %c0_29] : memref<4x128xf32, #tpu.memory_space<vmem>>, vector<1x128xf32>
    %69 = vector.shape_cast %68 : vector<1x128xf32> to vector<128xf32>
    %70 = vector.shape_cast %69 : vector<128xf32> to vector<1x128xf32>
    %cst_30 = arith.constant dense<0.000000e+00> : vector<512x128xf32>
    %71 = tpu.matmul %65, %67, %cst_30 {dimension_numbers = #tpu.dot_dimension_numbers<[1], [0], [0], [1], [0, 0, 1, 1], [], []>} : vector<512x128xf32>, vector<128x128xf32>, vector<512x128xf32> -> vector<512x128xf32>
    %72 = vector.broadcast %70 : vector<1x128xf32> to vector<512x128xf32>
    %73 = arith.addf %71, %72 : vector<512x128xf32>
    %cst_31 = arith.constant 0.000000e+00 : f32
    %74 = vector.broadcast %cst_31 : f32 to vector<512x128xf32>
    %75 = arith.maximumf %73, %74 : vector<512x128xf32>
    %c3 = arith.constant 3 : index
    %c0_32 = arith.constant 0 : index
    %c0_33 = arith.constant 0 : index
    %76 = vector.load %arg2[%c3, %c0_32, %c0_33] : memref<4x128x128xf32, #tpu.memory_space<vmem>>, vector<1x128x128xf32>
    %77 = vector.shape_cast %76 : vector<1x128x128xf32> to vector<128x128xf32>
    %c3_34 = arith.constant 3 : index
    %c0_35 = arith.constant 0 : index
    %78 = vector.load %arg3[%c3_34, %c0_35] : memref<4x128xf32, #tpu.memory_space<vmem>>, vector<1x128xf32>
    %79 = vector.shape_cast %78 : vector<1x128xf32> to vector<128xf32>
    %80 = vector.shape_cast %79 : vector<128xf32> to vector<1x128xf32>
    %cst_36 = arith.constant dense<0.000000e+00> : vector<512x128xf32>
    %81 = tpu.matmul %75, %77, %cst_36 {dimension_numbers = #tpu.dot_dimension_numbers<[1], [0], [0], [1], [0, 0, 1, 1], [], []>} : vector<512x128xf32>, vector<128x128xf32>, vector<512x128xf32> -> vector<512x128xf32>
    %82 = vector.broadcast %80 : vector<1x128xf32> to vector<512x128xf32>
    %83 = arith.addf %81, %82 : vector<512x128xf32>
    %84 = vector.shape_cast %83 : vector<512x128xf32> to vector<16x32x128xf32>
    %c0_37 = arith.constant 0 : index
    %c0_38 = arith.constant 0 : index
    %c0_39 = arith.constant 0 : index
    %85 = vector.load %arg4[%c0_37, %c0_38, %c0_39] : memref<16x32x128xf32, #tpu.memory_space<vmem>>, vector<16x32x128xf32>
    tpu.vector_store %arg4[%c0_37, %c0_38, %c0_39], %84 {strides = array<i32>} : memref<16x32x128xf32, #tpu.memory_space<vmem>>, vector<16x32x128xf32>,
    return
  }
  func.func @transform_0(%arg0: i32) -> (i32, i32, i32) {
    %c0_i32 = arith.constant 0 : i32
    %c0_i32_0 = arith.constant 0 : i32
    %c0_i32_1 = arith.constant 0 : i32
    return %arg0, %c0_i32, %c0_i32_0 : i32, i32, i32
  }
  func.func @transform_1(%arg0: i32) -> (i32, i32, i32) {
    %c0_i32 = arith.constant 0 : i32
    %c0_i32_0 = arith.constant 0 : i32
    %c0_i32_1 = arith.constant 0 : i32
    %c0_i32_2 = arith.constant 0 : i32
    return %c0_i32, %c0_i32_0, %c0_i32_1 : i32, i32, i32
  }
  func.func @transform_2(%arg0: i32) -> (i32, i32) {
    %c0_i32 = arith.constant 0 : i32
    %c0_i32_0 = arith.constant 0 : i32
    %c0_i32_1 = arith.constant 0 : i32
    return %c0_i32, %c0_i32_0 : i32, i32
  }
  func.func @transform_3(%arg0: i32) -> (i32, i32, i32) {
    %c0_i32 = arith.constant 0 : i32
    %c0_i32_0 = arith.constant 0 : i32
    %c0_i32_1 = arith.constant 0 : i32
    return %arg0, %c0_i32, %c0_i32_0 : i32, i32, i32
  }
}

</mosaic_0001>

<bundles_post_ra>
// kernel: tpu_custom_call.1
= control target key start
LH: loop header
LB: loop body
LE: loop exit
PB: predicated region body
PF: predicated region fallthrough
CT: control target
= control target key end

     0   :  { %8 = vsyncpa [#allocation3], 0  ;;  %s6709_s0 = inlined_call_operand.hbm [shape: f32[48,32,128], index: 0, kind: input, shape index: {}]   ;;  %s6710_s1 = inlined_call_operand.hbm [shape: f32[4,128,128], index: 1, kind: input, shape index: {}]   ;;  %s6711_s2 = inlined_call_operand.vmem [shape: f32[4,128], index: 2, kind: input, shape index: {}]   ;;  %s6712_s3 = inlined_call_operand.hbm [shape: f32[48,32,128], index: 3, kind: output, shape index: {}]  }
   0x1   :  { %10 = vsyncpa [#allocation3 + $0x1], 0 }
   0x2   :  { %11 = vsyncpa [#allocation6], 0 }
   0x3   :  { %12 = vsyncpa [#allocation4], 0 }
   0x4   :  { %14 = vsyncpa [#allocation4 + $0x1], 0  ;;  %s4706_s12 = smov 0   ;;  %s4708_s13 = smov 0  }
   0x5   :  { %s4710_s14 = smov 0   ;;  %s4712_s15 = smov 0  }
   0x6 LB: > { %s4727_s16 = sadd.s32 4294967295, %s4677_s15   ;;  %s3436_s17 = sadd.s32 4294967294, %s4677_s15   ;;  %s4677_s15 = sphi %s4712_s15, %s6754_s15   ;;  %s4673_s14 = sphi %s4710_s14, %s6753_s14   ;;  %s4669_s13 = sphi %s4708_s13, %s6752_s13   ;;  %s4665_s12 = sphi %s4706_s12, %s6751_s12  }
   0x7   : > { %p40_p0 = scmp.ne.s32.totalorder %s4669_s13, %s4665_s12  ;;  %p6713_p1 = scmp.eq.s32.totalorder %s4727_s16, 0 }
   0x8   : > { %p112_p3 = scmp.eq.s32.totalorder %s3436_s17, 2  ;;  %p3437_p5 = scmp.ge.s32.totalorder %s4677_s15, 1 }
   0x9   : > { %p4736_p4 = por %p6713_p1, %p40_p0  ;;  %p119_p7 = scmp.lt.s32.totalorder %s4677_s15, 4 }
   0xa   : > { %p4741_p6 = por %p112_p3, %p40_p0  ;;  %s4679_s21 = smov [#allocation5]  }
   0xb   : > { %s6721_s18 = scalar_select %p4736_p4, 1, 0 }
   0xc   : > { %s6722_s19 = scalar_select %p4741_p6, 1, 0 }
   0xd   : > { %p4746_p8 = pnand %p3437_p5, %p119_p7  ;;  %s131_s22 = sshll.u32 %s4679_s21, 4  ;;  %s132_s22 = int_to_ptr.vmem [resolvable:$true] %s131_s22 }
   0xe   : > { %s4759_s24 = sadd.s32 1, %s4677_s15   ;;  %s27_s25 = sadd.s32 1, %s4673_s14 }
   0xf   : > { %s6723_s20 = scalar_select %p4746_p8, 1, 0 }
  0x10   : > { %p4430_p9 = pneg %p4746_p8  ;;  %s24_s26 = ssub.s32 %s4677_s15, %s4759_s24 }
  0x11   : > { %s4549_s29 = scalar_lea.hbm %s6710_s1, 8192 }
  0x12   : > { %p4754_p10 = pnand %p4430_p9, %p6713_p1  ;;  %p4550_p11 = scmp.ne.s32.totalorder %s6710_s1, %s4549_s29 }
  0x13   : > { %p4556_p3 = scmp.lt.u32.totalorder %s4549_s29, %s6710_s1 }
  0x14   : > { %p4551_p12 = pneg %p4754_p10 }
  0x16   : > { %p4552_p13 = pnand %p4551_p12, %p4550_p11 }
  0x18   : > { %p4553_p0 = pneg %p4552_p13 }
  0x1a   : > { %p4558_p5 = pnand %p4556_p3, %p4553_p0 }
  0x1c   : > { %4561 = shalt.err (!%p4558_p5)
}
  0x1d   : > { %s4562_s7 = scalar_lea.vmem %s132_s22, 8192  ;;  %p4570_p2 = scmp.lt.s32.totalorder %s132_s22, %s132_s22 }
  0x1e   : > { %p4563_p7 = scmp.ne.s32.totalorder %s132_s22, %s4562_s7  ;;  %p4571_p6 = scmp.lt.s32.totalorder %s4562_s7, %s4562_s7 }
  0x20   : > { %p4565_p9 = pnand %p4563_p7, %p4551_p12  ;;  %p4572_p4 = por %p4571_p6, %p4570_p2 }
  0x22   : > { %p4566_p1 = pneg %p4565_p9 }
  0x24   : > { %p4573_p8 = pnand %p4572_p4, %p4566_p1 }
  0x26   : > { %4576 = shalt.err (!%p4573_p8)
}
  0x27   : > { %s4680_s8 = smov 128   ;;  %s4681_s9 = smov 8  }
  0x28   : > { %4433 = dma.hbm_to_vmem [thread:$0]  (!%p4754_p10), %s6710_s1, 8192, %s132_s22, [#allocation6], %s4680_s8, %s4680_s8, %s4681_s9  }
  0x29   : > { %p25_p1 = scmp.eq.s32.totalorder %s24_s26, 0  ;;  %p34_p2 = scmp.ne.s32.totalorder %s4673_s14, %s4669_s13 }
  0x2a   : > { %p35_p4 = scmp.eq.s32.totalorder %s4677_s15, 0  ;;  %p4443_p6 = scmp.lt.s32.totalorder %s4677_s15, 3 }
  0x2b   : > { %s4788_s17 = scalar_select %p25_p1, %s4673_s14, %s27_s25  }
  0x2c   : > { %p36_p8 = por %p35_p4, %p34_p2  ;;  %p6725_p11 = scmp.eq.s32.totalorder %s4727_s16, 2 }
  0x2d   : > { %s148_s23 = sand.u32 1, %s4673_s14   ;;  %s3459_s27 = sshll.u32 %s4677_s15, 13 }
  0x2e   : > { %p4792_p12 = por %p6725_p11, %p34_p2  ;;  %s3440_s28 = sshll.u32 %s148_s23, 9 }
  0x2f   : > { %s4801_s4 = scalar_lea.hbm %s6709_s0, %s3459_s27  ;;  %s152_s22 = scalar_lea.vmem [#allocation2], %s3440_s28 }
  0x30   : > { %s160_s25 = sshll.u32 %s152_s22, 4  ;;  %p4803_p10 = pnand %p4443_p6, %p36_p8  ;;  %s4807_s25 = int_to_ptr.vmem [resolvable:$true] %s160_s25 }
  0x31   : > { %s4809_s5 = scalar_lea.sflag [#allocation3], %s148_s23  ;;  %s4577_s6 = scalar_lea.hbm %s4801_s4, 8192 }
  0x32   : > { %p4578_p13 = scmp.ne.s32.totalorder %s4801_s4, %s4577_s6  ;;  %p4579_p0 = pneg %p4803_p10 }
  0x33   : > { %s4582_s11 = scalar_lea.hbm %s6709_s0, 24576  ;;  %p4583_p7 = scmp.lt.u32.totalorder %s4801_s4, %s6709_s0 }
  0x34   : > { %p4580_p3 = pnand %p4579_p0, %p4578_p13  ;;  %p4584_p9 = scmp.lt.u32.totalorder %s4582_s11, %s4577_s6 }
  0x35   : > { %p4586_p2 = scmp.lt.u32.totalorder %s4577_s6, %s4801_s4 }
  0x36   : > { %p4581_p5 = pneg %p4580_p3  ;;  %p4585_p1 = por %p4584_p9, %p4583_p7 }
  0x38   : > { %p4587_p4 = por %p4586_p2, %p4585_p1 }
  0x3a   : > { %p4588_p6 = pnand %p4587_p4, %p4581_p5 }
  0x3c   : > { %4591 = shalt.err (!%p4588_p6)
}
  0x3d   : > { %s4592_s23 = scalar_lea.vmem %s4807_s25, 8192  ;;  %s4682_s29 = smov [#allocation2]  }
  0x3e   : > { %p4593_p8 = scmp.ne.s32.totalorder %s4807_s25, %s4592_s23  ;;  %s4597_s30 = sshll.u32 %s4682_s29, 4  ;;  %s4598_s30 = int_to_ptr.vmem [resolvable:$false] %s4597_s30 }
  0x3f   : > { %s4599_s22 = scalar_lea.vmem %s4598_s30, 16384  ;;  %p4600_p3 = scmp.lt.s32.totalorder %s4807_s25, %s4598_s30 }
  0x40   : > { %p4595_p11 = pnand %p4593_p8, %p4579_p0  ;;  %p4601_p7 = scmp.lt.s32.totalorder %s4599_s22, %s4592_s23 }
  0x42   : > { %p4596_p13 = pneg %p4595_p11  ;;  %p4602_p9 = por %p4601_p7, %p4600_p3 }
  0x44   : > { %p4603_p1 = pnand %p4602_p9, %p4596_p13 }
  0x46   : > { %4606 = shalt.err (!%p4603_p1)
}
  0x47   : > { %4437 = dma.hbm_to_vmem [thread:$0]  (!%p4803_p10), %s4801_s4, 8192, %s4807_s25, %s4809_s5, %s4680_s8, %s4680_s8, %s4681_s9  }
  0x48   : > { %p6728_p0 = scmp.ne.s32.totalorder %s6723_s20, 0 }
  0x4a   : > { %172 = sbr.rel (%p6728_p0) target bundleno = 1284 (0x504), region = 32 }
  0x51   : > { %s4843_s6 = sand.u32 1, %s4669_s13   ;;  %p6729_p5 = scmp.ne.s32.totalorder %s6721_s18, 0 }
  0x52   : > { %s3445_s7 = sshll.u32 %s4843_s6, 9  ;;  %s175_s10 = scalar_lea.sflag [#allocation3], %s4843_s6 }
  0x53   : > { %s4849_s26 = scalar_lea.vmem [#allocation2], %s3445_s7 }
  0x54   : > { %4652 = dma.done.wait (%p6729_p5), %s175_s10, 8192  }
  0x55   : > { %4654 = vsyncadd (%p6729_p5), %s175_s10, 4294959104  ;;  %p6730_p10 = scmp.eq.s32.totalorder %s4727_s16, 0 }
  0x57   : > { %4656 = dma.done.wait (%p6730_p10), [#allocation6], 8192   ;;  %p6731_p2 = pmov %p6730_p10 }
  0x58   : > { %v271_v0 = vld [vmem:[#allocation5] sm:$0xff]  ;;  %v272_v1 = vld [vmem:[#allocation5 + $0x8] sm:$0xff]  ;;  %v273_v2 = vld [vmem:[#allocation5 + $0x10] sm:$0xff]  ;;  %s6531_s30 = scalar_lea.vmem [#allocation7], %s3445_s7  ;;  %s3461_s22 = sshll.u32 %s4727_s16, 13 }
  0x59   : > { %4658 = vsyncadd (%p6731_p2), [#allocation6], 4294959104  ;;  %v4294_v3 = vpack.c.bf16 %v272_v1, %v271_v0  ;;  %v274_v4 = vld [vmem:[#allocation5 + $0x18] sm:$0xff]  ;;  %v275_v6 = vld [vmem:[#allocation5 + $0x20] sm:$0xff]  ;;  %s3353_s7 = sshll.u32 %s6531_s30, 4  ;;  %s6661_s18 = scalar_lea.hbm %s6712_s3, %s3461_s22  ;;  %s6663_s7 = int_to_ptr.vmem [resolvable:$true] %s3353_s7 }
  0x5a   : > { %v4298_v5 = vpack.c.bf16 %v274_v4, %v273_v2  ;;  %v276_v7 = vld [vmem:[#allocation5 + $0x28] sm:$0xff]  ;;  %v207_v9 = vld [vmem:[%s4849_s26] sm:$0xff]  ;;  %v277_v10 = vld [vmem:[#allocation5 + $0x30] sm:$0xff]  ;;  %s3339_s16 = scalar_lea.sflag [#allocation4], %s4843_s6  ;;  %s4607_s20 = scalar_lea.vmem %s6663_s7, 8192 }
  0x5b   : > { %4295 = vmatprep.subr.bf16.mxu0 %v4294_v3  ;;  %v4302_v8 = vpack.c.bf16 %v276_v7, %v275_v6  ;;  %v278_v11 = vld [vmem:[#allocation5 + $0x38] sm:$0xff]  ;;  %3814 = vmatprep.mubr.f32.mxu0 %v207_v9  ;;  %v279_v13 = vld [vmem:[#allocation5 + $0x40] sm:$0xff]  ;;  %v280_v14 = vld [vmem:[#allocation5 + $0x48] sm:$0xff]  ;;  %p4608_p4 = scmp.ne.s32.totalorder %s6663_s7, %s4607_s20  ;;  %s4683_s8 = smov [#allocation7]  }
  0x5c   : > { %4297 = vmatpush3.bf16.msra.mxu0 %v4294_v3  ;;  %v4306_v12 = vpack.c.bf16 %v278_v11, %v277_v10  ;;  %v4310_v15 = vpack.c.bf16 %v280_v14, %v279_v13  ;;  %v281_v16 = vld [vmem:[#allocation5 + $0x50] sm:$0xff]  ;;  %v282_v17 = vld [vmem:[#allocation5 + $0x58] sm:$0xff]  ;;  %v283_v19 = vld [vmem:[#allocation5 + $0x60] sm:$0xff]  ;;  %s4611_s9 = sshll.u32 %s4683_s8, 4  ;;  %s4612_s9 = int_to_ptr.vmem [resolvable:$false] %s4611_s9 }
  0x5d   : > { %4299 = vmatprep.subr.bf16.mxu0 %v4298_v5  ;;  %v4314_v18 = vpack.c.bf16 %v282_v17, %v281_v16  ;;  %v284_v20 = vld [vmem:[#allocation5 + $0x68] sm:$0xff]  ;;  %v285_v22 = vld [vmem:[#allocation5 + $0x70] sm:$0xff]  ;;  %v286_v23 = vld [vmem:[#allocation5 + $0x78] sm:$0xff]  ;;  %p4609_p6 = pnand %p4608_p4, %p4792_p12  ;;  %s4613_s4 = scalar_lea.vmem %s4612_s9, 16384 }
  0x5e   : > { %v4318_v21 = vpack.c.bf16 %v284_v20, %v283_v19  ;;  %v4322_v24 = vpack.c.bf16 %v286_v23, %v285_v22  ;;  %v208_v25 = vld [vmem:[%s4849_s26 + $0x8] sm:$0xff]  ;;  %v209_v26 = vld [vmem:[%s4849_s26 + $0x10] sm:$0xff]  ;;  %v210_v27 = vld [vmem:[%s4849_s26 + $0x18] sm:$0xff]  ;;  %p4614_p11 = scmp.lt.s32.totalorder %s6663_s7, %s4612_s9  ;;  %p4615_p13 = scmp.lt.s32.totalorder %s4613_s4, %s4607_s20 }
  0x5f   : > { %v211_v28 = vld [vmem:[%s4849_s26 + $0x20] sm:$0xff]  ;;  %v212_v29 = vld [vmem:[%s4849_s26 + $0x28] sm:$0xff]  ;;  %v213_v30 = vld [vmem:[%s4849_s26 + $0x30] sm:$0xff]  ;;  %p4610_p8 = pneg %p4609_p6 }
  0x60   : > { %4301 = vmatpush3.bf16.msra.mxu0 %v4298_v5  ;;  %v214_v31 = vld [vmem:[%s4849_s26 + $0x38] sm:$0xff]  ;;  %v215_v32 = vld [vmem:[%s4849_s26 + $0x40] sm:$0xff]  ;;  %v216_v33 = vld [vmem:[%s4849_s26 + $0x48] sm:$0xff]  ;;  %p4616_p3 = por %p4615_p13, %p4614_p11 }
  0x61   : > { %4303 = vmatprep.subr.bf16.mxu0 %v4302_v8  ;;  %v217_v34 = vld [vmem:[%s4849_s26 + $0x50] sm:$0xff]  ;;  %v218_v35 = vld [vmem:[%s4849_s26 + $0x58] sm:$0xff]  ;;  %v219_v36 = vld [vmem:[%s4849_s26 + $0x60] sm:$0xff] }
  0x62   : > { %v220_v37 = vld [vmem:[%s4849_s26 + $0x68] sm:$0xff]  ;;  %v221_v38 = vld [vmem:[%s4849_s26 + $0x70] sm:$0xff]  ;;  %v222_v39 = vld [vmem:[%s4849_s26 + $0x78] sm:$0xff]  ;;  %p4617_p7 = pnand %p4616_p3, %p4610_p8 }
  0x63   : > { %v223_v40 = vld [vmem:[%s4849_s26 + $0x80] sm:$0xff]  ;;  %v224_v41 = vld [vmem:[%s4849_s26 + $0x88] sm:$0xff]  ;;  %v225_v42 = vld [vmem:[%s4849_s26 + $0x90] sm:$0xff] }
  0x64   : > { %4305 = vmatpush3.bf16.msra.mxu0 %v4302_v8  ;;  %v226_v43 = vld [vmem:[%s4849_s26 + $0x98] sm:$0xff]  ;;  %v227_v44 = vld [vmem:[%s4849_s26 + $0xa0] sm:$0xff]  ;;  %v228_v45 = vld [vmem:[%s4849_s26 + $0xa8] sm:$0xff] }
  0x65   : > { %4307 = vmatprep.subr.bf16.mxu0 %v4306_v12  ;;  %v229_v46 = vld [vmem:[%s4849_s26 + $0xb0] sm:$0xff]  ;;  %v230_v47 = vld [vmem:[%s4849_s26 + $0xb8] sm:$0xff]  ;;  %v231_v48 = vld [vmem:[%s4849_s26 + $0xc0] sm:$0xff] }
  0x66   : > { %v232_v49 = vld [vmem:[%s4849_s26 + $0xc8] sm:$0xff]  ;;  %v233_v50 = vld [vmem:[%s4849_s26 + $0xd0] sm:$0xff]  ;;  %v234_v51 = vld [vmem:[%s4849_s26 + $0xd8] sm:$0xff] }
  0x67   : > { %v235_v52 = vld [vmem:[%s4849_s26 + $0xe0] sm:$0xff]  ;;  %v236_v53 = vld [vmem:[%s4849_s26 + $0xe8] sm:$0xff]  ;;  %v237_v54 = vld [vmem:[%s4849_s26 + $0xf0] sm:$0xff] }
  0x68   : > { %4309 = vmatpush3.bf16.msra.mxu0 %v4306_v12  ;;  %v238_v55 = vld [vmem:[%s4849_s26 + $0xf8] sm:$0xff]  ;;  %v239_v56 = vld [vmem:[%s4849_s26 + $0x100] sm:$0xff]  ;;  %v240_v57 = vld [vmem:[%s4849_s26 + $0x108] sm:$0xff] }
  0x69   : > { %4311 = vmatprep.subr.bf16.mxu0 %v4310_v15  ;;  %v241_v58 = vld [vmem:[%s4849_s26 + $0x110] sm:$0xff]  ;;  %v242_v59 = vld [vmem:[%s4849_s26 + $0x118] sm:$0xff]  ;;  %v243_v60 = vld [vmem:[%s4849_s26 + $0x120] sm:$0xff] }
  0x6a   : > { %v244_v61 = vld [vmem:[%s4849_s26 + $0x128] sm:$0xff]  ;;  %v245_v62 = vld [vmem:[%s4849_s26 + $0x130] sm:$0xff]  ;;  %v246_v63 = vld [vmem:[%s4849_s26 + $0x138] sm:$0xff] }
  0x6b   : > { %v247_v0 = vld [vmem:[%s4849_s26 + $0x140] sm:$0xff]  ;;  %v248_v1 = vld [vmem:[%s4849_s26 + $0x148] sm:$0xff]  ;;  %v249_v2 = vld [vmem:[%s4849_s26 + $0x150] sm:$0xff] }
  0x6c   : > { %4313 = vmatpush3.bf16.msra.mxu0 %v4310_v15  ;;  %v250_v3 = vld [vmem:[%s4849_s26 + $0x158] sm:$0xff]  ;;  %v251_v4 = vld [vmem:[%s4849_s26 + $0x160] sm:$0xff]  ;;  %v252_v5 = vld [vmem:[%s4849_s26 + $0x168] sm:$0xff] }
  0x6d   : > { %4315 = vmatprep.subr.bf16.mxu0 %v4314_v18  ;;  %v253_v6 = vld [vmem:[%s4849_s26 + $0x170] sm:$0xff]  ;;  %v254_v7 = vld [vmem:[%s4849_s26 + $0x178] sm:$0xff]  ;;  %v255_v8 = vld [vmem:[%s4849_s26 + $0x180] sm:$0xff] }
  0x6e   : > { %v256_v9 = vld [vmem:[%s4849_s26 + $0x188] sm:$0xff]  ;;  %v257_v10 = vld [vmem:[%s4849_s26 + $0x190] sm:$0xff]  ;;  %v258_v11 = vld [vmem:[%s4849_s26 + $0x198] sm:$0xff] }
  0x6f   : > { %v259_v12 = vld [vmem:[%s4849_s26 + $0x1a0] sm:$0xff]  ;;  %v1335_v14 = vld [vmem:[#allocation5 + $0x88] sm:$0xff]  ;;  %v261_v17 = vld [vmem:[%s4849_s26 + $0x1b0] sm:$0xff] }
  0x70   : > { %4317 = vmatpush3.bf16.msra.mxu0 %v4314_v18  ;;  %v1334_v13 = vld [vmem:[#allocation5 + $0x80] sm:$0xff]  ;;  %v260_v16 = vld [vmem:[%s4849_s26 + $0x1a8] sm:$0xff]  ;;  %v1336_v18 = vld [vmem:[#allocation5 + $0x90] sm:$0xff] }
  0x71   : > { %4319 = vmatprep.subr.bf16.mxu0 %v4318_v21  ;;  %v4326_v15 = vpack.c.bf16 %v1335_v14, %v1334_v13  ;;  %v1337_v19 = vld [vmem:[#allocation5 + $0x98] sm:$0xff]  ;;  %v263_v22 = vld [vmem:[%s4849_s26 + $0x1c0] sm:$0xff] }
  0x72   : > { %v262_v20 = vld [vmem:[%s4849_s26 + $0x1b8] sm:$0xff]  ;;  %v1338_v23 = vld [vmem:[#allocation5 + $0xa0] sm:$0xff] }
  0x73   : > { %4327 = vmatprep.subr.bf16.mxu1 %v4326_v15 }
  0x74   : > { %4321 = vmatpush3.bf16.msra.mxu0 %v4318_v21  ;;  %4329 = vmatpush3.bf16.msra.mxu1 %v4326_v15  ;;  %v4330_v21 = vpack.c.bf16 %v1337_v19, %v1336_v18 }
  0x75   : > { %4323 = vmatprep.subr.bf16.mxu0 %v4322_v24 }
  0x76   : > { %4331 = vmatprep.subr.bf16.mxu1 %v4330_v21 }
  0x78   : > { %4325 = vmatpush3.bf16.msra.mxu0 %v4322_v24  ;;  %4333 = vmatpush3.bf16.msra.mxu1 %v4330_v21  ;;  %v1339_v24 = vld [vmem:[#allocation5 + $0xa8] sm:$0xff] }
  0x7b   : > { %3815 = vmatmul.mubr.f32.vlgmr.msra.gmra.mrb[0].mxu0 %v208_v25  ;;  %v264_v25 = vld [vmem:[%s4849_s26 + $0x1c8] sm:$0xff] }
  0x7c   : > { %3817 = vmatprep.mubr.f32.mxu0 %v209_v26  ;;  %v4334_v26 = vpack.c.bf16 %v1339_v24, %v1338_v23 }
  0x7e   : > { %4335 = vmatprep.subr.bf16.mxu1 %v4334_v26 }
  0x7f   : > { %3818 = vmatmul.mubr.f32.gmra.mrb[2].mxu0 %v210_v27  ;;  %v265_v27 = vld [vmem:[%s4849_s26 + $0x1d0] sm:$0xff]  ;;  %4337 = vmatpush3.bf16.msra.mxu1 %v4334_v26 }
  0x80   : > { %3820 = vmatprep.mubr.f32.mxu0 %v211_v28  ;;  %v266_v28 = vld [vmem:[%s4849_s26 + $0x1d8] sm:$0xff] }
  0x83   : > { %3821 = vmatmul.mubr.f32.gmra.mrb[4].mxu0 %v212_v29  ;;  %v267_v29 = vld [vmem:[%s4849_s26 + $0x1e0] sm:$0xff] }
  0x84   : > { %3823 = vmatprep.mubr.f32.mxu0 %v213_v30  ;;  %v1340_v30 = vld [vmem:[#allocation5 + $0xb0] sm:$0xff] }
  0x87   : > { %3824 = vmatmul.mubr.f32.gmra.mrb[6].mxu0 %v214_v31  ;;  %v1341_v31 = vld [vmem:[#allocation5 + $0xb8] sm:$0xff] }
  0x88   : > { %3826 = vmatprep.mubr.f32.mxu0 %v215_v32  ;;  %v4338_v32 = vpack.c.bf16 %v1341_v31, %v1340_v30 }
  0x8a   : > { %4339 = vmatprep.subr.bf16.mxu1 %v4338_v32 }
  0x8b   : > { %3827 = vmatmul.mubr.f32.gmra.mrb[8].mxu0 %v216_v33  ;;  %v268_v33 = vld [vmem:[%s4849_s26 + $0x1e8] sm:$0xff]  ;;  %4341 = vmatpush3.bf16.msra.mxu1 %v4338_v32 }
  0x8c   : > { %3829 = vmatprep.mubr.f32.mxu0 %v217_v34  ;;  %v269_v34 = vld [vmem:[%s4849_s26 + $0x1f0] sm:$0xff] }
  0x8f   : > { %3830 = vmatmul.mubr.f32.gmra.mrb[10].mxu0 %v218_v35  ;;  %v1342_v35 = vld [vmem:[#allocation5 + $0xc0] sm:$0xff] }
  0x90   : > { %3832 = vmatprep.mubr.f32.mxu0 %v219_v36  ;;  %v1343_v36 = vld [vmem:[#allocation5 + $0xc8] sm:$0xff] }
  0x93   : > { %3833 = vmatmul.mubr.f32.gmra.mrb[12].mxu0 %v220_v37  ;;  %v4342_v37 = vpack.c.bf16 %v1343_v36, %v1342_v35 }
  0x94   : > { %3835 = vmatprep.mubr.f32.mxu0 %v221_v38  ;;  %v270_v38 = vld [vmem:[%s4849_s26 + $0x1f8] sm:$0xff] }
  0x95   : > { %4343 = vmatprep.subr.bf16.mxu1 %v4342_v37 }
  0x96   : > { %4345 = vmatpush3.bf16.msra.mxu1 %v4342_v37 }
  0x97   : > { %3836 = vmatmul.mubr.f32.gmra.mrb[14].mxu0 %v222_v39  ;;  %v1344_v39 = vld [vmem:[#allocation5 + $0xd0] sm:$0xff] }
  0x98   : > { %3838 = vmatprep.mubr.f32.mxu0 %v223_v40  ;;  %v1345_v40 = vld [vmem:[#allocation5 + $0xd8] sm:$0xff] }
  0x9b   : > { %3839 = vmatmul.mubr.f32.gmra.mrb[16].mxu0 %v224_v41  ;;  %v4346_v41 = vpack.c.bf16 %v1345_v40, %v1344_v39 }
  0x9c   : > { %3841 = vmatprep.mubr.f32.mxu0 %v225_v42  ;;  %v1346_v42 = vld [vmem:[#allocation5 + $0xe0] sm:$0xff] }
  0x9d   : > { %4347 = vmatprep.subr.bf16.mxu1 %v4346_v41 }
  0x9e   : > { %4349 = vmatpush3.bf16.msra.mxu1 %v4346_v41 }
  0x9f   : > { %3842 = vmatmul.mubr.f32.gmra.mrb[18].mxu0 %v226_v43  ;;  %v1347_v43 = vld [vmem:[#allocation5 + $0xe8] sm:$0xff] }
  0xa0   : > { %3844 = vmatprep.mubr.f32.mxu0 %v227_v44  ;;  %v4350_v44 = vpack.c.bf16 %v1347_v43, %v1346_v42 }
  0xa2   : > { %4351 = vmatprep.subr.bf16.mxu1 %v4350_v44 }
  0xa3   : > { %3845 = vmatmul.mubr.f32.gmra.mrb[20].mxu0 %v228_v45  ;;  %4353 = vmatpush3.bf16.msra.mxu1 %v4350_v44  ;;  %v1348_v45 = vld [vmem:[#allocation5 + $0xf0] sm:$0xff] }
  0xa4   : > { %3847 = vmatprep.mubr.f32.mxu0 %v229_v46  ;;  %v1349_v46 = vld [vmem:[#allocation5 + $0xf8] sm:$0xff] }
  0xa7   : > { %3848 = vmatmul.mubr.f32.gmra.mrb[22].mxu0 %v230_v47  ;;  %v4354_v47 = vpack.c.bf16 %v1349_v46, %v1348_v45 }
  0xa8   : > { %3850 = vmatprep.mubr.f32.mxu0 %v231_v48  ;;  %v4926_v48 = vld [vmem:[%s6711_s2] ss:$0 sm:$0xff] }
  0xa9   : > { %4355 = vmatprep.subr.bf16.mxu1 %v4354_v47 }
  0xaa   : > { %4357 = vmatpush3.bf16.msra.mxu1 %v4354_v47 }
  0xab   : > { %3851 = vmatmul.mubr.f32.gmra.mrb[24].mxu0 %v232_v49 }
  0xac   : > { %3853 = vmatprep.mubr.f32.mxu0 %v233_v50 }
  0xaf   : > { %3854 = vmatmul.mubr.f32.gmra.mrb[26].mxu0 %v234_v51 }
  0xb0   : > { %3856 = vmatprep.mubr.f32.mxu0 %v235_v52 }
  0xb3   : > { %3857 = vmatmul.mubr.f32.gmra.mrb[28].mxu0 %v236_v53 }
  0xb4   : > { %3859 = vmatprep.mubr.f32.mxu0 %v237_v54 }
  0xb7   : > { %3860 = vmatmul.mubr.f32.gmra.mrb[30].mxu0 %v238_v55 }
  0xb8   : > { %3862 = vmatprep.mubr.f32.mxu0 %v239_v56 }
  0xbb   : > { %3863 = vmatmul.mubr.f32.gmra.mrb[32].mxu0 %v240_v57 }
  0xbc   : > { %3865 = vmatprep.mubr.f32.mxu0 %v241_v58 }
  0xbf   : > { %3866 = vmatmul.mubr.f32.gmra.mrb[34].mxu0 %v242_v59 }
  0xc0   : > { %3868 = vmatprep.mubr.f32.mxu0 %v243_v60 }
  0xc3   : > { %3869 = vmatmul.mubr.f32.gmra.mrb[36].mxu0 %v244_v61 }
  0xc4   : > { %3871 = vmatprep.mubr.f32.mxu0 %v245_v62 }
  0xc7   : > { %3872 = vmatmul.mubr.f32.gmra.mrb[38].mxu0 %v246_v63 }
  0xc8   : > { %3874 = vmatprep.mubr.f32.mxu0 %v247_v0 }
  0xcb   : > { %3875 = vmatmul.mubr.f32.gmra.mrb[40].mxu0 %v248_v1 }
  0xcc   : > { %3877 = vmatprep.mubr.f32.mxu0 %v249_v2 }
  0xcf   : > { %3878 = vmatmul.mubr.f32.gmra.mrb[42].mxu0 %v250_v3 }
  0xd0   : > { %3880 = vmatprep.mubr.f32.mxu0 %v251_v4 }
  0xd3   : > { %3881 = vmatmul.mubr.f32.gmra.mrb[44].mxu0 %v252_v5 }
  0xd4   : > { %3883 = vmatprep.mubr.f32.mxu0 %v253_v6 }
  0xd7   : > { %3884 = vmatmul.mubr.f32.gmra.mrb[46].mxu0 %v254_v7 }
  0xd8   : > { %3886 = vmatprep.mubr.f32.mxu0 %v255_v8 }
  0xdb   : > { %3887 = vmatmul.mubr.f32.gmra.mrb[48].mxu0 %v256_v9 }
  0xdc   : > { %3889 = vmatprep.mubr.f32.mxu0 %v257_v10 }
  0xdf   : > { %3890 = vmatmul.mubr.f32.gmra.mrb[50].mxu0 %v258_v11 }
  0xe0   : > { %3892 = vmatprep.mubr.f32.mxu0 %v259_v12 }
  0xe3   : > { %3893 = vmatmul.mubr.f32.gmra.mrb[52].mxu0 %v260_v16 }
  0xe4   : > { %3895 = vmatprep.mubr.f32.mxu0 %v261_v17 }
  0xe7   : > { %3896 = vmatmul.mubr.f32.gmra.mrb[54].mxu0 %v262_v20 }
  0xe8   : > { %3898 = vmatprep.mubr.f32.mxu0 %v263_v22 }
  0xeb   : > { %3899 = vmatmul.mubr.f32.gmra.mrb[56].mxu0 %v264_v25 }
  0xec   : > { %3901 = vmatprep.mubr.f32.mxu0 %v265_v27 }
  0xef   : > { %3902 = vmatmul.mubr.f32.gmra.mrb[58].mxu0 %v266_v28 }
  0xf0   : > { %3904 = vmatprep.mubr.f32.mxu0 %v267_v29 }
  0xf3   : > { %3905 = vmatmul.mubr.f32.gmra.mrb[60].mxu0 %v268_v33 }
  0xf4   : > { %3907 = vmatprep.mubr.f32.mxu0 %v269_v34 }
  0xf7   : > { %3908 = vmatmul.mubr.f32.gmra.mrb[62].mxu0 %v270_v38 }
 0x14e   : > { %v3816_v49 = vpop.f32.mrb[0].mxu0 }
 0x14f   : > { %v364_v50 = vadd.f32 %v3816_v49, %v4926_v48  ;;  %v358_v51 = vpop.f32.mrb[1].mxu0 }
 0x150   : > { %v359_v52 = vadd.f32 %v4926_v48, %v358_v51 }
 0x151   : > { %v4930_v53 = vmax.f32 %v364_v50, 0.0 }
 0x152   : > { %v4932_v54 = vmax.f32 %v359_v52, 0.0  ;;  %v3819_v55 = vpop.f32.mrb[2].mxu0 }
 0x153   : > { %v886_v56 = vmul.f32 %v4930_v53, %v4930_v53  ;;  %v374_v57 = vadd.f32 %v3819_v55, %v4926_v48  ;;  %v368_v58 = vpop.f32.mrb[3].mxu0 }
 0x154   : > { %v741_v59 = vadd.f32 %v4930_v53, %v4932_v54  ;;  %v885_v60 = vmul.f32 %v4932_v54, %v4932_v54  ;;  %v369_v61 = vadd.f32 %v4926_v48, %v368_v58 }
 0x155   : > { %v4942_v63 = vmax.f32 %v374_v57, 0.0 }
 0x156   : > { %v949_v62 = vadd.f32 %v886_v56, %v885_v60  ;;  %v4944_v0 = vmax.f32 %v369_v61, 0.0  ;;  %v3822_v1 = vpop.f32.mrb[4].mxu0 }
 0x157   : > { %v384_v2 = vadd.f32 %v3822_v1, %v4926_v48  ;;  %v378_v3 = vpop.f32.mrb[5].mxu0  ;;  %v888_v8 = vmul.f32 %v4942_v63, %v4942_v63 }
 0x158   : > { %v742_v4 = vadd.f32 %v741_v59, %v4944_v0  ;;  %v887_v5 = vmul.f32 %v4944_v0, %v4944_v0  ;;  %v379_v6 = vadd.f32 %v4926_v48, %v378_v3 }
 0x159   : > { %v4951_v7 = vmax.f32 %v384_v2, 0.0 }
 0x15a   : > { %v743_v9 = vadd.f32 %v742_v4, %v4942_v63  ;;  %v950_v10 = vadd.f32 %v949_v62, %v887_v5  ;;  %v4956_v11 = vmax.f32 %v379_v6, 0.0  ;;  %v3825_v12 = vpop.f32.mrb[6].mxu0 }
 0x15b   : > { %v890_v13 = vmul.f32 %v4951_v7, %v4951_v7  ;;  %v394_v14 = vadd.f32 %v3825_v12, %v4926_v48  ;;  %v388_v15 = vpop.f32.mrb[7].mxu0 }
 0x15c   : > { %v744_v16 = vrot.slane %v743_v9, 4  ;;  %v951_v17 = vadd.f32 %v950_v10, %v888_v8  ;;  %v750_v18 = vadd.f32 %v4951_v7, %v4956_v11  ;;  %v889_v19 = vmul.f32 %v4956_v11, %v4956_v11 }
 0x15d   : > { %v389_v20 = vadd.f32 %v4926_v48, %v388_v15  ;;  %v4966_v24 = vmax.f32 %v394_v14, 0.0 }
 0x15e   : > { %v745_v21 = vadd.f32 %v744_v16, %v743_v9  ;;  %v952_v22 = vrot.slane %v951_v17, 4  ;;  %v958_v23 = vadd.f32 %v890_v13, %v889_v19  ;;  %v3828_v25 = vpop.f32.mrb[8].mxu0 }
 0x15f   : > { %v4968_v26 = vmax.f32 %v389_v20, 0.0  ;;  %v404_v27 = vadd.f32 %v3828_v25, %v4926_v48  ;;  %v398_v28 = vpop.f32.mrb[9].mxu0  ;;  %v892_v37 = vmul.f32 %v4966_v24, %v4966_v24 }
 0x160   : > { %v746_v29 = vrot.slane %v745_v21, 2  ;;  %v953_v30 = vadd.f32 %v952_v22, %v951_v17  ;;  %v399_v31 = vadd.f32 %v4926_v48, %v398_v28 }
 0x161   : > { %v751_v32 = vadd.f32 %v750_v18, %v4968_v26  ;;  %v891_v33 = vmul.f32 %v4968_v26, %v4968_v26  ;;  %v4975_v34 = vmax.f32 %v404_v27, 0.0 }
 0x162   : > { %v747_v35 = vadd.f32 %v746_v29, %v745_v21  ;;  %v954_v36 = vrot.slane %v953_v30, 2  ;;  %v4979_v38 = vmax.f32 %v399_v31, 0.0  ;;  %v3831_v39 = vpop.f32.mrb[10].mxu0 }
 0x163   : > { %v752_v40 = vadd.f32 %v751_v32, %v4966_v24  ;;  %v959_v41 = vadd.f32 %v958_v23, %v891_v33  ;;  %v894_v42 = vmul.f32 %v4975_v34, %v4975_v34  ;;  %v414_v43 = vadd.f32 %v3831_v39, %v4926_v48  ;;  %v408_v44 = vpop.f32.mrb[11].mxu0 }
 0x164   : > { %v748_v45 = vrot.slane %v747_v35, 1  ;;  %v955_v46 = vadd.f32 %v954_v36, %v953_v30  ;;  %v759_v47 = vadd.f32 %v4975_v34, %v4979_v38  ;;  %v893_v49 = vmul.f32 %v4979_v38, %v4979_v38 }
 0x165   : > { %v753_v50 = vrot.slane %v752_v40, 4  ;;  %v960_v51 = vadd.f32 %v959_v41, %v892_v37  ;;  %v4989_v52 = vmax.f32 %v414_v43, 0.0  ;;  %v409_v55 = vadd.f32 %v4926_v48, %v408_v44 }
 0x166   : > { %v749_v56 = vadd.f32 %v748_v45, %v747_v35  ;;  %v956_v57 = vrot.slane %v955_v46, 1  ;;  %v967_v58 = vadd.f32 %v894_v42, %v893_v49  ;;  %v3834_v59 = vpop.f32.mrb[12].mxu0 }
 0x167   : > { %v754_v60 = vadd.f32 %v753_v50, %v752_v40  ;;  %v961_v61 = vrot.slane %v960_v51, 4  ;;  %v896_v62 = vmul.f32 %v4989_v52, %v4989_v52  ;;  %v4994_v1 = vmax.f32 %v409_v55, 0.0  ;;  %v418_v2 = vpop.f32.mrb[13].mxu0 }
 0x168   : > { %v957_v3 = vadd.f32 %v956_v57, %v955_v46  ;;  %v4996_v4 = vmul.f32 0.03125, %v749_v56  ;;  %v424_v5 = vadd.f32 %v3834_v59, %v4926_v48  ;;  %v419_v6 = vadd.f32 %v4926_v48, %v418_v2 }
 0x169   : > { %v755_v8 = vrot.slane %v754_v60, 2  ;;  %v962_v9 = vadd.f32 %v961_v61, %v960_v51  ;;  %v760_v10 = vadd.f32 %v759_v47, %v4994_v1  ;;  %v895_v12 = vmul.f32 %v4994_v1, %v4994_v1 }
 0x16a   : > { %v1109_v13 = vmul.f32 0.03125, %v957_v3  ;;  %v1125_v14 = vmul.f32 %v4996_v4, %v4996_v4  ;;  %v1175_v15 = vsub.f32 %v4944_v0, %v4996_v4  ;;  %v5007_v16 = vmax.f32 %v424_v5, 0.0  ;;  %v3837_v17 = vpop.f32.mrb[14].mxu0 }
 0x16b   : > { %v756_v18 = vadd.f32 %v755_v8, %v754_v60  ;;  %v963_v19 = vrot.slane %v962_v9, 2  ;;  %v761_v20 = vadd.f32 %v760_v10, %v4989_v52  ;;  %v968_v21 = vadd.f32 %v967_v58, %v895_v12  ;;  %v428_v22 = vpop.f32.mrb[15].mxu0 }
 0x16c   : > { %v1141_v23 = vsub.f32 %v1109_v13, %v1125_v14  ;;  %v898_v25 = vmul.f32 %v5007_v16, %v5007_v16  ;;  %v5012_v27 = vmax.f32 %v419_v6, 0.0  ;;  %v434_v28 = vadd.f32 %v3837_v17, %v4926_v48 }
 0x16d   : > { %v757_v29 = vrot.slane %v756_v18, 1  ;;  %v964_v30 = vadd.f32 %v963_v19, %v962_v9  ;;  %v762_v31 = vrot.slane %v761_v20, 4  ;;  %v969_v32 = vadd.f32 %v968_v21, %v896_v62 }
 0x16e   : > { %v1157_v33 = vmax.f32 %v1141_v23, 0.0  ;;  %v768_v35 = vadd.f32 %v5007_v16, %v5012_v27  ;;  %v897_v36 = vmul.f32 %v5012_v27, %v5012_v27  ;;  %v5019_v37 = vmax.f32 %v434_v28, 0.0  ;;  %v3840_v39 = vpop.f32.mrb[16].mxu0 }
 0x16f   : > { %v758_v40 = vadd.f32 %v757_v29, %v756_v18  ;;  %v965_v41 = vrot.slane %v964_v30, 1  ;;  %v763_v42 = vadd.f32 %v762_v31, %v761_v20  ;;  %v970_v43 = vrot.slane %v969_v32, 4  ;;  %v438_v44 = vpop.f32.mrb[17].mxu0 }
 0x170   : > { %v1237_v45 = vadd.f32 1e-05, %v1157_v33  ;;  %v976_v46 = vadd.f32 %v898_v25, %v897_v36  ;;  %v900_v47 = vmul.f32 %v5019_v37, %v5019_v37  ;;  %v429_v49 = vadd.f32 %v4926_v48, %v428_v22 }
 0x171   : > { %v966_v50 = vadd.f32 %v965_v41, %v964_v30  ;;  %v5024_v51 = vmul.f32 0.03125, %v758_v40  ;;  %v764_v55 = vrot.slane %v763_v42, 2  ;;  %v971_v56 = vadd.f32 %v970_v43, %v969_v32 }
 0x172   : > { %4483 = vrsqrt.f32 %v1237_v45  ;;  %v5026_v57 = vmax.f32 %v429_v49, 0.0  ;;  %v444_v58 = vadd.f32 %v3840_v39, %v4926_v48  ;;  %v439_v59 = vadd.f32 %v4926_v48, %v438_v44  ;;  %v3843_v60 = vpop.f32.mrb[18].mxu0 }
 0x173   : > { %v1110_v61 = vmul.f32 0.03125, %v966_v50  ;;  %v1126_v62 = vmul.f32 %v5024_v51, %v5024_v51  ;;  %v1179_v2 = vsub.f32 %v4968_v26, %v5024_v51  ;;  %v765_v3 = vadd.f32 %v764_v55, %v763_v42  ;;  %v448_v5 = vpop.f32.mrb[19].mxu0 }
 0x174   : > { %v972_v6 = vrot.slane %v971_v56, 2  ;;  %v769_v8 = vadd.f32 %v768_v35, %v5026_v57  ;;  %v899_v9 = vmul.f32 %v5026_v57, %v5026_v57  ;;  %v5037_v10 = vmax.f32 %v444_v58, 0.0 }
 0x175   : > { %v1142_v12 = vsub.f32 %v1110_v61, %v1126_v62  ;;  %v766_v13 = vrot.slane %v765_v3, 1  ;;  %v5039_v14 = vmax.f32 %v439_v59, 0.0  ;;  %v454_v17 = vadd.f32 %v3843_v60, %v4926_v48 }
 0x176   : > { %v973_v18 = vadd.f32 %v972_v6, %v971_v56  ;;  %v770_v19 = vadd.f32 %v769_v8, %v5019_v37  ;;  %v977_v20 = vadd.f32 %v976_v46, %v899_v9  ;;  %v902_v21 = vmul.f32 %v5037_v10, %v5037_v10  ;;  %v3846_v22 = vpop.f32.mrb[20].mxu0 }
 0x177   : > { %v1158_v23 = vmax.f32 %v1142_v12, 0.0  ;;  %v767_v25 = vadd.f32 %v766_v13, %v765_v3  ;;  %v777_v28 = vadd.f32 %v5037_v10, %v5039_v14  ;;  %v901_v29 = vmul.f32 %v5039_v14, %v5039_v14  ;;  %v458_v30 = vpop.f32.mrb[21].mxu0 }
 0x178   : > { %v974_v31 = vrot.slane %v973_v18, 1  ;;  %v771_v32 = vrot.slane %v770_v19, 4  ;;  %v978_v33 = vadd.f32 %v977_v20, %v900_v47  ;;  %v5049_v35 = vmax.f32 %v454_v17, 0.0 }
 0x179   : > { %v1238_v36 = vadd.f32 1e-05, %v1158_v23  ;;  %v5051_v39 = vmul.f32 0.03125, %v767_v25  ;;  %v985_v40 = vadd.f32 %v902_v21, %v901_v29  ;;  %v449_v41 = vadd.f32 %v4926_v48, %v448_v5 }
 0x17a   : > { %v975_v42 = vadd.f32 %v974_v31, %v973_v18  ;;  %v772_v43 = vadd.f32 %v771_v32, %v770_v19  ;;  %v979_v44 = vrot.slane %v978_v33, 4  ;;  %v904_v45 = vmul.f32 %v5049_v35, %v5049_v35  ;;  %v3849_v46 = vpop.f32.mrb[22].mxu0 }
 0x17b   : > { %4485 = vrsqrt.f32 %v1238_v36  ;;  %v1127_v49 = vmul.f32 %v5051_v39, %v5051_v39  ;;  %v1183_v47 = vsub.f32 %v4994_v1, %v5051_v39  ;;  %v5060_v50 = vmax.f32 %v449_v41, 0.0  ;;  %v468_v55 = vpop.f32.mrb[23].mxu0 }
 0x17c   : > { %v5062_v56 = vpop.eup %4483  ;;  %v1111_v58 = vmul.f32 0.03125, %v975_v42  ;;  %v773_v59 = vrot.slane %v772_v43, 2  ;;  %v980_v60 = vadd.f32 %v979_v44, %v978_v33  ;;  %v464_v61 = vadd.f32 %v3846_v22, %v4926_v48 }
 0x17d   : > { %v778_v62 = vadd.f32 %v777_v28, %v5060_v50  ;;  %v903_v3 = vmul.f32 %v5060_v50, %v5060_v50  ;;  %v459_v5 = vadd.f32 %v4926_v48, %v458_v30  ;;  %v474_v6 = vadd.f32 %v3849_v46, %v4926_v48 }
 0x17e   : > { %v1143_v8 = vsub.f32 %v1111_v58, %v1127_v49  ;;  %v774_v9 = vadd.f32 %v773_v59, %v772_v43  ;;  %v981_v12 = vrot.slane %v980_v60, 2  ;;  %v5070_v13 = vmax.f32 %v464_v61, 0.0  ;;  %v3852_v17 = vpop.f32.mrb[24].mxu0 }
 0x17f   : > { %v779_v18 = vadd.f32 %v778_v62, %v5049_v35  ;;  %v986_v19 = vadd.f32 %v985_v40, %v903_v3  ;;  %v5073_v20 = vmax.f32 %v459_v5, 0.0  ;;  %v5075_v21 = vmax.f32 %v474_v6, 0.0  ;;  %v478_v22 = vpop.f32.mrb[25].mxu0 }
 0x180   : > { %v1159_v23 = vmax.f32 %v1143_v8, 0.0  ;;  %v775_v25 = vrot.slane %v774_v9, 1  ;;  %v982_v28 = vadd.f32 %v981_v12, %v980_v60  ;;  %v906_v29 = vmul.f32 %v5070_v13, %v5070_v13 }
 0x181   : > { %v780_v30 = vrot.slane %v779_v18, 4  ;;  %v987_v31 = vadd.f32 %v986_v19, %v904_v45  ;;  %v786_v32 = vadd.f32 %v5070_v13, %v5073_v20  ;;  %v905_v33 = vmul.f32 %v5073_v20, %v5073_v20 }
 0x182   : > { %v1239_v36 = vadd.f32 1e-05, %v1159_v23  ;;  %v776_v40 = vadd.f32 %v775_v25, %v774_v9  ;;  %v983_v41 = vrot.slane %v982_v28, 1  ;;  %v908_v42 = vmul.f32 %v5075_v21, %v5075_v21  ;;  %v3855_v43 = vpop.f32.mrb[26].mxu0 }
 0x183   : > { %v781_v44 = vadd.f32 %v780_v30, %v779_v18  ;;  %v988_v46 = vrot.slane %v987_v31, 4  ;;  %v994_v49 = vadd.f32 %v906_v29, %v905_v33  ;;  %v469_v58 = vadd.f32 %v4926_v48, %v468_v55  ;;  %v488_v59 = vpop.f32.mrb[27].mxu0 }
 0x184   : > { %4487 = vrsqrt.f32 %v1239_v36  ;;  %v984_v45 = vadd.f32 %v983_v41, %v982_v28  ;;  %v5086_v60 = vmul.f32 0.03125, %v776_v40  ;;  %v484_v61 = vadd.f32 %v3852_v17, %v4926_v48 }
 0x185   : > { %v5089_v62 = vpop.eup %4485  ;;  %v782_v3 = vrot.slane %v781_v44, 2  ;;  %v989_v5 = vadd.f32 %v988_v46, %v987_v31  ;;  %v5091_v6 = vmax.f32 %v469_v58, 0.0  ;;  %v479_v8 = vadd.f32 %v4926_v48, %v478_v22 }
 0x186   : > { %v1112_v9 = vmul.f32 0.03125, %v984_v45  ;;  %v1128_v12 = vmul.f32 %v5086_v60, %v5086_v60  ;;  %v5098_v18 = vmax.f32 %v484_v61, 0.0  ;;  %v3858_v19 = vpop.f32.mrb[28].mxu0  ;;  %v1173_v33 = vsub.f32 %v4932_v54, %v4996_v4 }
 0x187   : > { %v783_v23 = vadd.f32 %v782_v3, %v781_v44  ;;  %v990_v17 = vrot.slane %v989_v5, 2  ;;  %v787_v25 = vadd.f32 %v786_v32, %v5091_v6  ;;  %v907_v28 = vmul.f32 %v5091_v6, %v5091_v6  ;;  %v498_v29 = vpop.f32.mrb[29].mxu0 }
 0x188   : > { %v1144_v30 = vsub.f32 %v1112_v9, %v1128_v12  ;;  %v910_v22 = vmul.f32 %v5098_v18, %v5098_v18  ;;  %v5105_v31 = vmax.f32 %v479_v8, 0.0  ;;  %v1269_v45 = vmul.f32 %v5062_v56, %v1173_v33 }
 0x189   : > { %v784_v36 = vrot.slane %v783_v23, 1  ;;  %v991_v40 = vadd.f32 %v990_v17, %v989_v5  ;;  %v788_v41 = vadd.f32 %v787_v25, %v5075_v21  ;;  %v995_v44 = vadd.f32 %v994_v49, %v907_v28 }
 0x18a   : > { %v1160_v46 = vmax.f32 %v1144_v30, 0.0  ;;  %v795_v32 = vadd.f32 %v5098_v18, %v5105_v31  ;;  %v909_v58 = vmul.f32 %v5105_v31, %v5105_v31  ;;  %v5115_v61 = vpop.f32.mrb[30].mxu0  ;;  %3942 = vmatprep.mubr.f32.mxu1 %v1269_v45  ;;  %v1174_v49 = vsub.f32 %v4930_v53, %v4996_v4 }
 0x18b   : > { %v785_v3 = vadd.f32 %v784_v36, %v783_v23  ;;  %v992_v8 = vrot.slane %v991_v40, 1  ;;  %v789_v9 = vrot.slane %v788_v41, 4  ;;  %v996_v54 = vadd.f32 %v995_v44, %v908_v42  ;;  %v5117_v12 = vpop.f32.mrb[31].mxu0 }
 0x18c   : > { %v1240_v5 = vadd.f32 1e-05, %v1160_v46  ;;  %v1003_v17 = vadd.f32 %v910_v22, %v909_v58  ;;  %v1271_v25 = vmul.f32 %v5062_v56, %v1175_v15  ;;  %v1270_v42 = vmul.f32 %v5062_v56, %v1174_v49 }
 0x18d   : > { %v993_v28 = vadd.f32 %v992_v8, %v991_v40  ;;  %v5125_v30 = vmul.f32 0.03125, %v785_v3  ;;  %v790_v23 = vadd.f32 %v789_v9, %v788_v41  ;;  %v997_v33 = vrot.slane %v996_v54, 4 }
 0x18e   : > { %v5127_v36 = vpop.eup %4487  ;;  %4489 = vrsqrt.f32 %v1240_v5  ;;  %v494_v22 = vadd.f32 %v3855_v43, %v4926_v48  ;;  %v489_v44 = vadd.f32 %v4926_v48, %v488_v59  ;;  %v5132_v53 = vpop.f32.mrb[32].mxu0  ;;  %3943 = vmatmul.mubr.f32.vlgmr.msra.gmra.mrb[0].mxu1 %v1270_v42  ;;  %v1176_v43 = vsub.f32 %v4942_v63, %v4996_v4 }
 0x18f   : > { %v1113_v46 = vmul.f32 0.03125, %v993_v28  ;;  %v1129_v0 = vmul.f32 %v5125_v30, %v5125_v30  ;;  %v791_v40 = vrot.slane %v790_v23, 2  ;;  %v5138_v41 = vpop.f32.mrb[33].mxu0  ;;  %v998_v58 = vadd.f32 %v997_v33, %v996_v54  ;;  %3945 = vmatprep.mubr.f32.mxu1 %v1271_v25 }
 0x190   : > { %v5140_v45 = vmax.f32 %v494_v22, 0.0  ;;  %v5142_v3 = vmax.f32 %v489_v44, 0.0  ;;  %v504_v9 = vadd.f32 %v3858_v19, %v4926_v48  ;;  %v499_v5 = vadd.f32 %v4926_v48, %v498_v29 }
 0x191   : > { %v1145_v59 = vsub.f32 %v1113_v46, %v1129_v0  ;;  %v792_v8 = vadd.f32 %v791_v40, %v790_v23  ;;  %v999_v49 = vrot.slane %v998_v58, 2  ;;  %v1272_v4 = vmul.f32 %v5062_v56, %v1176_v43 }
 0x192   : > { %v912_v28 = vmul.f32 %v5140_v45, %v5140_v45  ;;  %v796_v54 = vadd.f32 %v795_v32, %v5142_v3  ;;  %v911_v33 = vmul.f32 %v5142_v3, %v5142_v3  ;;  %v5153_v42 = vpop.f32.mrb[34].mxu0  ;;  %v5156_v25 = vmax.f32 %v504_v9, 0.0 }
 0x193   : > { %v1161_v22 = vmax.f32 %v1145_v59, 0.0  ;;  %v793_v63 = vrot.slane %v792_v8, 1  ;;  %v5158_v19 = vpop.f32.mrb[35].mxu0  ;;  %v1000_v29 = vadd.f32 %v999_v49, %v998_v58  ;;  %v5161_v46 = vmax.f32 %v499_v5, 0.0  ;;  %3946 = vmatmul.mubr.f32.gmra.mrb[2].mxu1 %v1272_v4 }
 0x194   : > { %v797_v23 = vadd.f32 %v796_v54, %v5140_v45  ;;  %v1004_v44 = vadd.f32 %v1003_v17, %v911_v33  ;;  %v914_v40 = vmul.f32 %v5156_v25, %v5156_v25  ;;  %v1177_v59 = vsub.f32 %v4956_v11, %v5024_v51 }
 0x195   : > { %v1241_v32 = vadd.f32 1e-05, %v1161_v22  ;;  %v794_v0 = vadd.f32 %v793_v63, %v792_v8  ;;  %v1001_v56 = vrot.slane %v1000_v29, 1  ;;  %v804_v58 = vadd.f32 %v5156_v25, %v5161_v46 }
 0x196   : > { %v798_v43 = vrot.slane %v797_v23, 4  ;;  %v1005_v9 = vadd.f32 %v1004_v44, %v912_v28  ;;  %v5169_v49 = vpop.f32.mrb[36].mxu0  ;;  %v913_v8 = vmul.f32 %v5161_v46, %v5161_v46  ;;  %v1273_v5 = vmul.f32 %v5089_v62, %v1177_v59 }
 0x197   : > { %4491 = vrsqrt.f32 %v1241_v32  ;;  %v5171_v17 = vmul.f32 0.03125, %v794_v0  ;;  %v5176_v54 = vpop.f32.mrb[37].mxu0  ;;  %v1002_v11 = vadd.f32 %v1001_v56, %v1000_v29  ;;  %v1178_v63 = vsub.f32 %v4951_v7, %v5024_v51 }
 0x198   : > { %v5178_v33 = vpop.eup %4489  ;;  %v799_v22 = vadd.f32 %v798_v43, %v797_v23  ;;  %v1006_v28 = vrot.slane %v1005_v9, 4  ;;  %v1012_v32 = vadd.f32 %v914_v40, %v913_v8  ;;  %3948 = vmatprep.mubr.f32.mxu1 %v1273_v5  ;;  %v1275_v0 = vmul.f32 %v5089_v62, %v1179_v2 }
 0x199   : > { %v1130_v4 = vmul.f32 %v5171_v17, %v5171_v17  ;;  %v1114_v59 = vmul.f32 0.03125, %v1002_v11  ;;  %v1274_v56 = vmul.f32 %v5089_v62, %v1178_v63  ;;  %v514_v7 = vadd.f32 %v5115_v61, %v4926_v48 }
 0x19a   : > { %v800_v29 = vrot.slane %v799_v22, 2  ;;  %v1007_v23 = vadd.f32 %v1006_v28, %v1005_v9  ;;  %v5191_v43 = vpop.f32.mrb[38].mxu0  ;;  %v509_v44 = vadd.f32 %v4926_v48, %v5117_v12  ;;  %v1180_v40 = vsub.f32 %v4966_v24, %v5024_v51 }
 0x19b   : > { %v524_v26 = vadd.f32 %v5132_v53, %v4926_v48  ;;  %v5201_v2 = vpop.f32.mrb[39].mxu0  ;;  %v1146_v8 = vsub.f32 %v1114_v59, %v1130_v4  ;;  %3949 = vmatmul.mubr.f32.gmra.mrb[4].mxu1 %v1274_v56  ;;  %v519_v11 = vadd.f32 %v4926_v48, %v5138_v41  ;;  %v5205_v61 = vmax.f32 %v514_v7, 0.0 }
 0x19c   : > { %v801_v9 = vadd.f32 %v800_v29, %v799_v22  ;;  %v1008_v5 = vrot.slane %v1007_v23, 2  ;;  %3951 = vmatprep.mubr.f32.mxu1 %v1275_v0  ;;  %v5207_v28 = vmax.f32 %v509_v44, 0.0  ;;  %v1276_v12 = vmul.f32 %v5089_v62, %v1180_v40 }
 0x19d   : > { %v5210_v24 = vmax.f32 %v524_v26, 0.0  ;;  %v1162_v51 = vmax.f32 %v1146_v8, 0.0  ;;  %v5212_v15 = vmax.f32 %v519_v11, 0.0  ;;  %v916_v4 = vmul.f32 %v5205_v61, %v5205_v61 }
 0x19e   : > { %v802_v53 = vrot.slane %v801_v9, 1  ;;  %v1009_v63 = vadd.f32 %v1008_v5, %v1007_v23  ;;  %v5214_v22 = vpop.f32.mrb[40].mxu0  ;;  %v805_v41 = vadd.f32 %v804_v58, %v5207_v28  ;;  %v915_v44 = vmul.f32 %v5207_v28, %v5207_v28 }
 0x19f   : > { %v918_v62 = vmul.f32 %v5210_v24, %v5210_v24  ;;  %v5223_v0 = vpop.f32.mrb[41].mxu0  ;;  %v1242_v59 = vadd.f32 1e-05, %v1162_v51  ;;  %3952 = vmatmul.mubr.f32.gmra.mrb[6].mxu1 %v1276_v12  ;;  %v813_v56 = vadd.f32 %v5210_v24, %v5212_v15  ;;  %v917_v26 = vmul.f32 %v5212_v15, %v5212_v15 }
 0x1a0   : > { %v803_v29 = vadd.f32 %v802_v53, %v801_v9  ;;  %v1010_v23 = vrot.slane %v1009_v63, 1  ;;  %v806_v40 = vadd.f32 %v805_v41, %v5205_v61  ;;  %v1013_v58 = vadd.f32 %v1012_v32, %v915_v44 }
 0x1a1   : > { %v5227_v7 = vpop.eup %4491  ;;  %v1181_v8 = vsub.f32 %v4979_v38, %v5051_v39  ;;  %4493 = vrsqrt.f32 %v1242_v59  ;;  %v1182_v9 = vsub.f32 %v4975_v34, %v5051_v39  ;;  %v1021_v55 = vadd.f32 %v918_v62, %v917_v26 }
 0x1a2   : > { %v1011_v5 = vadd.f32 %v1010_v23, %v1009_v63  ;;  %v5234_v11 = vmul.f32 0.03125, %v803_v29  ;;  %v5238_v12 = vpop.f32.mrb[42].mxu0  ;;  %v807_v51 = vrot.slane %v806_v40, 4  ;;  %v1014_v53 = vadd.f32 %v1013_v58, %v916_v4 }
 0x1a3   : > { %v1277_v32 = vmul.f32 %v5127_v36, %v1181_v8  ;;  %v5241_v41 = vpop.f32.mrb[43].mxu0  ;;  %v1278_v59 = vmul.f32 %v5127_v36, %v1182_v9  ;;  %v1279_v4 = vmul.f32 %v5127_v36, %v1183_v47  ;;  %v534_v62 = vadd.f32 %v5153_v42, %v4926_v48 }
 0x1a4   : > { %v1115_v44 = vmul.f32 0.03125, %v1011_v5  ;;  %v1131_v38 = vmul.f32 %v5234_v11, %v5234_v11  ;;  %v808_v29 = vadd.f32 %v807_v51, %v806_v40  ;;  %v1015_v34 = vrot.slane %v1014_v53, 4 }
 0x1a5   : > { %3954 = vmatprep.mubr.f32.mxu1 %v1277_v32  ;;  %v529_v58 = vadd.f32 %v4926_v48, %v5158_v19  ;;  %v1184_v26 = vsub.f32 %v4989_v52, %v5051_v39  ;;  %v544_v40 = vadd.f32 %v5169_v49, %v4926_v48  ;;  %v5262_v47 = vmax.f32 %v534_v62, 0.0 }
 0x1a6   : > { %v1147_v23 = vsub.f32 %v1115_v44, %v1131_v38  ;;  %3955 = vmatmul.mubr.f32.gmra.mrb[8].mxu1 %v1278_v59  ;;  %v5260_v8 = vpop.f32.mrb[44].mxu0  ;;  %v809_v5 = vrot.slane %v808_v29, 2  ;;  %v1016_v1 = vadd.f32 %v1015_v34, %v1014_v53  ;;  %v539_v42 = vadd.f32 %v4926_v48, %v5176_v54 }
 0x1a7   : > { %3957 = vmatprep.mubr.f32.mxu1 %v1279_v4  ;;  %v5266_v9 = vpop.f32.mrb[45].mxu0  ;;  %v5268_v19 = vmax.f32 %v529_v58, 0.0  ;;  %v1280_v52 = vmul.f32 %v5127_v36, %v1184_v26  ;;  %v5271_v39 = vmax.f32 %v544_v40, 0.0  ;;  %v920_v53 = vmul.f32 %v5262_v47, %v5262_v47 }
 0x1a8   : > { %v1163_v51 = vmax.f32 %v1147_v23, 0.0  ;;  %v810_v49 = vadd.f32 %v809_v5, %v808_v29  ;;  %v1017_v32 = vrot.slane %v1016_v1, 2  ;;  %v5275_v44 = vmax.f32 %v539_v42, 0.0 }
 0x1a9   : > { %6732 = vst [vmem:[#allocation11_spill] sm:$0xff] %v5271_v39  ;;  %v814_v59 = vadd.f32 %v813_v56, %v5268_v19  ;;  %v919_v54 = vmul.f32 %v5268_v19, %v5268_v19  ;;  %v922_v34 = vmul.f32 %v5271_v39, %v5271_v39  ;;  %v1185_v5 = vsub.f32 %v5012_v27, %v5086_v60 }
 0x1aa   : > { %6733 = vst [vmem:[#allocation12_spill] sm:$0xff] %v5275_v44  ;;  %v1243_v38 = vadd.f32 1e-05, %v1163_v51  ;;  %3958 = vmatmul.mubr.f32.gmra.mrb[10].mxu1 %v1280_v52  ;;  %v5282_v36 = vpop.f32.mrb[46].mxu0  ;;  %v811_v4 = vrot.slane %v810_v49, 1  ;;  %v1018_v29 = vadd.f32 %v1017_v32, %v1016_v1  ;;  %v822_v62 = vadd.f32 %v5271_v39, %v5275_v44 }
 0x1ab   : > { %v921_v23 = vmul.f32 %v5275_v44, %v5275_v44  ;;  %v5288_v58 = vpop.f32.mrb[47].mxu0  ;;  %v5290_v56 = vpop.eup %4493  ;;  %v815_v26 = vadd.f32 %v814_v59, %v5262_v47  ;;  %v1022_v40 = vadd.f32 %v1021_v55, %v919_v54  ;;  %v1186_v52 = vsub.f32 %v5007_v16, %v5086_v60 }
 0x1ac   : > { %4495 = vrsqrt.f32 %v1243_v38  ;;  %v812_v42 = vadd.f32 %v811_v4, %v810_v49  ;;  %v1019_v51 = vrot.slane %v1018_v29, 1  ;;  %v1281_v39 = vmul.f32 %v5178_v33, %v1185_v5 }
 0x1ad   : > { %v1030_v1 = vadd.f32 %v922_v34, %v921_v23  ;;  %v816_v32 = vrot.slane %v815_v26, 4  ;;  %v1023_v63 = vadd.f32 %v1022_v40, %v920_v53  ;;  %v6734_v44 = vsub.f32 %v5026_v57, %v5086_v60 }
 0x1ae   : > { %v5302_v59 = vpop.f32.mrb[48].mxu0  ;;  %v1020_v55 = vadd.f32 %v1019_v51, %v1018_v29  ;;  %v5304_v54 = vmul.f32 0.03125, %v812_v42  ;;  %v1282_v27 = vmul.f32 %v5178_v33, %v1186_v52  ;;  %v554_v49 = vadd.f32 %v5191_v43, %v4926_v48  ;;  %3960 = vmatprep.mubr.f32.mxu1 %v1281_v39 }
 0x1af   : > { %v1283_v38 = vmul.f32 %v5178_v33, %v6734_v44  ;;  %v5309_v16 = vpop.f32.mrb[49].mxu0  ;;  %v817_v53 = vadd.f32 %v816_v32, %v815_v26  ;;  %v1024_v34 = vrot.slane %v1023_v63, 4  ;;  %v549_v57 = vadd.f32 %v4926_v48, %v5201_v2 }
 0x1b0   : > { %v1188_v44 = vsub.f32 %v5019_v37, %v5086_v60  ;;  %v1116_v4 = vmul.f32 0.03125, %v1020_v55  ;;  %v1132_v29 = vmul.f32 %v5304_v54, %v5304_v54  ;;  %3961 = vmatmul.mubr.f32.gmra.mrb[12].mxu1 %v1282_v27  ;;  %v5319_v43 = vmax.f32 %v554_v49, 0.0 }
 0x1b1   : > { %v818_v40 = vrot.slane %v817_v53, 2  ;;  %v1025_v26 = vadd.f32 %v1024_v34, %v1023_v63  ;;  %3963 = vmatprep.mubr.f32.mxu1 %v1283_v38  ;;  %v5321_v39 = vmax.f32 %v549_v57, 0.0  ;;  %v564_v42 = vadd.f32 %v5214_v22, %v4926_v48 }
 0x1b2   : > { %6735 = vst [vmem:[#allocation13_spill] sm:$0xff] %v5319_v43  ;;  %v1284_v2 = vmul.f32 %v5178_v33, %v1188_v44  ;;  %v5324_v5 = vpop.f32.mrb[50].mxu0  ;;  %v1148_v37 = vsub.f32 %v1116_v4, %v1132_v29  ;;  %v924_v60 = vmul.f32 %v5319_v43, %v5319_v43  ;;  %v559_v51 = vadd.f32 %v4926_v48, %v5223_v0 }
 0x1b3   : > { %v5332_v52 = vpop.f32.mrb[51].mxu0  ;;  %v819_v63 = vadd.f32 %v818_v40, %v817_v53  ;;  %v1026_v32 = vrot.slane %v1025_v26, 2  ;;  %v823_v38 = vadd.f32 %v822_v62, %v5321_v39  ;;  %v923_v33 = vmul.f32 %v5321_v39, %v5321_v39 }
 0x1b4   : > { %v1164_v55 = vmax.f32 %v1148_v37, 0.0  ;;  %3964 = vmatmul.mubr.f32.gmra.mrb[14].mxu1 %v1284_v2  ;;  %v5337_v27 = vmax.f32 %v564_v42, 0.0  ;;  %v5339_v49 = vmax.f32 %v559_v51, 0.0  ;;  %v1189_v22 = vsub.f32 %v5039_v14, %v5125_v30 }
 0x1b5   : > { %v820_v0 = vrot.slane %v819_v63, 1  ;;  %v1027_v57 = vadd.f32 %v1026_v32, %v1025_v26  ;;  %v824_v53 = vadd.f32 %v823_v38, %v5319_v43  ;;  %v1031_v44 = vadd.f32 %v1030_v1, %v923_v33 }
 0x1b6   : > { %6736 = vst [vmem:[#allocation14_spill] sm:$0xff] %v5337_v27  ;;  %v5343_v34 = vpop.eup %4495  ;;  %v5346_v62 = vpop.f32.mrb[52].mxu0  ;;  %v1244_v4 = vadd.f32 1e-05, %v1164_v55  ;;  %v926_v29 = vmul.f32 %v5337_v27, %v5337_v27  ;;  %v831_v40 = vadd.f32 %v5337_v27, %v5339_v49  ;;  %v925_v2 = vmul.f32 %v5339_v49, %v5339_v49 }
 0x1b7   : > { %v5354_v14 = vpop.f32.mrb[53].mxu0  ;;  %v821_v37 = vadd.f32 %v820_v0, %v819_v63  ;;  %v1028_v42 = vrot.slane %v1027_v57, 1  ;;  %v825_v26 = vrot.slane %v824_v53, 4  ;;  %v1032_v51 = vadd.f32 %v1031_v44, %v924_v60 }
 0x1b8   : > { %4497 = vrsqrt.f32 %v1244_v4  ;;  %v1039_v1 = vadd.f32 %v926_v29, %v925_v2  ;;  %v1285_v32 = vmul.f32 %v5227_v7, %v1189_v22  ;;  %v1190_v38 = vsub.f32 %v5037_v10, %v5125_v30 }
 0x1b9   : > { %v1029_v33 = vadd.f32 %v1028_v42, %v1027_v57  ;;  %v5359_v55 = vmul.f32 0.03125, %v821_v37  ;;  %v826_v23 = vadd.f32 %v825_v26, %v824_v53  ;;  %v1033_v27 = vrot.slane %v1032_v51, 4 }
 0x1ba   : > { %v5361_v43 = vpop.f32.mrb[54].mxu0  ;;  %3966 = vmatprep.mubr.f32.mxu1 %v1285_v32  ;;  %v1286_v63 = vmul.f32 %v5227_v7, %v1190_v38  ;;  %v6737_v60 = vsub.f32 %v5060_v50, %v5125_v30  ;;  %v574_v22 = vadd.f32 %v5238_v12, %v4926_v48  ;;  %v569_v10 = vadd.f32 %v4926_v48, %v5241_v41 }
 0x1bb   : > { %v5372_v57 = vpop.f32.mrb[55].mxu0  ;;  %v1117_v53 = vmul.f32 0.03125, %v1029_v33  ;;  %v1133_v44 = vmul.f32 %v5359_v55, %v5359_v55  ;;  %v827_v29 = vrot.slane %v826_v23, 2  ;;  %v1034_v2 = vadd.f32 %v1033_v27, %v1032_v51 }
 0x1bc   : > { %v1287_v0 = vmul.f32 %v5227_v7, %v6737_v60  ;;  %3967 = vmatmul.mubr.f32.gmra.mrb[16].mxu1 %v1286_v63  ;;  %v5378_v50 = vmax.f32 %v574_v22, 0.0  ;;  %v5380_v37 = vmax.f32 %v569_v10, 0.0  ;;  %v1192_v12 = vsub.f32 %v5049_v35, %v5125_v30 }
 0x1bd   : > { %v1149_v41 = vsub.f32 %v1117_v53, %v1133_v44  ;;  %v828_v42 = vadd.f32 %v827_v29, %v826_v23  ;;  %v584_v26 = vadd.f32 %v5260_v8, %v4926_v48  ;;  %v579_v32 = vadd.f32 %v4926_v48, %v5266_v9 }
 0x1be   : > { %3969 = vmatprep.mubr.f32.mxu1 %v1287_v0  ;;  %v5388_v38 = vpop.f32.mrb[56].mxu0  ;;  %v1035_v27 = vrot.slane %v1034_v2, 2  ;;  %v928_v51 = vmul.f32 %v5378_v50, %v5378_v50  ;;  %v832_v33 = vadd.f32 %v831_v40, %v5380_v37  ;;  %v927_v35 = vmul.f32 %v5380_v37, %v5380_v37 }
 0x1bf   : > { %v5395_v30 = vpop.f32.mrb[57].mxu0  ;;  %v1165_v23 = vmax.f32 %v1149_v41, 0.0  ;;  %v829_v63 = vrot.slane %v828_v42, 1  ;;  %v1288_v8 = vmul.f32 %v5227_v7, %v1192_v12  ;;  %v5398_v60 = vmax.f32 %v584_v26, 0.0 }
 0x1c0   : > { %v1036_v48 = vadd.f32 %v1035_v27, %v1034_v2  ;;  %v833_v9 = vadd.f32 %v832_v33, %v5378_v50  ;;  %v1040_v0 = vadd.f32 %v1039_v1, %v927_v35  ;;  %v5401_v22 = vmax.f32 %v579_v32, 0.0 }
 0x1c1   : > { %v1245_v10 = vadd.f32 1e-05, %v1165_v23  ;;  %v830_v53 = vadd.f32 %v829_v63, %v828_v42  ;;  %3970 = vmatmul.mubr.f32.gmra.mrb[18].mxu1 %v1288_v8  ;;  %v930_v40 = vmul.f32 %v5398_v60, %v5398_v60  ;;  %v1193_v44 = vsub.f32 %v5073_v20, %v5171_v17 }
 0x1c2   : > { %v5407_v29 = vpop.f32.mrb[58].mxu0  ;;  %v5409_v7 = vpop.eup %4497  ;;  %v1037_v12 = vrot.slane %v1036_v48, 1  ;;  %v834_v2 = vrot.slane %v833_v9, 4  ;;  %v1041_v41 = vadd.f32 %v1040_v0, %v928_v51  ;;  %v840_v1 = vadd.f32 %v5398_v60, %v5401_v22 }
 0x1c3   : > { %v5413_v26 = vpop.f32.mrb[59].mxu0  ;;  %4499 = vrsqrt.f32 %v1245_v10  ;;  %v5415_v42 = vmul.f32 0.03125, %v830_v53  ;;  %v929_v32 = vmul.f32 %v5401_v22, %v5401_v22  ;;  %v1289_v20 = vmul.f32 %v5290_v56, %v1193_v44 }
 0x1c4   : > { %v1038_v27 = vadd.f32 %v1037_v12, %v1036_v48  ;;  %v835_v33 = vadd.f32 %v834_v2, %v833_v9  ;;  %v1042_v35 = vrot.slane %v1041_v41, 4  ;;  %v1194_v23 = vsub.f32 %v5070_v13, %v5171_v17  ;;  %v5438_v2 = vld [vmem:[%s6711_s2] ss:$0 sm:$0xff] }
 0x1c5   : > { %v1134_v51 = vmul.f32 %v5415_v42, %v5415_v42  ;;  %v1048_v8 = vadd.f32 %v930_v40, %v929_v32  ;;  %3972 = vmatprep.mubr.f32.mxu1 %v1289_v20  ;;  %v6738_v0 = vsub.f32 %v5091_v6, %v5171_v17  ;;  %v594_v40 = vadd.f32 %v5438_v2, %v5282_v36 }
 0x1c6   : > { %v5430_v53 = vpop.f32.mrb[60].mxu0  ;;  %v1118_v48 = vmul.f32 0.03125, %v1038_v27  ;;  %v836_v9 = vrot.slane %v835_v33, 2  ;;  %v1043_v44 = vadd.f32 %v1042_v35, %v1041_v41  ;;  %v1290_v13 = vmul.f32 %v5290_v56, %v1194_v23 }
 0x1c7   : > { %v1291_v10 = vmul.f32 %v5290_v56, %v6738_v0  ;;  %v5433_v12 = vpop.f32.mrb[61].mxu0  ;;  %v589_v6 = vadd.f32 %v5438_v2, %v5288_v58  ;;  %v1196_v32 = vsub.f32 %v5075_v21, %v5171_v17  ;;  %v604_v41 = vadd.f32 %v5438_v2, %v5302_v59 }
 0x1c8   : > { %v1150_v20 = vsub.f32 %v1118_v48, %v1134_v51  ;;  %v837_v27 = vadd.f32 %v836_v9, %v835_v33  ;;  %v1044_v35 = vrot.slane %v1043_v44, 2  ;;  %3973 = vmatmul.mubr.f32.gmra.mrb[20].mxu1 %v1290_v13  ;;  %v599_v23 = vadd.f32 %v5438_v2, %v5309_v16 }
 0x1c9   : > { %3975 = vmatprep.mubr.f32.mxu1 %v1291_v10  ;;  %v5450_v0 = vmax.f32 %v594_v40, 0.0  ;;  %v5452_v36 = vmax.f32 %v589_v6, 0.0  ;;  %v1292_v58 = vmul.f32 %v5290_v56, %v1196_v32  ;;  %v5455_v63 = vmax.f32 %v604_v41, 0.0 }
 0x1ca   : > { %v5457_v21 = vpop.f32.mrb[62].mxu0  ;;  %v1166_v17 = vmax.f32 %v1150_v20, 0.0  ;;  %v838_v59 = vrot.slane %v837_v27, 1  ;;  %v1045_v51 = vadd.f32 %v1044_v35, %v1043_v44  ;;  %v5459_v33 = vmax.f32 %v599_v23, 0.0 }
 0x1cb   : > { %6739 = vst [vmem:[#allocation15_spill] sm:$0xff] %v5455_v63  ;;  %v5461_v48 = vpop.f32.mrb[63].mxu0  ;;  %v932_v16 = vmul.f32 %v5450_v0, %v5450_v0  ;;  %v841_v10 = vadd.f32 %v840_v1, %v5452_v36  ;;  %v931_v9 = vmul.f32 %v5452_v36, %v5452_v36  ;;  %v934_v56 = vmul.f32 %v5455_v63, %v5455_v63 }
 0x1cc   : > { %v1246_v13 = vadd.f32 1e-05, %v1166_v17  ;;  %v839_v40 = vadd.f32 %v838_v59, %v837_v27  ;;  %v1046_v6 = vrot.slane %v1045_v51, 1  ;;  %3976 = vmatmul.mubr.f32.gmra.mrb[22].mxu1 %v1292_v58  ;;  %v849_v44 = vadd.f32 %v5455_v63, %v5459_v33 }
 0x1cd   : > { %v5472_v32 = vpop.eup %4499  ;;  %v842_v41 = vadd.f32 %v841_v10, %v5450_v0  ;;  %v1049_v20 = vadd.f32 %v1048_v8, %v931_v9  ;;  %v933_v1 = vmul.f32 %v5459_v33, %v5459_v33  ;;  %v1197_v35 = vsub.f32 %v5105_v31, %v5234_v11 }
 0x1ce   : > { %4501 = vrsqrt.f32 %v1246_v13  ;;  %v1047_v23 = vadd.f32 %v1046_v6, %v1045_v51  ;;  %v5479_v17 = vmul.f32 0.03125, %v839_v40  ;;  %v1198_v27 = vsub.f32 %v5098_v18, %v5234_v11 }
 0x1cf   : > { %v843_v58 = vrot.slane %v842_v41, 4  ;;  %v1050_v59 = vadd.f32 %v1049_v20, %v932_v16  ;;  %v1057_v4 = vadd.f32 %v934_v56, %v933_v1  ;;  %v1293_v63 = vmul.f32 %v5343_v34, %v1197_v35 }
 0x1d0   : > { %v1119_v10 = vmul.f32 0.03125, %v1047_v23  ;;  %v1135_v8 = vmul.f32 %v5479_v17, %v5479_v17  ;;  %v1215_v9 = vsub.f32 %v5380_v37, %v5479_v17  ;;  %v1294_v31 = vmul.f32 %v5343_v34, %v1198_v27 }
 0x1d1   : > { %v844_v51 = vadd.f32 %v843_v58, %v842_v41  ;;  %v1051_v13 = vrot.slane %v1050_v59, 4  ;;  %3978 = vmatprep.mubr.f32.mxu1 %v1293_v63  ;;  %v6740_v18 = vsub.f32 %v5142_v3, %v5234_v11  ;;  %v614_v56 = vadd.f32 %v5438_v2, %v5324_v5 }
 0x1d2   : > { %v1151_v40 = vsub.f32 %v1119_v10, %v1135_v8  ;;  %3979 = vmatmul.mubr.f32.gmra.mrb[24].mxu1 %v1294_v31  ;;  %v609_v6 = vadd.f32 %v5438_v2, %v5332_v52  ;;  %v1200_v20 = vsub.f32 %v5140_v45, %v5234_v11  ;;  %v624_v41 = vadd.f32 %v5438_v2, %v5346_v62 }
 0x1d3   : > { %v1295_v16 = vmul.f32 %v5343_v34, %v6740_v18  ;;  %v845_v63 = vrot.slane %v844_v51, 2  ;;  %v1052_v1 = vadd.f32 %v1051_v13, %v1050_v59  ;;  %v5501_v3 = vmax.f32 %v614_v56, 0.0 }
 0x1d4   : > { %v619_v35 = vadd.f32 %v5438_v2, %v5354_v14  ;;  %v1167_v5 = vmax.f32 %v1151_v40, 0.0  ;;  %v5505_v23 = vmax.f32 %v609_v6, 0.0  ;;  %v1296_v27 = vmul.f32 %v5343_v34, %v1200_v20 }
 0x1d5   : > { %3981 = vmatprep.mubr.f32.mxu1 %v1295_v16  ;;  %v5508_v52 = vmax.f32 %v624_v41, 0.0  ;;  %v846_v58 = vadd.f32 %v845_v63, %v844_v51  ;;  %v1053_v45 = vrot.slane %v1052_v1, 2  ;;  %v936_v11 = vmul.f32 %v5501_v3, %v5501_v3 }
 0x1d6   : > { %v5512_v62 = vmax.f32 %v619_v35, 0.0  ;;  %v1247_v59 = vadd.f32 1e-05, %v1167_v5  ;;  %v850_v10 = vadd.f32 %v849_v44, %v5505_v23  ;;  %v935_v14 = vmul.f32 %v5505_v23, %v5505_v23  ;;  %3982 = vmatmul.mubr.f32.gmra.mrb[26].mxu1 %v1296_v27 }
 0x1d7   : > { %v938_v8 = vmul.f32 %v5508_v52, %v5508_v52  ;;  %v847_v34 = vrot.slane %v846_v58, 1  ;;  %v1054_v31 = vadd.f32 %v1053_v45, %v1052_v1  ;;  %v1201_v56 = vsub.f32 %v5161_v46, %v5304_v54 }
 0x1d8   : > { %v858_v51 = vadd.f32 %v5508_v52, %v5512_v62  ;;  %v937_v13 = vmul.f32 %v5512_v62, %v5512_v62  ;;  %v5523_v18 = vpop.eup %4501  ;;  %4503 = vrsqrt.f32 %v1247_v59  ;;  %v851_v44 = vadd.f32 %v850_v10, %v5501_v3 }
 0x1d9   : > { %v1058_v16 = vadd.f32 %v1057_v4, %v935_v14  ;;  %v848_v40 = vadd.f32 %v847_v34, %v846_v58  ;;  %v1055_v6 = vrot.slane %v1054_v31, 1  ;;  %v1202_v41 = vsub.f32 %v5156_v25, %v5304_v54 }
 0x1da   : > { %v1066_v20 = vadd.f32 %v938_v8, %v937_v13  ;;  %v852_v63 = vrot.slane %v851_v44, 4  ;;  %v1297_v35 = vmul.f32 %v5409_v7, %v1201_v56  ;;  %v6741_v5 = vsub.f32 %v5207_v28, %v5304_v54 }
 0x1db   : > { %v1059_v1 = vadd.f32 %v1058_v16, %v936_v11  ;;  %v1056_v45 = vadd.f32 %v1055_v6, %v1054_v31  ;;  %v5535_v4 = vmul.f32 0.03125, %v848_v40  ;;  %v1298_v46 = vmul.f32 %v5409_v7, %v1202_v41 }
 0x1dc   : > { %v1299_v27 = vmul.f32 %v5409_v7, %v6741_v5  ;;  %v634_v58 = vadd.f32 %v5438_v2, %v5361_v43  ;;  %v853_v59 = vadd.f32 %v852_v63, %v851_v44  ;;  %3984 = vmatprep.mubr.f32.mxu1 %v1297_v35  ;;  %v629_v25 = vadd.f32 %v5438_v2, %v5372_v57 }
 0x1dd   : > { %v1060_v10 = vrot.slane %v1059_v1, 4  ;;  %v1204_v11 = vsub.f32 %v5205_v61, %v5304_v54  ;;  %v1120_v28 = vmul.f32 0.03125, %v1056_v45  ;;  %v1136_v14 = vmul.f32 %v5535_v4, %v5535_v4  ;;  %3985 = vmatmul.mubr.f32.gmra.mrb[28].mxu1 %v1298_v46 }
 0x1de   : > { %v1219_v8 = vsub.f32 %v5452_v36, %v5535_v4  ;;  %v5548_v34 = vmax.f32 %v634_v58, 0.0  ;;  %v854_v43 = vrot.slane %v853_v59, 2  ;;  %3987 = vmatprep.mubr.f32.mxu1 %v1299_v27  ;;  %v5550_v13 = vmax.f32 %v629_v25, 0.0 }
 0x1df   : > { %v1061_v31 = vadd.f32 %v1060_v10, %v1059_v1  ;;  %v1300_v57 = vmul.f32 %v5409_v7, %v1204_v11  ;;  %v1152_v44 = vsub.f32 %v1120_v28, %v1136_v14  ;;  %v644_v54 = vadd.f32 %v5438_v2, %v5388_v38 }
 0x1e0   : > { %v940_v61 = vmul.f32 %v5548_v34, %v5548_v34  ;;  %v639_v16 = vadd.f32 %v5438_v2, %v5395_v30  ;;  %v855_v56 = vadd.f32 %v854_v43, %v853_v59  ;;  %v859_v6 = vadd.f32 %v858_v51, %v5550_v13 }
 0x1e1   : > { %v1062_v40 = vrot.slane %v1061_v31, 2  ;;  %v939_v41 = vmul.f32 %v5550_v13, %v5550_v13  ;;  %v1168_v63 = vmax.f32 %v1152_v44, 0.0  ;;  %3988 = vmatmul.mubr.f32.gmra.mrb[30].mxu1 %v1300_v57  ;;  %v5562_v7 = vmax.f32 %v644_v54, 0.0 }
 0x1e2   : > { %v5564_v1 = vmax.f32 %v639_v16, 0.0  ;;  %v1205_v35 = vsub.f32 %v5212_v15, %v5359_v55  ;;  %v5568_v38 = vpop.eup %4503  ;;  %v856_v5 = vrot.slane %v855_v56, 1  ;;  %v860_v27 = vadd.f32 %v859_v6, %v5548_v34 }
 0x1e3   : > { %v1063_v30 = vadd.f32 %v1062_v40, %v1061_v31  ;;  %v1067_v45 = vadd.f32 %v1066_v20, %v939_v41  ;;  %v1248_v51 = vadd.f32 1e-05, %v1168_v63  ;;  %v942_v46 = vmul.f32 %v5562_v7, %v5562_v7 }
 0x1e4   : > { %v867_v58 = vadd.f32 %v5562_v7, %v5564_v1  ;;  %v941_v59 = vmul.f32 %v5564_v1, %v5564_v1  ;;  %v857_v10 = vadd.f32 %v856_v5, %v855_v56  ;;  %v861_v15 = vrot.slane %v860_v27, 4 }
 0x1e5   : > { %v1064_v25 = vrot.slane %v1063_v30, 1  ;;  %v1068_v11 = vadd.f32 %v1067_v45, %v940_v61  ;;  %4505 = vrsqrt.f32 %v1248_v51  ;;  %v1301_v14 = vmul.f32 %v5472_v32, %v1205_v35 }
 0x1e6   : > { %v1075_v28 = vadd.f32 %v942_v46, %v941_v59  ;;  %v1206_v20 = vsub.f32 %v5210_v24, %v5359_v55  ;;  %v5580_v31 = vmul.f32 0.03125, %v857_v10  ;;  %v862_v57 = vadd.f32 %v861_v15, %v860_v27 }
 0x1e7   : > { %v1065_v43 = vadd.f32 %v1064_v25, %v1063_v30  ;;  %v1069_v44 = vrot.slane %v1068_v11, 4  ;;  %3990 = vmatprep.mubr.f32.mxu1 %v1301_v14  ;;  %v6742_v16 = vsub.f32 %v5268_v19, %v5359_v55  ;;  %v654_v56 = vadd.f32 %v5438_v2, %v5407_v29 }
 0x1e8   : > { %v1302_v54 = vmul.f32 %v5472_v32, %v1206_v20  ;;  %v649_v40 = vadd.f32 %v5438_v2, %v5413_v26  ;;  %v1137_v6 = vmul.f32 %v5580_v31, %v5580_v31  ;;  %v1223_v41 = vsub.f32 %v5505_v23, %v5580_v31  ;;  %v2399_v23 = vld [vmem:[#allocation5 + $0x110] sm:$0xff] }
 0x1e9   : > { %v1303_v61 = vmul.f32 %v5472_v32, %v6742_v16  ;;  %v1121_v24 = vmul.f32 0.03125, %v1065_v43  ;;  %v863_v63 = vrot.slane %v862_v57, 2  ;;  %v1070_v35 = vadd.f32 %v1069_v44, %v1068_v11 }
 0x1ea   : > { %3991 = vmatmul.mubr.f32.gmra.mrb[32].mxu1 %v1302_v54  ;;  %v5595_v5 = vmax.f32 %v654_v56, 0.0  ;;  %v5597_v19 = vmax.f32 %v649_v40, 0.0  ;;  %v1208_v29 = vsub.f32 %v5262_v47, %v5359_v55  ;;  %v664_v26 = vadd.f32 %v5438_v2, %v5430_v53 }
 0x1eb   : > { %v1153_v30 = vsub.f32 %v1121_v24, %v1137_v6  ;;  %v864_v27 = vadd.f32 %v863_v63, %v862_v57  ;;  %3993 = vmatprep.mubr.f32.mxu1 %v1303_v61  ;;  %v659_v45 = vadd.f32 %v5438_v2, %v5433_v12  ;;  %v1071_v51 = vrot.slane %v1070_v35, 2  ;;  %v6743_v57 = vld [vmem:[#allocation12_spill] sm:$0xff] }
 0x1ec   : > { %v944_v46 = vmul.f32 %v5595_v5, %v5595_v5  ;;  %v868_v59 = vadd.f32 %v867_v58, %v5597_v19  ;;  %v943_v10 = vmul.f32 %v5597_v19, %v5597_v19  ;;  %v1304_v55 = vmul.f32 %v5472_v32, %v1208_v29  ;;  %v6744_v29 = vld [vmem:[#allocation11_spill] sm:$0xff] }
 0x1ed   : > { %v1169_v25 = vmax.f32 %v1153_v30, 0.0  ;;  %v865_v47 = vrot.slane %v864_v27, 1  ;;  %v5611_v15 = vmax.f32 %v664_v26, 0.0  ;;  %v1072_v11 = vadd.f32 %v1071_v51, %v1070_v35 }
 0x1ee   : > { %v869_v53 = vadd.f32 %v868_v59, %v5595_v5  ;;  %v1076_v14 = vadd.f32 %v1075_v28, %v943_v10  ;;  %v5614_v12 = vmax.f32 %v659_v45, 0.0  ;;  %3994 = vmatmul.mubr.f32.gmra.mrb[34].mxu1 %v1304_v55  ;;  %v1209_v44 = vsub.f32 %v6743_v57, %v5415_v42  ;;  %v6747_v57 = vld [vmem:[#allocation14_spill] sm:$0xff] }
 0x1ef   : > { %v1249_v20 = vadd.f32 1e-05, %v1169_v25  ;;  %v866_v43 = vadd.f32 %v865_v47, %v864_v27  ;;  %v946_v58 = vmul.f32 %v5611_v15, %v5611_v15  ;;  %v5620_v54 = vpop.eup %4505  ;;  %v1073_v32 = vrot.slane %v1072_v11, 1 }
 0x1f0   : > { %v870_v16 = vrot.slane %v869_v53, 4  ;;  %v1077_v61 = vadd.f32 %v1076_v14, %v944_v46  ;;  %v876_v56 = vadd.f32 %v5611_v15, %v5614_v12  ;;  %v945_v40 = vmul.f32 %v5614_v12, %v5614_v12 }
 0x1f1   : > { %4507 = vrsqrt.f32 %v1249_v20  ;;  %v5624_v28 = vmul.f32 0.03125, %v866_v43  ;;  %v1305_v24 = vmul.f32 %v5523_v18, %v1209_v44  ;;  %v1074_v6 = vadd.f32 %v1073_v32, %v1072_v11 }
 0x1f2   : > { %v871_v63 = vadd.f32 %v870_v16, %v869_v53  ;;  %v1078_v35 = vrot.slane %v1077_v61, 4  ;;  %v1210_v30 = vsub.f32 %v6744_v29, %v5415_v42  ;;  %v1084_v45 = vadd.f32 %v946_v58, %v945_v40  ;;  %v6746_v53 = vld [vmem:[#allocation13_spill] sm:$0xff] }
 0x1f3   : > { %v1138_v27 = vmul.f32 %v5624_v28, %v5624_v28  ;;  %v1227_v26 = vsub.f32 %v5550_v13, %v5624_v28  ;;  %3996 = vmatprep.mubr.f32.mxu1 %v1305_v24  ;;  %v6745_v51 = vsub.f32 %v5321_v39, %v5415_v42  ;;  %v1122_v59 = vmul.f32 0.03125, %v1074_v6 }
 0x1f4   : > { %v872_v10 = vrot.slane %v871_v63, 2  ;;  %v1079_v25 = vadd.f32 %v1078_v35, %v1077_v61  ;;  %v1306_v47 = vmul.f32 %v5523_v18, %v1210_v30  ;;  %v674_v55 = vadd.f32 %v5438_v2, %v5457_v21 }
 0x1f5   : > { %v1307_v46 = vmul.f32 %v5523_v18, %v6745_v51  ;;  %v669_v11 = vadd.f32 %v5438_v2, %v5461_v48  ;;  %v1212_v14 = vsub.f32 %v6746_v53, %v5415_v42  ;;  %v1213_v20 = vsub.f32 %v5339_v49, %v5479_v17 }
 0x1f6   : > { %v1154_v39 = vsub.f32 %v1122_v59, %v1138_v27  ;;  %v873_v43 = vadd.f32 %v872_v10, %v871_v63  ;;  %v1080_v58 = vrot.slane %v1079_v25, 2  ;;  %3997 = vmatmul.mubr.f32.gmra.mrb[36].mxu1 %v1306_v47  ;;  %v1214_v44 = vsub.f32 %v6747_v57, %v5479_v17 }
 0x1f7   : > { %3999 = vmatprep.mubr.f32.mxu1 %v1307_v46  ;;  %v5650_v32 = vmax.f32 %v674_v55, 0.0  ;;  %v5652_v21 = vmax.f32 %v669_v11, 0.0  ;;  %v1308_v2 = vmul.f32 %v5523_v18, %v1212_v14  ;;  %v1309_v48 = vmul.f32 %v5568_v38, %v1213_v20 }
 0x1f8   : > { %v1170_v42 = vmax.f32 %v1154_v39, 0.0  ;;  %v874_v16 = vrot.slane %v873_v43, 1  ;;  %v1081_v61 = vadd.f32 %v1080_v58, %v1079_v25  ;;  %v1310_v49 = vmul.f32 %v5568_v38, %v1214_v44  ;;  %v6748_v39 = vld [vmem:[#allocation15_spill] sm:$0xff] }
 0x1f9   : > { %v948_v40 = vmul.f32 %v5650_v32, %v5650_v32  ;;  %v877_v24 = vadd.f32 %v876_v56, %v5652_v21  ;;  %v947_v6 = vmul.f32 %v5652_v21, %v5652_v21  ;;  %v1311_v18 = vmul.f32 %v5568_v38, %v1215_v9 }
 0x1fa   : > { %v1250_v63 = vadd.f32 1e-05, %v1170_v42  ;;  %v875_v35 = vadd.f32 %v874_v16, %v873_v43  ;;  %v1082_v29 = vrot.slane %v1081_v61, 1  ;;  %4000 = vmatmul.mubr.f32.gmra.mrb[38].mxu1 %v1308_v2  ;;  %v1216_v30 = vsub.f32 %v5378_v50, %v5479_v17  ;;  %v2398_v16 = vld [vmem:[#allocation5 + $0x108] sm:$0xff] }
 0x1fb   : > { %v4508_v27 = vpop.eup %4507  ;;  %v878_v51 = vadd.f32 %v877_v24, %v5650_v32  ;;  %v1085_v46 = vadd.f32 %v1084_v45, %v947_v6  ;;  %4002 = vmatprep.mubr.f32.mxu1 %v1309_v48  ;;  %v1217_v56 = vsub.f32 %v5401_v22, %v5535_v4  ;;  %v1218_v37 = vsub.f32 %v5398_v60, %v5535_v4 }
 0x1fc   : > { %4509 = vrsqrt.f32 %v1250_v63  ;;  %v1083_v9 = vadd.f32 %v1082_v29, %v1081_v61  ;;  %v5673_v59 = vmul.f32 0.03125, %v875_v35  ;;  %v1312_v10 = vmul.f32 %v5568_v38, %v1216_v30  ;;  %v2402_v30 = vld [vmem:[#allocation5 + $0x128] sm:$0xff] }
 0x1fd   : > { %v879_v25 = vrot.slane %v878_v51, 4  ;;  %v1086_v47 = vadd.f32 %v1085_v46, %v948_v40  ;;  %v1313_v50 = vmul.f32 %v5620_v54, %v1217_v56  ;;  %v1314_v17 = vmul.f32 %v5620_v54, %v1218_v37 }
 0x1fe   : > { %v1123_v45 = vmul.f32 0.03125, %v1083_v9  ;;  %v1139_v55 = vmul.f32 %v5673_v59, %v5673_v59  ;;  %v1231_v22 = vsub.f32 %v5597_v19, %v5673_v59  ;;  %4003 = vmatmul.mubr.f32.gmra.mrb[40].mxu1 %v1310_v49  ;;  %v1315_v60 = vmul.f32 %v5620_v54, %v1219_v8  ;;  %v2403_v9 = vld [vmem:[#allocation5 + $0x130] sm:$0xff] }
 0x1ff   : > { %v880_v38 = vadd.f32 %v879_v25, %v878_v51  ;;  %v1087_v11 = vrot.slane %v1086_v47, 4  ;;  %4005 = vmatprep.mubr.f32.mxu1 %v1311_v18  ;;  %v1220_v53 = vsub.f32 %v5450_v0, %v5535_v4  ;;  %v1221_v14 = vsub.f32 %v5459_v33, %v5580_v31  ;;  %v2397_v4 = vld [vmem:[#allocation5 + $0x100] sm:$0xff] }
 0x200   : > { %v1155_v20 = vsub.f32 %v1123_v45, %v1139_v55  ;;  %v1222_v43 = vsub.f32 %v6748_v39, %v5580_v31  ;;  %v5695_v58 = vmul.f32 %v4508_v27, %v1223_v41  ;;  %v1224_v36 = vsub.f32 %v5501_v3, %v5580_v31  ;;  %v2400_v41 = vld [vmem:[#allocation5 + $0x118] sm:$0xff]  ;;  %v2405_v55 = vld [vmem:[#allocation5 + $0x140] sm:$0xff] }
 0x201   : > { %v881_v8 = vrot.slane %v880_v38, 2  ;;  %v1088_v57 = vadd.f32 %v1087_v11, %v1086_v47  ;;  %v1316_v44 = vmul.f32 %v5620_v54, %v1220_v53  ;;  %v1317_v0 = vmul.f32 %v4508_v27, %v1221_v14  ;;  %v2408_v39 = vld [vmem:[#allocation5 + $0x158] sm:$0xff] }
 0x202   : > { %v1171_v2 = vmax.f32 %v1155_v20, 0.0  ;;  %4006 = vmatmul.mubr.f32.gmra.mrb[42].mxu1 %v1312_v10  ;;  %v1318_v33 = vmul.f32 %v4508_v27, %v1222_v43  ;;  %v1320_v48 = vmul.f32 %v4508_v27, %v1224_v36  ;;  %v1225_v42 = vsub.f32 %v5512_v62, %v5624_v28  ;;  %v2404_v10 = vld [vmem:[#allocation5 + $0x138] sm:$0xff]  ;;  %v2407_v20 = vld [vmem:[#allocation5 + $0x150] sm:$0xff]  ;;  %v2410_v36 = vld [vmem:[#allocation5 + $0x168] sm:$0xff] }
 0x203   : > { %v882_v61 = vadd.f32 %v881_v8, %v880_v38  ;;  %v1089_v49 = vrot.slane %v1088_v57, 2  ;;  %4008 = vmatprep.mubr.f32.mxu1 %v1313_v50  ;;  %v1226_v3 = vsub.f32 %v5508_v52, %v5624_v28  ;;  %v1228_v31 = vsub.f32 %v5548_v34, %v5624_v28  ;;  %v2401_v52 = vld [vmem:[#allocation5 + $0x120] sm:$0xff] }
 0x204   : > { %v1251_v54 = vadd.f32 1e-05, %v1171_v2  ;;  %v1229_v40 = vsub.f32 %v5564_v1, %v5673_v59  ;;  %v1230_v24 = vsub.f32 %v5562_v7, %v5673_v59  ;;  %v1232_v62 = vsub.f32 %v5595_v5, %v5673_v59 }
 0x205   : > { %v883_v6 = vrot.slane %v882_v61, 1  ;;  %v1090_v18 = vadd.f32 %v1089_v49, %v1088_v57  ;;  %v4358_v63 = vpack.c.bf16 %v2398_v16, %v2397_v4  ;;  %v4362_v35 = vpack.c.bf16 %v2400_v41, %v2399_v23  ;;  %v2412_v4 = vld [vmem:[#allocation5 + $0x178] sm:$0xff] }
 0x206   : > { %v4510_v29 = vpop.eup %4509  ;;  %4511 = vrsqrt.f32 %v1251_v54  ;;  %4009 = vmatmul.mubr.f32.gmra.mrb[44].mxu1 %v1314_v17  ;;  %v4366_v37 = vpack.c.bf16 %v2402_v30, %v2401_v52  ;;  %v4378_v43 = vpack.c.bf16 %v2408_v39, %v2407_v20 }
 0x207   : > { %v884_v34 = vadd.f32 %v883_v6, %v882_v61  ;;  %v1091_v27 = vrot.slane %v1090_v18, 1  ;;  %4011 = vmatprep.mubr.f32.mxu1 %v1315_v60  ;;  %v1321_v51 = vmul.f32 %v4510_v29, %v1225_v42  ;;  %v1322_v1 = vmul.f32 %v4510_v29, %v1226_v3  ;;  %4359 = vmatprep.subr.bf16.mxu0 %v4358_v63  ;;  %v2406_v60 = vld [vmem:[#allocation5 + $0x148] sm:$0xff] }
 0x208   : > { %v1323_v7 = vmul.f32 %v4510_v29, %v1227_v26  ;;  %v1324_v5 = vmul.f32 %v4510_v29, %v1228_v31  ;;  %4361 = vmatpush3.bf16.msra.mxu0 %v4358_v63  ;;  %v4370_v26 = vpack.c.bf16 %v2404_v10, %v2403_v9 }
 0x209   : > { %v1092_v46 = vadd.f32 %v1091_v27, %v1090_v18  ;;  %v1108_v56 = vmul.f32 0.03125, %v884_v34  ;;  %4363 = vmatprep.subr.bf16.mxu0 %v4362_v35 }
 0x20a   : > { %4012 = vmatmul.mubr.f32.gmra.mrb[46].mxu1 %v1316_v44 }
 0x20b   : > { %v1124_v25 = vmul.f32 0.03125, %v1092_v46  ;;  %v1140_v47 = vmul.f32 %v1108_v56, %v1108_v56  ;;  %v1235_v50 = vsub.f32 %v5652_v21, %v1108_v56  ;;  %4014 = vmatprep.mubr.f32.mxu1 %v1317_v0  ;;  %v1233_v17 = vsub.f32 %v5614_v12, %v1108_v56  ;;  %v2411_v0 = vld [vmem:[#allocation5 + $0x170] sm:$0xff] }
 0x20c   : > { %v1234_v45 = vsub.f32 %v5611_v15, %v1108_v56  ;;  %v1236_v13 = vsub.f32 %v5650_v32, %v1108_v56  ;;  %4365 = vmatpush3.bf16.msra.mxu0 %v4362_v35  ;;  %v4374_v21 = vpack.c.bf16 %v2406_v60, %v2405_v55  ;;  %v4386_v2 = vpack.c.bf16 %v2412_v4, %v2411_v0 }
 0x20d   : > { %v1156_v28 = vsub.f32 %v1124_v25, %v1140_v47  ;;  %4367 = vmatprep.subr.bf16.mxu0 %v4366_v37 }
 0x20e   : > { %4015 = vmatmul.mubr.f32.gmra.mrb[48].mxu1 %v1318_v33  ;;  %v5726_v33 = vld [vmem:[%s6711_s2 + $0x1] ss:$0 sm:$0xff] }
 0x20f   : > { %v1172_v38 = vmax.f32 %v1156_v28, 0.0  ;;  %4017 = vmatprep.mubr.f32.mxu1 %v5695_v58  ;;  %v2409_v58 = vld [vmem:[#allocation5 + $0x160] sm:$0xff] }
 0x210   : > { %v4512_v11 = vpop.eup %4511  ;;  %4369 = vmatpush3.bf16.msra.mxu0 %v4366_v37  ;;  %v4382_v8 = vpack.c.bf16 %v2410_v36, %v2409_v58 }
 0x211   : > { %v1252_v53 = vadd.f32 1e-05, %v1172_v38  ;;  %v1325_v14 = vmul.f32 %v4512_v11, %v1229_v40  ;;  %v1326_v12 = vmul.f32 %v4512_v11, %v1230_v24  ;;  %v1327_v15 = vmul.f32 %v4512_v11, %v1231_v22  ;;  %4371 = vmatprep.subr.bf16.mxu0 %v4370_v26 }
 0x212   : > { %4018 = vmatmul.mubr.f32.gmra.mrb[50].mxu1 %v1320_v48  ;;  %v1328_v32 = vmul.f32 %v4512_v11, %v1232_v62 }
 0x213   : > { %4513 = vrsqrt.f32 %v1252_v53  ;;  %4020 = vmatprep.mubr.f32.mxu1 %v1321_v51 }
 0x214   : > { %4373 = vmatpush3.bf16.msra.mxu0 %v4370_v26 }
 0x215   : > { %4375 = vmatprep.subr.bf16.mxu0 %v4374_v21 }
 0x216   : > { %4021 = vmatmul.mubr.f32.gmra.mrb[52].mxu1 %v1322_v1 }
 0x217   : > { %4023 = vmatprep.mubr.f32.mxu1 %v1323_v7 }
 0x218   : > { %4377 = vmatpush3.bf16.msra.mxu0 %v4374_v21 }
 0x219   : > { %4379 = vmatprep.subr.bf16.mxu0 %v4378_v43 }
 0x21a   : > { %4024 = vmatmul.mubr.f32.gmra.mrb[54].mxu1 %v1324_v5 }
 0x21b   : > { %4026 = vmatprep.mubr.f32.mxu1 %v1325_v14 }
 0x21c   : > { %4381 = vmatpush3.bf16.msra.mxu0 %v4378_v43 }
 0x21d   : > { %v4514_v19 = vpop.eup %4513  ;;  %4383 = vmatprep.subr.bf16.mxu0 %v4382_v8 }
 0x21e   : > { %4027 = vmatmul.mubr.f32.gmra.mrb[56].mxu1 %v1326_v12  ;;  %v1329_v59 = vmul.f32 %v4514_v19, %v1233_v17  ;;  %v1330_v22 = vmul.f32 %v4514_v19, %v1234_v45  ;;  %v1331_v57 = vmul.f32 %v4514_v19, %v1235_v50  ;;  %v1332_v44 = vmul.f32 %v4514_v19, %v1236_v13 }
 0x21f   : > { %4029 = vmatprep.mubr.f32.mxu1 %v1327_v15 }
 0x220   : > { %4385 = vmatpush3.bf16.msra.mxu0 %v4382_v8 }
 0x221   : > { %4387 = vmatprep.subr.bf16.mxu0 %v4386_v2 }
 0x222   : > { %4030 = vmatmul.mubr.f32.gmra.mrb[58].mxu1 %v1328_v32 }
 0x223   : > { %4032 = vmatprep.mubr.f32.mxu1 %v1329_v59 }
 0x224   : > { %4389 = vmatpush3.bf16.msra.mxu0 %v4386_v2 }
 0x226   : > { %4033 = vmatmul.mubr.f32.gmra.mrb[60].mxu1 %v1330_v22 }
 0x227   : > { %4035 = vmatprep.mubr.f32.mxu1 %v1331_v57 }
 0x22a   : > { %4036 = vmatmul.mubr.f32.gmra.mrb[62].mxu1 %v1332_v44 }
 0x261   : > { %v3944_v48 = vpop.f32.mrb[0].mxu1 }
 0x262   : > { %v1427_v42 = vadd.f32 %v3944_v48, %v5726_v33  ;;  %v1421_v16 = vpop.f32.mrb[1].mxu1 }
 0x263   : > { %v1422_v23 = vadd.f32 %v5726_v33, %v1421_v16 }
 0x264   : > { %v5730_v41 = vmax.f32 %v1427_v42, 0.0 }
 0x265   : > { %v5732_v61 = vmax.f32 %v1422_v23, 0.0 }
 0x266   : > { %v1949_v49 = vmul.f32 %v5730_v41, %v5730_v41  ;;  %v3947_v3 = vpop.f32.mrb[2].mxu1 }
 0x267   : > { %v1804_v31 = vadd.f32 %v5730_v41, %v5732_v61  ;;  %v1948_v54 = vmul.f32 %v5732_v61, %v5732_v61  ;;  %v1437_v40 = vadd.f32 %v3947_v3, %v5726_v33  ;;  %v1431_v24 = vpop.f32.mrb[3].mxu1 }
 0x268   : > { %v1432_v62 = vadd.f32 %v5726_v33, %v1431_v24 }
 0x269   : > { %v2012_v6 = vadd.f32 %v1949_v49, %v1948_v54  ;;  %v5742_v18 = vmax.f32 %v1437_v40, 0.0 }
 0x26a   : > { %v5744_v63 = vmax.f32 %v1432_v62, 0.0 }
 0x26b   : > { %v1951_v30 = vmul.f32 %v5742_v18, %v5742_v18 }
 0x26c   : > { %v1805_v35 = vadd.f32 %v1804_v31, %v5744_v63  ;;  %v1950_v29 = vmul.f32 %v5744_v63, %v5744_v63 }
 0x26e   : > { %v3950_v52 = vpop.f32.mrb[4].mxu1  ;;  %v1806_v34 = vadd.f32 %v1805_v35, %v5742_v18  ;;  %v2013_v27 = vadd.f32 %v2012_v6, %v1950_v29 }
 0x26f   : > { %v1447_v51 = vadd.f32 %v3950_v52, %v5726_v33  ;;  %v1441_v1 = vpop.f32.mrb[5].mxu1 }
 0x270   : > { %v1442_v7 = vadd.f32 %v5726_v33, %v1441_v1  ;;  %v1807_v5 = vrot.slane %v1806_v34, 4  ;;  %v2014_v46 = vadd.f32 %v2013_v27, %v1951_v30 }
 0x271   : > { %v5754_v56 = vmax.f32 %v1447_v51, 0.0 }
 0x272   : > { %v5756_v37 = vmax.f32 %v1442_v7, 0.0  ;;  %v3953_v9 = vpop.f32.mrb[6].mxu1  ;;  %v1808_v10 = vadd.f32 %v1807_v5, %v1806_v34  ;;  %v2015_v25 = vrot.slane %v2014_v46, 4 }
 0x273   : > { %v1953_v47 = vmul.f32 %v5754_v56, %v5754_v56  ;;  %v1457_v50 = vadd.f32 %v3953_v9, %v5726_v33  ;;  %v1451_v17 = vpop.f32.mrb[7].mxu1 }
 0x274   : > { %v1813_v45 = vadd.f32 %v5754_v56, %v5756_v37  ;;  %v1952_v13 = vmul.f32 %v5756_v37, %v5756_v37  ;;  %v1452_v28 = vadd.f32 %v5726_v33, %v1451_v17  ;;  %v1809_v26 = vrot.slane %v1808_v10, 2 }
 0x275   : > { %v2016_v55 = vadd.f32 %v2015_v25, %v2014_v46  ;;  %v5766_v38 = vmax.f32 %v1457_v50, 0.0 }
 0x276   : > { %v2021_v60 = vadd.f32 %v1953_v47, %v1952_v13  ;;  %v5768_v11 = vmax.f32 %v1452_v28, 0.0  ;;  %v1810_v21 = vadd.f32 %v1809_v26, %v1808_v10 }
 0x277   : > { %v2017_v53 = vrot.slane %v2016_v55, 2  ;;  %v1955_v58 = vmul.f32 %v5766_v38, %v5766_v38 }
 0x278   : > { %v1814_v14 = vadd.f32 %v1813_v45, %v5768_v11  ;;  %v1954_v12 = vmul.f32 %v5768_v11, %v5768_v11  ;;  %v1811_v32 = vrot.slane %v1810_v21, 1 }
 0x279   : > { %v3956_v15 = vpop.f32.mrb[8].mxu1  ;;  %v2018_v20 = vadd.f32 %v2017_v53, %v2016_v55 }
 0x27a   : > { %v1467_v39 = vadd.f32 %v3956_v15, %v5726_v33  ;;  %v1461_v43 = vpop.f32.mrb[9].mxu1  ;;  %v1815_v36 = vadd.f32 %v1814_v14, %v5766_v38  ;;  %v2022_v8 = vadd.f32 %v2021_v60, %v1954_v12  ;;  %v1812_v59 = vadd.f32 %v1811_v32, %v1810_v21 }
 0x27b   : > { %v1462_v19 = vadd.f32 %v5726_v33, %v1461_v43  ;;  %v2019_v22 = vrot.slane %v2018_v20, 1 }
 0x27c   : > { %v5778_v57 = vmax.f32 %v1467_v39, 0.0  ;;  %v1816_v44 = vrot.slane %v1815_v36, 4  ;;  %v2023_v0 = vadd.f32 %v2022_v8, %v1955_v58  ;;  %v5782_v42 = vmul.f32 0.03125, %v1812_v59 }
 0x27d   : > { %v5780_v4 = vmax.f32 %v1462_v19, 0.0  ;;  %v3959_v2 = vpop.f32.mrb[10].mxu1  ;;  %v2020_v48 = vadd.f32 %v2019_v22, %v2018_v20 }
 0x27e   : > { %v1957_v16 = vmul.f32 %v5778_v57, %v5778_v57  ;;  %v1477_v23 = vadd.f32 %v3959_v2, %v5726_v33  ;;  %v1471_v49 = vpop.f32.mrb[11].mxu1  ;;  %v1817_v3 = vadd.f32 %v1816_v44, %v1815_v36  ;;  %v2024_v31 = vrot.slane %v2023_v0, 4 }
 0x27f   : > { %v1822_v54 = vadd.f32 %v5778_v57, %v5780_v4  ;;  %v1956_v40 = vmul.f32 %v5780_v4, %v5780_v4  ;;  %v2172_v24 = vmul.f32 0.03125, %v2020_v48  ;;  %v2188_v62 = vmul.f32 %v5782_v42, %v5782_v42 }
 0x280   : > { %v2238_v6 = vsub.f32 %v5744_v63, %v5782_v42  ;;  %v1818_v35 = vrot.slane %v1817_v3, 2  ;;  %v2025_v29 = vadd.f32 %v2024_v31, %v2023_v0  ;;  %v1472_v30 = vadd.f32 %v5726_v33, %v1471_v49 }
 0x281   : > { %v2030_v52 = vadd.f32 %v1957_v16, %v1956_v40  ;;  %v2204_v34 = vsub.f32 %v2172_v24, %v2188_v62  ;;  %v5796_v27 = vmax.f32 %v1477_v23, 0.0  ;;  %v2236_v51 = vsub.f32 %v5732_v61, %v5782_v42 }
 0x282   : > { %v2237_v1 = vsub.f32 %v5730_v41, %v5782_v42  ;;  %v1819_v7 = vadd.f32 %v1818_v35, %v1817_v3  ;;  %v2026_v5 = vrot.slane %v2025_v29, 2  ;;  %v5802_v46 = vmax.f32 %v1472_v30, 0.0 }
 0x283   : > { %v2239_v9 = vsub.f32 %v5742_v18, %v5782_v42  ;;  %v2220_v10 = vmax.f32 %v2204_v34, 0.0  ;;  %v3962_v25 = vpop.f32.mrb[12].mxu1  ;;  %v1959_v26 = vmul.f32 %v5796_v27, %v5796_v27 }
 0x284   : > { %v1820_v47 = vrot.slane %v1819_v7, 1  ;;  %v2027_v50 = vadd.f32 %v2026_v5, %v2025_v29  ;;  %v1823_v17 = vadd.f32 %v1822_v54, %v5802_v46  ;;  %v1958_v45 = vmul.f32 %v5802_v46, %v5802_v46  ;;  %v1481_v13 = vpop.f32.mrb[13].mxu1 }
 0x285   : > { %v2300_v28 = vadd.f32 1e-05, %v2220_v10  ;;  %v1487_v55 = vadd.f32 %v3962_v25, %v5726_v33  ;;  %v1482_v60 = vadd.f32 %v5726_v33, %v1481_v13 }
 0x286   : > { %v1821_v21 = vadd.f32 %v1820_v47, %v1819_v7  ;;  %v2028_v53 = vrot.slane %v2027_v50, 1  ;;  %v1824_v14 = vadd.f32 %v1823_v17, %v5796_v27  ;;  %v2031_v12 = vadd.f32 %v2030_v52, %v1958_v45 }
 0x287   : > { %4515 = vrsqrt.f32 %v2300_v28  ;;  %v5814_v15 = vmax.f32 %v1487_v55, 0.0  ;;  %v5816_v32 = vmax.f32 %v1482_v60, 0.0  ;;  %v3965_v20 = vpop.f32.mrb[14].mxu1 }
 0x288   : > { %v2029_v39 = vadd.f32 %v2028_v53, %v2027_v50  ;;  %v5818_v43 = vmul.f32 0.03125, %v1821_v21  ;;  %v1825_v58 = vrot.slane %v1824_v14, 4  ;;  %v2032_v36 = vadd.f32 %v2031_v12, %v1959_v26  ;;  %v1491_v8 = vpop.f32.mrb[15].mxu1 }
 0x289   : > { %v1961_v19 = vmul.f32 %v5814_v15, %v5814_v15  ;;  %v1831_v59 = vadd.f32 %v5814_v15, %v5816_v32  ;;  %v1960_v22 = vmul.f32 %v5816_v32, %v5816_v32  ;;  %v1497_v44 = vadd.f32 %v3965_v20, %v5726_v33 }
 0x28a   : > { %v2173_v0 = vmul.f32 0.03125, %v2029_v39  ;;  %v2189_v2 = vmul.f32 %v5818_v43, %v5818_v43  ;;  %v2242_v48 = vsub.f32 %v5768_v11, %v5818_v43  ;;  %v1826_v16 = vadd.f32 %v1825_v58, %v1824_v14 }
 0x28b   : > { %v2033_v23 = vrot.slane %v2032_v36, 4  ;;  %v2039_v49 = vadd.f32 %v1961_v19, %v1960_v22  ;;  %v5831_v3 = vmax.f32 %v1497_v44, 0.0  ;;  %v1492_v31 = vadd.f32 %v5726_v33, %v1491_v8 }
 0x28c   : > { %v2205_v54 = vsub.f32 %v2173_v0, %v2189_v2  ;;  %v1827_v40 = vrot.slane %v1826_v16, 2  ;;  %v2240_v24 = vsub.f32 %v5756_v37, %v5818_v43  ;;  %v2241_v62 = vsub.f32 %v5754_v56, %v5818_v43 }
 0x28d   : > { %v2034_v35 = vadd.f32 %v2033_v23, %v2032_v36  ;;  %v5838_v29 = vmax.f32 %v1492_v31, 0.0  ;;  %v2243_v52 = vsub.f32 %v5766_v38, %v5818_v43  ;;  %v1963_v17 = vmul.f32 %v5831_v3, %v5831_v3 }
 0x28e   : > { %v2221_v30 = vmax.f32 %v2205_v54, 0.0  ;;  %v1828_v34 = vadd.f32 %v1827_v40, %v1826_v16 }
 0x28f   : > { %v2035_v7 = vrot.slane %v2034_v35, 2  ;;  %v1832_v5 = vadd.f32 %v1831_v59, %v5838_v29  ;;  %v1962_v10 = vmul.f32 %v5838_v29, %v5838_v29  ;;  %v3968_v25 = vpop.f32.mrb[16].mxu1 }
 0x290   : > { %v2301_v47 = vadd.f32 1e-05, %v2221_v30  ;;  %v1829_v50 = vrot.slane %v1828_v34, 1  ;;  %v1507_v45 = vadd.f32 %v3968_v25, %v5726_v33  ;;  %v1501_v13 = vpop.f32.mrb[17].mxu1 }
 0x291   : > { %v4516_v28 = vpop.eup %4515  ;;  %v2036_v26 = vadd.f32 %v2035_v7, %v2034_v35  ;;  %v1833_v55 = vadd.f32 %v1832_v5, %v5831_v3  ;;  %v2040_v60 = vadd.f32 %v2039_v49, %v1962_v10  ;;  %v1502_v21 = vadd.f32 %v5726_v33, %v1501_v13 }
 0x292   : > { %4517 = vrsqrt.f32 %v2301_v47  ;;  %v1830_v53 = vadd.f32 %v1829_v50, %v1828_v34  ;;  %v5850_v14 = vmax.f32 %v1507_v45, 0.0  ;;  %v2332_v12 = vmul.f32 %v4516_v28, %v2236_v51 }
 0x293   : > { %v2037_v20 = vrot.slane %v2036_v26, 1  ;;  %v1834_v39 = vrot.slane %v1833_v55, 4  ;;  %v2041_v58 = vadd.f32 %v2040_v60, %v1963_v17  ;;  %v5855_v36 = vmax.f32 %v1502_v21, 0.0 }
 0x294   : > { %v5857_v8 = vmul.f32 0.03125, %v1830_v53  ;;  %v1965_v19 = vmul.f32 %v5850_v14, %v5850_v14  ;;  %v3971_v59 = vpop.f32.mrb[18].mxu1  ;;  %4070 = vmatprep.mubr.f32.mxu0 %v2332_v12  ;;  %v2333_v22 = vmul.f32 %v4516_v28, %v2237_v1  ;;  %v2334_v61 = vmul.f32 %v4516_v28, %v2238_v6 }
 0x295   : > { %v2038_v51 = vadd.f32 %v2037_v20, %v2036_v26  ;;  %v1835_v44 = vadd.f32 %v1834_v39, %v1833_v55  ;;  %v2042_v0 = vrot.slane %v2041_v58, 4  ;;  %v1840_v2 = vadd.f32 %v5850_v14, %v5855_v36  ;;  %v1511_v16 = vpop.f32.mrb[19].mxu1 }
 0x296   : > { %v2190_v23 = vmul.f32 %v5857_v8, %v5857_v8  ;;  %v2246_v49 = vsub.f32 %v5802_v46, %v5857_v8  ;;  %v1964_v41 = vmul.f32 %v5855_v36, %v5855_v36  ;;  %v1517_v1 = vadd.f32 %v3971_v59, %v5726_v33  ;;  %4071 = vmatmul.mubr.f32.vlgmr.msra.gmra.mrb[64].mxu0 %v2333_v22 }
 0x297   : > { %v2174_v63 = vmul.f32 0.03125, %v2038_v51  ;;  %v1836_v6 = vrot.slane %v1835_v44, 2  ;;  %v2043_v31 = vadd.f32 %v2042_v0, %v2041_v58  ;;  %v1512_v54 = vadd.f32 %v5726_v33, %v1511_v16  ;;  %4073 = vmatprep.mubr.f32.mxu0 %v2334_v61 }
 0x298   : > { %v2048_v40 = vadd.f32 %v1965_v19, %v1964_v41  ;;  %v5877_v35 = vmax.f32 %v1517_v1, 0.0  ;;  %v2335_v30 = vmul.f32 %v4516_v28, %v2239_v9  ;;  %v2244_v34 = vsub.f32 %v5780_v4, %v5857_v8 }
 0x299   : > { %v2206_v7 = vsub.f32 %v2174_v63, %v2190_v23  ;;  %v1837_v5 = vadd.f32 %v1836_v6, %v1835_v44  ;;  %v2044_v10 = vrot.slane %v2043_v31, 2  ;;  %v5884_v25 = vmax.f32 %v1512_v54, 0.0 }
 0x29a   : > { %4074 = vmatmul.mubr.f32.gmra.mrb[66].mxu0 %v2335_v30  ;;  %v2245_v47 = vsub.f32 %v5778_v57, %v5857_v8  ;;  %v2247_v50 = vsub.f32 %v5796_v27, %v5857_v8  ;;  %v1967_v28 = vmul.f32 %v5877_v35, %v5877_v35 }
 0x29b   : > { %v2222_v17 = vmax.f32 %v2206_v7, 0.0  ;;  %v1838_v45 = vrot.slane %v1837_v5, 1  ;;  %v2045_v13 = vadd.f32 %v2044_v10, %v2043_v31  ;;  %v1841_v18 = vadd.f32 %v1840_v2, %v5884_v25  ;;  %v3974_v42 = vpop.f32.mrb[20].mxu1 }
 0x29c   : > { %v4518_v9 = vpop.eup %4517  ;;  %v1966_v26 = vmul.f32 %v5884_v25, %v5884_v25  ;;  %v1527_v55 = vadd.f32 %v3974_v42, %v5726_v33  ;;  %v1521_v60 = vpop.f32.mrb[21].mxu1 }
 0x29d   : > { %v2302_v21 = vadd.f32 1e-05, %v2222_v17  ;;  %v1839_v53 = vadd.f32 %v1838_v45, %v1837_v5  ;;  %v2046_v12 = vrot.slane %v2045_v13, 1  ;;  %v1842_v20 = vadd.f32 %v1841_v18, %v5877_v35 }
 0x29e   : > { %v2049_v39 = vadd.f32 %v2048_v40, %v1966_v26  ;;  %v5897_v58 = vmax.f32 %v1527_v55, 0.0  ;;  %v1522_v19 = vadd.f32 %v5726_v33, %v1521_v60  ;;  %v2336_v59 = vmul.f32 %v4518_v9, %v2240_v24 }
 0x29f   : > { %4519 = vrsqrt.f32 %v2302_v21  ;;  %v2047_v22 = vadd.f32 %v2046_v12, %v2045_v13  ;;  %v5903_v61 = vmul.f32 0.03125, %v1839_v53  ;;  %v1843_v51 = vrot.slane %v1842_v20, 4  ;;  %v3977_v44 = vpop.f32.mrb[22].mxu1 }
 0x2a0   : > { %v2050_v0 = vadd.f32 %v2049_v39, %v1967_v28  ;;  %v1969_v2 = vmul.f32 %v5897_v58, %v5897_v58  ;;  %v5907_v16 = vmax.f32 %v1522_v19, 0.0  ;;  %v1537_v23 = vadd.f32 %v3977_v44, %v5726_v33  ;;  %v1531_v41 = vpop.f32.mrb[23].mxu1  ;;  %4076 = vmatprep.mubr.f32.mxu0 %v2336_v59 }
 0x2a1   : > { %v2175_v1 = vmul.f32 0.03125, %v2047_v22  ;;  %v2191_v37 = vmul.f32 %v5903_v61, %v5903_v61  ;;  %v2250_v24 = vsub.f32 %v5838_v29, %v5903_v61  ;;  %v1844_v63 = vadd.f32 %v1843_v51, %v1842_v20 }
 0x2a2   : > { %v2051_v6 = vrot.slane %v2050_v0, 4  ;;  %v1849_v31 = vadd.f32 %v5897_v58, %v5907_v16  ;;  %v1968_v54 = vmul.f32 %v5907_v16, %v5907_v16  ;;  %v5918_v40 = vmax.f32 %v1537_v23, 0.0 }
 0x2a3   : > { %v2207_v30 = vsub.f32 %v2175_v1, %v2191_v37  ;;  %v1845_v7 = vrot.slane %v1844_v63, 2  ;;  %v1532_v5 = vadd.f32 %v5726_v33, %v1531_v41  ;;  %v2337_v10 = vmul.f32 %v4518_v9, %v2241_v62 }
 0x2a4   : > { %v2052_v17 = vadd.f32 %v2051_v6, %v2050_v0  ;;  %v2057_v45 = vadd.f32 %v1969_v2, %v1968_v54  ;;  %v1971_v13 = vmul.f32 %v5918_v40, %v5918_v40  ;;  %v2338_v18 = vmul.f32 %v4518_v9, %v2242_v48 }
 0x2a5   : > { %v2223_v42 = vmax.f32 %v2207_v30, 0.0  ;;  %v1846_v28 = vadd.f32 %v1845_v7, %v1844_v63  ;;  %v5929_v26 = vmax.f32 %v1532_v5, 0.0  ;;  %v3980_v55 = vpop.f32.mrb[24].mxu1  ;;  %4077 = vmatmul.mubr.f32.gmra.mrb[68].mxu0 %v2337_v10  ;;  %v2339_v56 = vmul.f32 %v4518_v9, %v2243_v52 }
 0x2a6   : > { %v2053_v62 = vrot.slane %v2052_v17, 2  ;;  %v1547_v60 = vadd.f32 %v3980_v55, %v5726_v33  ;;  %v1541_v21 = vpop.f32.mrb[25].mxu1  ;;  %4079 = vmatprep.mubr.f32.mxu0 %v2338_v18  ;;  %v2248_v53 = vsub.f32 %v5816_v32, %v5903_v61  ;;  %v2249_v11 = vsub.f32 %v5814_v15, %v5903_v61 }
 0x2a7   : > { %v2303_v48 = vadd.f32 1e-05, %v2223_v42  ;;  %v1847_v12 = vrot.slane %v1846_v28, 1  ;;  %v1850_v20 = vadd.f32 %v1849_v31, %v5929_v26  ;;  %v1970_v39 = vmul.f32 %v5929_v26, %v5929_v26 }
 0x2a8   : > { %v2054_v38 = vadd.f32 %v2053_v62, %v2052_v17  ;;  %v5942_v43 = vmax.f32 %v1547_v60, 0.0  ;;  %v1542_v52 = vadd.f32 %v5726_v33, %v1541_v21  ;;  %v2251_v9 = vsub.f32 %v5831_v3, %v5903_v61 }
 0x2a9   : > { %v4520_v19 = vpop.eup %4519  ;;  %4521 = vrsqrt.f32 %v2303_v48  ;;  %v1848_v59 = vadd.f32 %v1847_v12, %v1846_v28  ;;  %v1851_v22 = vadd.f32 %v1850_v20, %v5918_v40  ;;  %v2058_v51 = vadd.f32 %v2057_v45, %v1970_v39  ;;  %v3983_v44 = vpop.f32.mrb[26].mxu1  ;;  %4080 = vmatmul.mubr.f32.gmra.mrb[70].mxu0 %v2339_v56 }
 0x2aa   : > { %v2055_v0 = vrot.slane %v2054_v38, 1  ;;  %v1973_v2 = vmul.f32 %v5942_v43, %v5942_v43  ;;  %v5950_v23 = vmax.f32 %v1542_v52, 0.0  ;;  %v1557_v41 = vadd.f32 %v3983_v44, %v5726_v33  ;;  %v1551_v1 = vpop.f32.mrb[27].mxu1 }
 0x2ab   : > { %v5953_v37 = vmul.f32 0.03125, %v1848_v59  ;;  %v1852_v63 = vrot.slane %v1851_v22, 4  ;;  %v2059_v6 = vadd.f32 %v2058_v51, %v1971_v13  ;;  %v1552_v31 = vadd.f32 %v5726_v33, %v1551_v1 }
 0x2ac   : > { %v2056_v54 = vadd.f32 %v2055_v0, %v2054_v38  ;;  %v1858_v30 = vadd.f32 %v5942_v43, %v5950_v23  ;;  %v1972_v7 = vmul.f32 %v5950_v23, %v5950_v23  ;;  %v5960_v5 = vmax.f32 %v1557_v41, 0.0 }
 0x2ad   : > { %v2192_v10 = vmul.f32 %v5953_v37, %v5953_v37  ;;  %v2254_v17 = vsub.f32 %v5884_v25, %v5953_v37  ;;  %v1853_v45 = vadd.f32 %v1852_v63, %v1851_v22  ;;  %v2060_v18 = vrot.slane %v2059_v6, 4 }
 0x2ae   : > { %v2176_v13 = vmul.f32 0.03125, %v2056_v54  ;;  %v2066_v42 = vadd.f32 %v1973_v2, %v1972_v7  ;;  %v1975_v28 = vmul.f32 %v5960_v5, %v5960_v5  ;;  %v5968_v55 = vmax.f32 %v1552_v31, 0.0 }
 0x2af   : > { %v1854_v56 = vrot.slane %v1853_v45, 2  ;;  %v2061_v62 = vadd.f32 %v2060_v18, %v2059_v6  ;;  %v2340_v60 = vmul.f32 %v4520_v19, %v2244_v34  ;;  %v2341_v21 = vmul.f32 %v4520_v19, %v2245_v47 }
 0x2b0   : > { %v2208_v48 = vsub.f32 %v2176_v13, %v2192_v10  ;;  %v1859_v12 = vadd.f32 %v1858_v30, %v5968_v55  ;;  %v1974_v20 = vmul.f32 %v5968_v55, %v5968_v55  ;;  %v3986_v39 = vpop.f32.mrb[28].mxu1  ;;  %v2342_v38 = vmul.f32 %v4520_v19, %v2246_v49 }
 0x2b1   : > { %v1855_v52 = vadd.f32 %v1854_v56, %v1853_v45  ;;  %v2062_v59 = vrot.slane %v2061_v62, 2  ;;  %v1567_v4 = vadd.f32 %v3986_v39, %v5726_v33  ;;  %v1561_v34 = vpop.f32.mrb[29].mxu1  ;;  %4082 = vmatprep.mubr.f32.mxu0 %v2340_v60  ;;  %v2343_v57 = vmul.f32 %v4520_v19, %v2247_v50 }
 0x2b2   : > { %v2224_v47 = vmax.f32 %v2208_v48, 0.0  ;;  %v1860_v22 = vadd.f32 %v1859_v12, %v5960_v5  ;;  %v2067_v51 = vadd.f32 %v2066_v42, %v1974_v20  ;;  %v1562_v44 = vadd.f32 %v5726_v33, %v1561_v34  ;;  %4083 = vmatmul.mubr.f32.gmra.mrb[72].mxu0 %v2341_v21 }
 0x2b3   : > { %v4522_v0 = vpop.eup %4521  ;;  %v1856_v46 = vrot.slane %v1855_v52, 1  ;;  %v2063_v49 = vadd.f32 %v2062_v59, %v2061_v62  ;;  %v5988_v2 = vmax.f32 %v1567_v4, 0.0  ;;  %4085 = vmatprep.mubr.f32.mxu0 %v2342_v38  ;;  %v2252_v41 = vsub.f32 %v5855_v36, %v5953_v37 }
 0x2b4   : > { %v2304_v1 = vadd.f32 1e-05, %v2224_v47  ;;  %v1861_v63 = vrot.slane %v1860_v22, 4  ;;  %v2068_v27 = vadd.f32 %v2067_v51, %v1975_v28  ;;  %v5992_v8 = vmax.f32 %v1562_v44, 0.0  ;;  %v3989_v50 = vpop.f32.mrb[30].mxu1 }
 0x2b5   : > { %v1857_v19 = vadd.f32 %v1856_v46, %v1855_v52  ;;  %v2064_v6 = vrot.slane %v2063_v49, 1  ;;  %v1977_v31 = vmul.f32 %v5988_v2, %v5988_v2  ;;  %v1577_v54 = vadd.f32 %v3989_v50, %v5726_v33  ;;  %v1571_v30 = vpop.f32.mrb[31].mxu1 }
 0x2b6   : > { %4523 = vrsqrt.f32 %v2304_v1  ;;  %v1862_v7 = vadd.f32 %v1861_v63, %v1860_v22  ;;  %v2069_v10 = vrot.slane %v2068_v27, 4  ;;  %v1867_v45 = vadd.f32 %v5988_v2, %v5992_v8  ;;  %4086 = vmatmul.mubr.f32.gmra.mrb[74].mxu0 %v2343_v57 }
 0x2b7   : > { %v2065_v18 = vadd.f32 %v2064_v6, %v2063_v49  ;;  %v5999_v13 = vmul.f32 0.03125, %v1857_v19  ;;  %v1976_v42 = vmul.f32 %v5992_v8, %v5992_v8  ;;  %v6003_v28 = vmax.f32 %v1577_v54, 0.0 }
 0x2b8   : > { %v1863_v56 = vrot.slane %v1862_v7, 2  ;;  %v2070_v62 = vadd.f32 %v2069_v10, %v2068_v27  ;;  %v1572_v60 = vadd.f32 %v5726_v33, %v1571_v30  ;;  %v2344_v21 = vmul.f32 %v4522_v0, %v2248_v53 }
 0x2b9   : > { %v2177_v48 = vmul.f32 0.03125, %v2065_v18  ;;  %v2193_v12 = vmul.f32 %v5999_v13, %v5999_v13  ;;  %v2258_v20 = vsub.f32 %v5929_v26, %v5999_v13  ;;  %v2075_v39 = vadd.f32 %v1977_v31, %v1976_v42 }
 0x2ba   : > { %v1864_v38 = vadd.f32 %v1863_v56, %v1862_v7  ;;  %v2071_v52 = vrot.slane %v2070_v62, 2  ;;  %v1979_v59 = vmul.f32 %v6003_v28, %v6003_v28  ;;  %v6015_v4 = vmax.f32 %v1572_v60, 0.0  ;;  %4088 = vmatprep.mubr.f32.mxu0 %v2344_v21 }
 0x2bb   : > { %v2209_v34 = vsub.f32 %v2177_v48, %v2193_v12  ;;  %v2345_v32 = vmul.f32 %v4522_v0, %v2249_v11  ;;  %v2346_v53 = vmul.f32 %v4522_v0, %v2250_v24  ;;  %v2347_v57 = vmul.f32 %v4522_v0, %v2251_v9 }
 0x2bc   : > { %v1865_v47 = vrot.slane %v1864_v38, 1  ;;  %v2072_v22 = vadd.f32 %v2071_v52, %v2070_v62  ;;  %v1868_v51 = vadd.f32 %v1867_v45, %v6015_v4  ;;  %v1978_v44 = vmul.f32 %v6015_v4, %v6015_v4 }
 0x2bd   : > { %v3992_v46 = vpop.f32.mrb[32].mxu1  ;;  %v2225_v49 = vmax.f32 %v2209_v34, 0.0  ;;  %4089 = vmatmul.mubr.f32.gmra.mrb[76].mxu0 %v2345_v32  ;;  %v2253_v29 = vsub.f32 %v5850_v14, %v5953_v37  ;;  %v2255_v3 = vsub.f32 %v5877_v35, %v5953_v37  ;;  %v2256_v50 = vsub.f32 %v5907_v16, %v5999_v13 }
 0x2be   : > { %v1587_v15 = vadd.f32 %v3992_v46, %v5726_v33  ;;  %v1581_v11 = vpop.f32.mrb[33].mxu1  ;;  %v1866_v61 = vadd.f32 %v1865_v47, %v1864_v38  ;;  %v2073_v24 = vrot.slane %v2072_v22, 1  ;;  %v1869_v9 = vadd.f32 %v1868_v51, %v6003_v28  ;;  %4091 = vmatprep.mubr.f32.mxu0 %v2346_v53 }
 0x2bf   : > { %v2076_v0 = vadd.f32 %v2075_v39, %v1978_v44  ;;  %v2305_v1 = vadd.f32 1e-05, %v2225_v49  ;;  %v1582_v27 = vadd.f32 %v5726_v33, %v1581_v11  ;;  %v2257_v46 = vsub.f32 %v5897_v58, %v5999_v13 }
 0x2c0   : > { %v6035_v63 = vmax.f32 %v1587_v15, 0.0  ;;  %v4524_v19 = vpop.eup %4523  ;;  %v2074_v6 = vadd.f32 %v2073_v24, %v2072_v22  ;;  %v6040_v14 = vmul.f32 0.03125, %v1866_v61  ;;  %v1870_v31 = vrot.slane %v1869_v9, 4 }
 0x2c1   : > { %v2077_v35 = vadd.f32 %v2076_v0, %v1979_v59  ;;  %4525 = vrsqrt.f32 %v2305_v1  ;;  %v6044_v30 = vmax.f32 %v1582_v27, 0.0  ;;  %v3995_v7 = vpop.f32.mrb[34].mxu1  ;;  %4092 = vmatmul.mubr.f32.gmra.mrb[78].mxu0 %v2347_v57  ;;  %v2348_v10 = vmul.f32 %v4524_v19, %v2252_v41 }
 0x2c2   : > { %v1981_v54 = vmul.f32 %v6035_v63, %v6035_v63  ;;  %v2178_v45 = vmul.f32 0.03125, %v2074_v6  ;;  %v2194_v18 = vmul.f32 %v6040_v14, %v6040_v14  ;;  %v2262_v42 = vsub.f32 %v5968_v55, %v6040_v14  ;;  %v1591_v62 = vpop.f32.mrb[35].mxu1 }
 0x2c3   : > { %v1871_v56 = vadd.f32 %v1870_v31, %v1869_v9  ;;  %v2078_v60 = vrot.slane %v2077_v35, 4  ;;  %v1876_v21 = vadd.f32 %v6035_v63, %v6044_v30  ;;  %v1980_v48 = vmul.f32 %v6044_v30, %v6044_v30  ;;  %4094 = vmatprep.mubr.f32.mxu0 %v2348_v10 }
 0x2c4   : > { %v1597_v12 = vadd.f32 %v3995_v7, %v5726_v33  ;;  %v2210_v36 = vsub.f32 %v2178_v45, %v2194_v18  ;;  %v1592_v39 = vadd.f32 %v5726_v33, %v1591_v62  ;;  %v2349_v38 = vmul.f32 %v4524_v19, %v2253_v29 }
 0x2c5   : > { %v1872_v41 = vrot.slane %v1871_v56, 2  ;;  %v2079_v52 = vadd.f32 %v2078_v60, %v2077_v35  ;;  %v2084_v59 = vadd.f32 %v1981_v54, %v1980_v48  ;;  %v2350_v32 = vmul.f32 %v4524_v19, %v2254_v17 }
 0x2c6   : > { %v6059_v34 = vmax.f32 %v1597_v12, 0.0  ;;  %v2226_v53 = vmax.f32 %v2210_v36, 0.0  ;;  %v6064_v47 = vmax.f32 %v1592_v39, 0.0  ;;  %4095 = vmatmul.mubr.f32.gmra.mrb[80].mxu0 %v2349_v38  ;;  %v2351_v22 = vmul.f32 %v4524_v19, %v2255_v3 }
 0x2c7   : > { %v1873_v57 = vadd.f32 %v1872_v41, %v1871_v56  ;;  %v2080_v51 = vrot.slane %v2079_v52, 2  ;;  %4097 = vmatprep.mubr.f32.mxu0 %v2350_v32  ;;  %v2259_v49 = vsub.f32 %v5918_v40, %v5999_v13  ;;  %v2260_v24 = vsub.f32 %v5950_v23, %v6040_v14 }
 0x2c8   : > { %v1983_v44 = vmul.f32 %v6059_v34, %v6059_v34  ;;  %v2306_v15 = vadd.f32 1e-05, %v2226_v53  ;;  %v1877_v37 = vadd.f32 %v1876_v21, %v6064_v47  ;;  %v1982_v17 = vmul.f32 %v6064_v47, %v6064_v47 }
 0x2c9   : > { %v1874_v25 = vrot.slane %v1873_v57, 1  ;;  %v3998_v11 = vpop.f32.mrb[36].mxu1  ;;  %v2081_v29 = vadd.f32 %v2080_v51, %v2079_v52  ;;  %v2261_v58 = vsub.f32 %v5942_v43, %v6040_v14  ;;  %v2263_v31 = vsub.f32 %v5960_v5, %v6040_v14 }
 0x2ca   : > { %v1607_v3 = vadd.f32 %v3998_v11, %v5726_v33  ;;  %v1601_v61 = vpop.f32.mrb[37].mxu1  ;;  %4527 = vrsqrt.f32 %v2306_v15  ;;  %v1878_v9 = vadd.f32 %v1877_v37, %v6059_v34  ;;  %v2085_v0 = vadd.f32 %v2084_v59, %v1982_v17  ;;  %4098 = vmatmul.mubr.f32.gmra.mrb[82].mxu0 %v2351_v22 }
 0x2cb   : > { %v1875_v40 = vadd.f32 %v1874_v25, %v1873_v57  ;;  %v4526_v1 = vpop.eup %4525  ;;  %v2082_v27 = vrot.slane %v2081_v29, 1  ;;  %v1602_v6 = vadd.f32 %v5726_v33, %v1601_v61 }
 0x2cc   : > { %v6081_v19 = vmax.f32 %v1607_v3, 0.0  ;;  %v1879_v54 = vrot.slane %v1878_v9, 4  ;;  %v2086_v7 = vadd.f32 %v2085_v0, %v1983_v44  ;;  %v2352_v45 = vmul.f32 %v4526_v1, %v2256_v50 }
 0x2cd   : > { %v6086_v35 = vmul.f32 0.03125, %v1875_v40  ;;  %v4001_v10 = vpop.f32.mrb[38].mxu1  ;;  %v2083_v18 = vadd.f32 %v2082_v27, %v2081_v29  ;;  %v6093_v62 = vmax.f32 %v1602_v6, 0.0  ;;  %v2353_v57 = vmul.f32 %v4526_v1, %v2257_v46 }
 0x2ce   : > { %v1985_v56 = vmul.f32 %v6081_v19, %v6081_v19  ;;  %v1617_v60 = vadd.f32 %v4001_v10, %v5726_v33  ;;  %v1611_v21 = vpop.f32.mrb[39].mxu1  ;;  %v1880_v36 = vadd.f32 %v1879_v54, %v1878_v9  ;;  %v2087_v41 = vrot.slane %v2086_v7, 4  ;;  %4100 = vmatprep.mubr.f32.mxu0 %v2352_v45 }
 0x2cf   : > { %v2195_v48 = vmul.f32 %v6086_v35, %v6086_v35  ;;  %v2266_v12 = vsub.f32 %v6015_v4, %v6086_v35  ;;  %v2179_v16 = vmul.f32 0.03125, %v2083_v18  ;;  %v1885_v50 = vadd.f32 %v6081_v19, %v6093_v62  ;;  %4101 = vmatmul.mubr.f32.gmra.mrb[84].mxu0 %v2353_v57 }
 0x2d0   : > { %v1984_v39 = vmul.f32 %v6093_v62, %v6093_v62  ;;  %v6104_v38 = vmax.f32 %v1617_v60, 0.0  ;;  %v1881_v52 = vrot.slane %v1880_v36, 2  ;;  %v2088_v59 = vadd.f32 %v2087_v41, %v2086_v7 }
 0x2d1   : > { %v1612_v32 = vadd.f32 %v5726_v33, %v1611_v21  ;;  %v4004_v53 = vpop.f32.mrb[40].mxu1  ;;  %v2211_v22 = vsub.f32 %v2179_v16, %v2195_v48  ;;  %v2354_v46 = vmul.f32 %v4526_v1, %v2258_v20  ;;  %v2355_v40 = vmul.f32 %v4526_v1, %v2259_v49 }
 0x2d2   : > { %v2093_v51 = vadd.f32 %v1985_v56, %v1984_v39  ;;  %v1987_v44 = vmul.f32 %v6104_v38, %v6104_v38  ;;  %v1627_v15 = vadd.f32 %v4004_v53, %v5726_v33  ;;  %v1621_v25 = vpop.f32.mrb[41].mxu1  ;;  %v1882_v37 = vadd.f32 %v1881_v52, %v1880_v36 }
 0x2d3   : > { %v2089_v17 = vrot.slane %v2088_v59, 2  ;;  %v6110_v11 = vmax.f32 %v1612_v32, 0.0  ;;  %v1622_v29 = vadd.f32 %v5726_v33, %v1621_v25  ;;  %v2227_v3 = vmax.f32 %v2211_v22, 0.0  ;;  %4103 = vmatprep.mubr.f32.mxu0 %v2354_v46 }
 0x2d4   : > { %v6113_v61 = vmax.f32 %v1627_v15, 0.0  ;;  %v6118_v9 = vpop.eup %4527  ;;  %v1883_v0 = vrot.slane %v1882_v37, 1  ;;  %4104 = vmatmul.mubr.f32.gmra.mrb[86].mxu0 %v2355_v40  ;;  %v2267_v4 = vsub.f32 %v6003_v28, %v6086_v35 }
 0x2d5   : > { %v2090_v27 = vadd.f32 %v2089_v17, %v2088_v59  ;;  %v1886_v6 = vadd.f32 %v1885_v50, %v6110_v11  ;;  %v1986_v54 = vmul.f32 %v6110_v11, %v6110_v11  ;;  %v4007_v7 = vpop.f32.mrb[42].mxu1  ;;  %v2307_v10 = vadd.f32 1e-05, %v2227_v3 }
 0x2d6   : > { %v1989_v45 = vmul.f32 %v6113_v61, %v6113_v61  ;;  %v6125_v18 = vmax.f32 %v1622_v29, 0.0  ;;  %v1637_v26 = vadd.f32 %v4007_v7, %v5726_v33  ;;  %v1631_v13 = vpop.f32.mrb[43].mxu1  ;;  %v1884_v20 = vadd.f32 %v1883_v0, %v1882_v37 }
 0x2d7   : > { %v2091_v49 = vrot.slane %v2090_v27, 1  ;;  %v1887_v1 = vadd.f32 %v1886_v6, %v6104_v38  ;;  %v2094_v56 = vadd.f32 %v2093_v51, %v1986_v54  ;;  %4529 = vrsqrt.f32 %v2307_v10 }
 0x2d8   : > { %v1894_v60 = vadd.f32 %v6113_v61, %v6125_v18  ;;  %v1988_v21 = vmul.f32 %v6125_v18, %v6125_v18  ;;  %v6133_v48 = vmax.f32 %v1637_v26, 0.0  ;;  %v6135_v41 = vmul.f32 0.03125, %v1884_v20 }
 0x2d9   : > { %v2092_v36 = vadd.f32 %v2091_v49, %v2090_v27  ;;  %v1888_v16 = vrot.slane %v1887_v1, 4  ;;  %v2095_v50 = vadd.f32 %v2094_v56, %v1987_v44  ;;  %v4010_v39 = vpop.f32.mrb[44].mxu1  ;;  %v1632_v32 = vadd.f32 %v5726_v33, %v1631_v13  ;;  %v6170_v49 = vld [vmem:[%s6711_s2 + $0x1] ss:$0 sm:$0xff] }
 0x2da   : > { %v2102_v52 = vadd.f32 %v1989_v45, %v1988_v21  ;;  %v1991_v59 = vmul.f32 %v6133_v48, %v6133_v48  ;;  %v1647_v53 = vadd.f32 %v4010_v39, %v5726_v33  ;;  %v1641_v57 = vpop.f32.mrb[45].mxu1  ;;  %v2196_v51 = vmul.f32 %v6135_v41, %v6135_v41 }
 0x2db   : > { %v2180_v22 = vmul.f32 0.03125, %v2092_v36  ;;  %v2270_v15 = vsub.f32 %v6064_v47, %v6135_v41  ;;  %v1889_v25 = vadd.f32 %v1888_v16, %v1887_v1  ;;  %v2096_v37 = vrot.slane %v2095_v50, 4 }
 0x2dc   : > { %v6145_v44 = vmax.f32 %v1632_v32, 0.0  ;;  %v6147_v17 = vmax.f32 %v1647_v53, 0.0  ;;  %v1642_v29 = vadd.f32 %v5726_v33, %v1641_v57  ;;  %v2356_v0 = vmul.f32 %v6118_v9, %v2260_v24 }
 0x2dd   : > { %v2212_v3 = vsub.f32 %v2180_v22, %v2196_v51  ;;  %v1890_v46 = vrot.slane %v1889_v25, 2  ;;  %v4013_v40 = vpop.f32.mrb[46].mxu1  ;;  %v2357_v27 = vmul.f32 %v6118_v9, %v2261_v58  ;;  %v2097_v6 = vadd.f32 %v2096_v37, %v2095_v50 }
 0x2de   : > { %v1895_v54 = vadd.f32 %v1894_v60, %v6145_v44  ;;  %v1990_v7 = vmul.f32 %v6145_v44, %v6145_v44  ;;  %v1993_v10 = vmul.f32 %v6147_v17, %v6147_v17  ;;  %v1651_v45 = vpop.f32.mrb[47].mxu1  ;;  %v6163_v23 = vmax.f32 %v1642_v29, 0.0  ;;  %4106 = vmatprep.mubr.f32.mxu0 %v2356_v0 }
 0x2df   : > { %v2228_v26 = vmax.f32 %v2212_v3, 0.0  ;;  %v1891_v13 = vadd.f32 %v1890_v46, %v1889_v25  ;;  %v1657_v24 = vadd.f32 %v4013_v40, %v5726_v33  ;;  %v2098_v43 = vrot.slane %v2097_v6, 2  ;;  %4107 = vmatmul.mubr.f32.gmra.mrb[88].mxu0 %v2357_v27 }
 0x2e0   : > { %v1896_v58 = vadd.f32 %v1895_v54, %v6133_v48  ;;  %v2103_v20 = vadd.f32 %v2102_v52, %v1990_v7  ;;  %v1652_v1 = vadd.f32 %v6170_v49, %v1651_v45  ;;  %v1903_v21 = vadd.f32 %v6147_v17, %v6163_v23 }
 0x2e1   : > { %v2308_v56 = vadd.f32 1e-05, %v2228_v26  ;;  %v1892_v60 = vrot.slane %v1891_v13, 1  ;;  %v1992_v33 = vmul.f32 %v6163_v23, %v6163_v23  ;;  %v4016_v36 = vpop.f32.mrb[48].mxu1  ;;  %v6177_v16 = vpop.eup %4529  ;;  %v2099_v50 = vadd.f32 %v2098_v43, %v2097_v6 }
 0x2e2   : > { %v1897_v39 = vrot.slane %v1896_v58, 4  ;;  %v2104_v52 = vadd.f32 %v2103_v20, %v1991_v59  ;;  %v6179_v32 = vmax.f32 %v1657_v24, 0.0  ;;  %v1661_v53 = vpop.f32.mrb[49].mxu1  ;;  %v6181_v51 = vmax.f32 %v1652_v1, 0.0 }
 0x2e3   : > { %4531 = vrsqrt.f32 %v2308_v56  ;;  %v1893_v57 = vadd.f32 %v1892_v60, %v1891_v13  ;;  %v2111_v22 = vadd.f32 %v1993_v10, %v1992_v33  ;;  %v2100_v25 = vrot.slane %v2099_v50, 1 }
 0x2e4   : > { %v1898_v37 = vadd.f32 %v1897_v39, %v1896_v58  ;;  %v2105_v29 = vrot.slane %v2104_v52, 4  ;;  %v1995_v3 = vmul.f32 %v6179_v32, %v6179_v32  ;;  %v1904_v40 = vadd.f32 %v1903_v21, %v6181_v51 }
 0x2e5   : > { %v6185_v46 = vmul.f32 0.03125, %v1893_v57  ;;  %v1994_v59 = vmul.f32 %v6181_v51, %v6181_v51  ;;  %v1667_v0 = vadd.f32 %v6170_v49, %v4016_v36  ;;  %v4019_v27 = vpop.f32.mrb[50].mxu1  ;;  %v2101_v6 = vadd.f32 %v2100_v25, %v2099_v50 }
 0x2e6   : > { %v1899_v54 = vrot.slane %v1898_v37, 2  ;;  %v2106_v7 = vadd.f32 %v2105_v29, %v2104_v52  ;;  %v1662_v10 = vadd.f32 %v6170_v49, %v1661_v53  ;;  %v1671_v45 = vpop.f32.mrb[51].mxu1  ;;  %v1905_v24 = vadd.f32 %v1904_v40, %v6179_v32 }
 0x2e7   : > { %v2197_v26 = vmul.f32 %v6185_v46, %v6185_v46  ;;  %v2274_v13 = vsub.f32 %v6110_v11, %v6185_v46  ;;  %v2112_v43 = vadd.f32 %v2111_v22, %v1994_v59  ;;  %v2181_v58 = vmul.f32 0.03125, %v2101_v6 }
 0x2e8   : > { %v1900_v20 = vadd.f32 %v1899_v54, %v1898_v37  ;;  %v2107_v1 = vrot.slane %v2106_v7, 2  ;;  %v6197_v56 = vmax.f32 %v1667_v0, 0.0  ;;  %v1906_v60 = vrot.slane %v1905_v24, 4 }
 0x2e9   : > { %v2113_v21 = vadd.f32 %v2112_v43, %v1995_v3  ;;  %v6199_v33 = vmax.f32 %v1662_v10, 0.0  ;;  %v2358_v36 = vmul.f32 %v6118_v9, %v2262_v42  ;;  %v4022_v50 = vpop.f32.mrb[52].mxu1  ;;  %v2213_v39 = vsub.f32 %v2181_v58, %v2197_v26 }
 0x2ea   : > { %v1901_v52 = vrot.slane %v1900_v20, 1  ;;  %v2108_v53 = vadd.f32 %v2107_v1, %v2106_v7  ;;  %v1997_v57 = vmul.f32 %v6197_v56, %v6197_v56  ;;  %v1681_v22 = vpop.f32.mrb[53].mxu1  ;;  %v1907_v25 = vadd.f32 %v1906_v60, %v1905_v24 }
 0x2eb   : > { %v2114_v37 = vrot.slane %v2113_v21, 4  ;;  %v1912_v29 = vadd.f32 %v6197_v56, %v6199_v33  ;;  %v1996_v3 = vmul.f32 %v6199_v33, %v6199_v33  ;;  %4109 = vmatprep.mubr.f32.mxu0 %v2358_v36  ;;  %v2229_v55 = vmax.f32 %v2213_v39, 0.0 }
 0x2ec   : > { %v1902_v40 = vadd.f32 %v1901_v52, %v1900_v20  ;;  %v2109_v42 = vrot.slane %v2108_v53, 1  ;;  %v1677_v59 = vadd.f32 %v6170_v49, %v4019_v27  ;;  %v1908_v6 = vrot.slane %v1907_v25, 2 }
 0x2ed   : > { %v6212_v0 = vpop.eup %4531  ;;  %v2115_v54 = vadd.f32 %v2114_v37, %v2113_v21  ;;  %v2120_v7 = vadd.f32 %v1997_v57, %v1996_v3  ;;  %v1672_v10 = vadd.f32 %v6170_v49, %v1671_v45  ;;  %v4025_v26 = vpop.f32.mrb[54].mxu1  ;;  %v2309_v24 = vadd.f32 1e-05, %v2229_v55 }
 0x2ee   : > { %v2110_v43 = vadd.f32 %v2109_v42, %v2108_v53  ;;  %v6215_v58 = vmul.f32 0.03125, %v1902_v40  ;;  %v6217_v1 = vmax.f32 %v1677_v59, 0.0  ;;  %v1691_v60 = vpop.f32.mrb[55].mxu1  ;;  %v1909_v36 = vadd.f32 %v1908_v6, %v1907_v25 }
 0x2ef   : > { %v2116_v20 = vrot.slane %v2115_v54, 2  ;;  %v6219_v39 = vmax.f32 %v1672_v10, 0.0  ;;  %v2359_v27 = vmul.f32 %v6118_v9, %v2263_v31  ;;  %4533 = vrsqrt.f32 %v2309_v24 }
 0x2f0   : > { %v2182_v21 = vmul.f32 0.03125, %v2110_v43  ;;  %v2198_v45 = vmul.f32 %v6215_v58, %v6215_v58  ;;  %v2278_v52 = vsub.f32 %v6145_v44, %v6215_v58  ;;  %v1910_v53 = vrot.slane %v1909_v36, 1  ;;  %v2869_v44 = vld [vmem:[#allocation5 + $0x188] sm:$0xff] }
 0x2f1   : > { %v2117_v57 = vadd.f32 %v2116_v20, %v2115_v54  ;;  %v1999_v25 = vmul.f32 %v6217_v1, %v6217_v1  ;;  %v1913_v37 = vadd.f32 %v1912_v29, %v6219_v39  ;;  %4110 = vmatmul.mubr.f32.gmra.mrb[90].mxu0 %v2359_v27  ;;  %v4028_v3 = vpop.f32.mrb[56].mxu1  ;;  %v1998_v14 = vmul.f32 %v6219_v39, %v6219_v39 }
 0x2f2   : > { %v2214_v5 = vsub.f32 %v2182_v21, %v2198_v45  ;;  %v1687_v31 = vadd.f32 %v6170_v49, %v4022_v50  ;;  %v1682_v9 = vadd.f32 %v6170_v49, %v1681_v22  ;;  %v1701_v55 = vpop.f32.mrb[57].mxu1  ;;  %v1911_v40 = vadd.f32 %v1910_v53, %v1909_v36 }
 0x2f3   : > { %v2118_v42 = vrot.slane %v2117_v57, 1  ;;  %v1914_v59 = vadd.f32 %v1913_v37, %v6217_v1  ;;  %v2264_v6 = vsub.f32 %v5992_v8, %v6086_v35  ;;  %v2121_v29 = vadd.f32 %v2120_v7, %v1998_v14 }
 0x2f4   : > { %v2230_v54 = vmax.f32 %v2214_v5, 0.0  ;;  %v6239_v10 = vmax.f32 %v1687_v31, 0.0  ;;  %v6241_v24 = vmax.f32 %v1682_v9, 0.0  ;;  %v6243_v20 = vmul.f32 0.03125, %v1911_v40 }
 0x2f5   : > { %v2119_v43 = vadd.f32 %v2118_v42, %v2117_v57  ;;  %v1915_v50 = vrot.slane %v1914_v59, 4  ;;  %v2360_v22 = vmul.f32 %v6177_v16, %v2264_v6  ;;  %v6246_v27 = vpop.f32.mrb[58].mxu1  ;;  %v2122_v21 = vadd.f32 %v2121_v29, %v1999_v25 }
 0x2f6   : > { %v2310_v36 = vadd.f32 1e-05, %v2230_v54  ;;  %v2001_v45 = vmul.f32 %v6239_v10, %v6239_v10  ;;  %v1921_v8 = vadd.f32 %v6239_v10, %v6241_v24  ;;  %v6252_v7 = vpop.f32.mrb[59].mxu1  ;;  %v2199_v57 = vmul.f32 %v6243_v20, %v6243_v20 }
 0x2f7   : > { %v2183_v53 = vmul.f32 0.03125, %v2119_v43  ;;  %v1916_v5 = vadd.f32 %v1915_v50, %v1914_v59  ;;  %4112 = vmatprep.mubr.f32.mxu0 %v2360_v22  ;;  %v2123_v14 = vrot.slane %v2122_v21, 4  ;;  %v2000_v25 = vmul.f32 %v6241_v24, %v6241_v24 }
 0x2f8   : > { %4535 = vrsqrt.f32 %v2310_v36  ;;  %v2265_v31 = vsub.f32 %v5988_v2, %v6086_v35  ;;  %v2362_v42 = vmul.f32 %v6177_v16, %v2266_v12  ;;  %v1697_v6 = vadd.f32 %v6170_v49, %v4025_v26 }
 0x2f9   : > { %v2215_v9 = vsub.f32 %v2183_v53, %v2199_v57  ;;  %v1917_v40 = vrot.slane %v1916_v5, 2  ;;  %v4034_v54 = vpop.f32.mrb[60].mxu1  ;;  %v6267_v59 = vpop.eup %4533  ;;  %v2124_v29 = vadd.f32 %v2123_v14, %v2122_v21  ;;  %v2129_v43 = vadd.f32 %v2001_v45, %v2000_v25 }
 0x2fa   : > { %v2361_v50 = vmul.f32 %v6177_v16, %v2265_v31  ;;  %v1692_v22 = vadd.f32 %v6170_v49, %v1691_v60  ;;  %v1721_v36 = vpop.f32.mrb[61].mxu1  ;;  %v6271_v57 = vmax.f32 %v1697_v6, 0.0  ;;  %v1707_v37 = vadd.f32 %v6170_v49, %v4028_v3 }
 0x2fb   : > { %v2231_v2 = vmax.f32 %v2215_v9, 0.0  ;;  %v1918_v53 = vadd.f32 %v1917_v40, %v1916_v5  ;;  %v2125_v12 = vrot.slane %v2124_v29, 2  ;;  %v1702_v21 = vadd.f32 %v6170_v49, %v1701_v55 }
 0x2fc   : > { %4113 = vmatmul.mubr.f32.gmra.mrb[92].mxu0 %v2361_v50  ;;  %v6275_v26 = vmax.f32 %v1692_v22, 0.0  ;;  %v2003_v60 = vmul.f32 %v6271_v57, %v6271_v57  ;;  %v2363_v5 = vmul.f32 %v6177_v16, %v2267_v4  ;;  %v6287_v9 = vmax.f32 %v1707_v37, 0.0 }
 0x2fd   : > { %v2311_v45 = vadd.f32 1e-05, %v2231_v2  ;;  %v1919_v14 = vrot.slane %v1918_v53, 1  ;;  %4115 = vmatprep.mubr.f32.mxu0 %v2362_v42  ;;  %v6282_v25 = vpop.f32.mrb[62].mxu1  ;;  %v2126_v31 = vadd.f32 %v2125_v12, %v2124_v29  ;;  %v6291_v40 = vmax.f32 %v1702_v21, 0.0 }
 0x2fe   : > { %v1922_v28 = vadd.f32 %v1921_v8, %v6275_v26  ;;  %v2002_v35 = vmul.f32 %v6275_v26, %v6275_v26  ;;  %v6289_v3 = vpop.f32.mrb[63].mxu1  ;;  %v2268_v42 = vsub.f32 %v6044_v30, %v6135_v41  ;;  %v2005_v8 = vmul.f32 %v6287_v9, %v6287_v9 }
 0x2ff   : > { %4537 = vrsqrt.f32 %v2311_v45  ;;  %v1920_v55 = vadd.f32 %v1919_v14, %v1918_v53  ;;  %v2127_v16 = vrot.slane %v2126_v31, 1  ;;  %v1930_v37 = vadd.f32 %v6287_v9, %v6291_v40 }
 0x300   : > { %v1923_v6 = vadd.f32 %v1922_v28, %v6271_v57  ;;  %v2130_v29 = vadd.f32 %v2129_v43, %v2002_v35  ;;  %4116 = vmatmul.mubr.f32.gmra.mrb[94].mxu0 %v2363_v5  ;;  %v2004_v22 = vmul.f32 %v6291_v40, %v6291_v40  ;;  %v2364_v2 = vmul.f32 %v6212_v0, %v2268_v42 }
 0x301   : > { %v6298_v50 = vmul.f32 0.03125, %v1920_v55  ;;  %v2128_v30 = vadd.f32 %v2127_v16, %v2126_v31  ;;  %v2269_v43 = vsub.f32 %v6035_v63, %v6135_v41  ;;  %v2366_v5 = vmul.f32 %v6212_v0, %v2270_v15 }
 0x302   : > { %v6305_v53 = vpop.eup %4535  ;;  %v1924_v4 = vrot.slane %v1923_v6, 4  ;;  %v2131_v12 = vadd.f32 %v2130_v29, %v2003_v60  ;;  %v2138_v14 = vadd.f32 %v2005_v8, %v2004_v22  ;;  %4118 = vmatprep.mubr.f32.mxu0 %v2364_v2  ;;  %v1717_v63 = vadd.f32 %v6170_v49, %v6246_v27 }
 0x303   : > { %v2200_v21 = vmul.f32 %v6298_v50, %v6298_v50  ;;  %v2286_v45 = vsub.f32 %v6219_v39, %v6298_v50  ;;  %v2184_v28 = vmul.f32 0.03125, %v2128_v30  ;;  %v2365_v60 = vmul.f32 %v6212_v0, %v2269_v43 }
 0x304   : > { %v1925_v31 = vadd.f32 %v1924_v4, %v1923_v6  ;;  %v2132_v35 = vrot.slane %v2131_v12, 4  ;;  %v1712_v55 = vadd.f32 %v6170_v49, %v6252_v7  ;;  %v2271_v42 = vsub.f32 %v6059_v34, %v6135_v41 }
 0x305   : > { %v1727_v16 = vadd.f32 %v6170_v49, %v4034_v54  ;;  %v2216_v29 = vsub.f32 %v2184_v28, %v2200_v21  ;;  %4119 = vmatmul.mubr.f32.gmra.mrb[96].mxu0 %v2365_v60  ;;  %v1722_v15 = vadd.f32 %v6170_v49, %v1721_v36  ;;  %v6326_v6 = vmax.f32 %v1717_v63, 0.0 }
 0x306   : > { %v1926_v47 = vrot.slane %v1925_v31, 2  ;;  %v2133_v8 = vadd.f32 %v2132_v35, %v2131_v12  ;;  %4121 = vmatprep.mubr.f32.mxu0 %v2366_v5  ;;  %v6328_v22 = vmax.f32 %v1712_v55, 0.0  ;;  %v2367_v27 = vmul.f32 %v6212_v0, %v2271_v42 }
 0x307   : > { %v6331_v2 = vmax.f32 %v1727_v16, 0.0  ;;  %v2232_v7 = vmax.f32 %v2216_v29, 0.0  ;;  %v6333_v41 = vmax.f32 %v1722_v15, 0.0  ;;  %v2007_v4 = vmul.f32 %v6326_v6, %v6326_v6 }
 0x308   : > { %v1927_v30 = vadd.f32 %v1926_v47, %v1925_v31  ;;  %v2134_v34 = vrot.slane %v2133_v8, 2  ;;  %v1931_v36 = vadd.f32 %v1930_v37, %v6328_v22  ;;  %v2006_v12 = vmul.f32 %v6328_v22, %v6328_v22 }
 0x309   : > { %v6335_v54 = vpop.eup %4537  ;;  %v2009_v0 = vmul.f32 %v6331_v2, %v6331_v2  ;;  %v2312_v43 = vadd.f32 1e-05, %v2232_v7  ;;  %4122 = vmatmul.mubr.f32.gmra.mrb[98].mxu0 %v2367_v27  ;;  %v1939_v28 = vadd.f32 %v6331_v2, %v6333_v41  ;;  %v2008_v60 = vmul.f32 %v6333_v41, %v6333_v41 }
 0x30a   : > { %v1928_v21 = vrot.slane %v1927_v30, 1  ;;  %v2135_v5 = vadd.f32 %v2134_v34, %v2133_v8  ;;  %v1932_v31 = vadd.f32 %v1931_v36, %v6326_v6  ;;  %v2139_v35 = vadd.f32 %v2138_v14, %v2006_v12 }
 0x30b   : > { %v2272_v37 = vsub.f32 %v6093_v62, %v6185_v46  ;;  %4539 = vrsqrt.f32 %v2312_v43  ;;  %v2273_v42 = vsub.f32 %v6081_v19, %v6185_v46  ;;  %v2147_v47 = vadd.f32 %v2009_v0, %v2008_v60 }
 0x30c   : > { %v1929_v63 = vadd.f32 %v1928_v21, %v1927_v30  ;;  %v2136_v55 = vrot.slane %v2135_v5, 1  ;;  %v1933_v16 = vrot.slane %v1932_v31, 4  ;;  %v2140_v29 = vadd.f32 %v2139_v35, %v2007_v4 }
 0x30d   : > { %v2368_v8 = vmul.f32 %v6267_v59, %v2272_v37  ;;  %v2369_v14 = vmul.f32 %v6267_v59, %v2273_v42  ;;  %v2370_v62 = vmul.f32 %v6267_v59, %v2274_v13  ;;  %v1737_v19 = vadd.f32 %v6170_v49, %v6282_v25 }
 0x30e   : > { %v2137_v15 = vadd.f32 %v2136_v55, %v2135_v5  ;;  %v6354_v27 = vmul.f32 0.03125, %v1929_v63  ;;  %v1934_v7 = vadd.f32 %v1933_v16, %v1932_v31  ;;  %v2141_v30 = vrot.slane %v2140_v29, 4 }
 0x30f   : > { %4124 = vmatprep.mubr.f32.mxu0 %v2368_v8  ;;  %v1732_v34 = vadd.f32 %v6170_v49, %v6289_v3  ;;  %v2275_v11 = vsub.f32 %v6104_v38, %v6185_v46  ;;  %v6371_v43 = vmax.f32 %v1737_v19, 0.0  ;;  %v2276_v3 = vsub.f32 %v6125_v18, %v6215_v58  ;;  %v2868_v19 = vld [vmem:[#allocation5 + $0x180] sm:$0xff] }
 0x310   : > { %v2185_v4 = vmul.f32 0.03125, %v2137_v15  ;;  %v2201_v36 = vmul.f32 %v6354_v27, %v6354_v27  ;;  %v2290_v12 = vsub.f32 %v6275_v26, %v6354_v27  ;;  %4125 = vmatmul.mubr.f32.gmra.mrb[100].mxu0 %v2369_v14  ;;  %v1935_v13 = vrot.slane %v1934_v7, 2 }
 0x311   : > { %v2142_v0 = vadd.f32 %v2141_v30, %v2140_v29  ;;  %4127 = vmatprep.mubr.f32.mxu0 %v2370_v62  ;;  %v6373_v25 = vmax.f32 %v1732_v34, 0.0  ;;  %v2371_v49 = vmul.f32 %v6267_v59, %v2275_v11  ;;  %v2277_v5 = vsub.f32 %v6113_v61, %v6215_v58 }
 0x312   : > { %v2217_v21 = vsub.f32 %v2185_v4, %v2201_v36  ;;  %v1936_v31 = vadd.f32 %v1935_v13, %v1934_v7  ;;  %v2011_v38 = vmul.f32 %v6371_v43, %v6371_v43  ;;  %v2372_v59 = vmul.f32 %v6305_v53, %v2276_v3 }
 0x313   : > { %v2143_v35 = vrot.slane %v2142_v0, 2  ;;  %v1940_v46 = vadd.f32 %v1939_v28, %v6373_v25  ;;  %v2010_v37 = vmul.f32 %v6373_v25, %v6373_v25  ;;  %v2373_v63 = vmul.f32 %v6305_v53, %v2277_v5 }
 0x314   : > { %v2233_v60 = vmax.f32 %v2217_v21, 0.0  ;;  %4128 = vmatmul.mubr.f32.gmra.mrb[102].mxu0 %v2371_v49  ;;  %v1937_v18 = vrot.slane %v1936_v31, 1  ;;  %v2374_v42 = vmul.f32 %v6305_v53, %v2278_v52  ;;  %v2279_v8 = vsub.f32 %v6133_v48, %v6215_v58 }
 0x315   : > { %v2144_v55 = vadd.f32 %v2143_v35, %v2142_v0  ;;  %v1941_v61 = vadd.f32 %v1940_v46, %v6371_v43  ;;  %v4540_v16 = vpop.eup %4539  ;;  %v2148_v29 = vadd.f32 %v2147_v47, %v2010_v37  ;;  %4130 = vmatprep.mubr.f32.mxu0 %v2372_v59  ;;  %v2280_v15 = vsub.f32 %v6163_v23, %v6243_v20  ;;  %v2871_v46 = vld [vmem:[#allocation5 + $0x198] sm:$0xff] }
 0x316   : > { %v2313_v28 = vadd.f32 1e-05, %v2233_v60  ;;  %v1938_v14 = vadd.f32 %v1937_v18, %v1936_v31  ;;  %v2281_v30 = vsub.f32 %v6147_v17, %v6243_v20  ;;  %v2375_v47 = vmul.f32 %v6305_v53, %v2279_v8 }
 0x317   : > { %v2145_v62 = vrot.slane %v2144_v55, 1  ;;  %v1942_v7 = vrot.slane %v1941_v61, 4  ;;  %v2149_v52 = vadd.f32 %v2148_v29, %v2011_v38  ;;  %v2376_v34 = vmul.f32 %v6335_v54, %v2280_v15 }
 0x318   : > { %4541 = vrsqrt.f32 %v2313_v28  ;;  %4131 = vmatmul.mubr.f32.gmra.mrb[104].mxu0 %v2373_v63  ;;  %v6400_v48 = vmul.f32 0.03125, %v1938_v14  ;;  %v2377_v23 = vmul.f32 %v6335_v54, %v2281_v30  ;;  %v6749_v17 = vsub.f32 %v6181_v51, %v6243_v20 }
 0x319   : > { %v2146_v4 = vadd.f32 %v2145_v62, %v2144_v55  ;;  %v1943_v58 = vadd.f32 %v1942_v7, %v1941_v61  ;;  %4133 = vmatprep.mubr.f32.mxu0 %v2374_v42  ;;  %v2150_v36 = vrot.slane %v2149_v52, 4  ;;  %v4390_v13 = vpack.c.bf16 %v2869_v44, %v2868_v19  ;;  %v2872_v61 = vld [vmem:[#allocation5 + $0x1a0] sm:$0xff]  ;;  %v2873_v42 = vld [vmem:[#allocation5 + $0x1a8] sm:$0xff]  ;;  %v2875_v19 = vld [vmem:[#allocation5 + $0x1b8] sm:$0xff] }
 0x31a   : > { %v2378_v11 = vmul.f32 %v6335_v54, %v6749_v17  ;;  %v2283_v0 = vsub.f32 %v6179_v32, %v6243_v20  ;;  %v2202_v21 = vmul.f32 %v6400_v48, %v6400_v48  ;;  %v2294_v49 = vsub.f32 %v6328_v22, %v6400_v48  ;;  %v2870_v20 = vld [vmem:[#allocation5 + $0x190] sm:$0xff]  ;;  %v2879_v17 = vld [vmem:[#allocation5 + $0x1d8] sm:$0xff] }
 0x31b   : > { %v2186_v53 = vmul.f32 0.03125, %v2146_v4  ;;  %v1944_v3 = vrot.slane %v1943_v58, 2  ;;  %v2151_v5 = vadd.f32 %v2150_v36, %v2149_v52  ;;  %4391 = vmatprep.subr.bf16.mxu1 %v4390_v13  ;;  %v2284_v51 = vsub.f32 %v6199_v33, %v6298_v50  ;;  %v2876_v4 = vld [vmem:[#allocation5 + $0x1c0] sm:$0xff] }
 0x31c   : > { %4134 = vmatmul.mubr.f32.gmra.mrb[106].mxu0 %v2375_v47  ;;  %v2379_v31 = vmul.f32 %v6335_v54, %v2283_v0  ;;  %4393 = vmatpush3.bf16.msra.mxu1 %v4390_v13  ;;  %v2285_v32 = vsub.f32 %v6197_v56, %v6298_v50  ;;  %v2382_v59 = vmul.f32 %v4540_v16, %v2286_v45  ;;  %v2880_v0 = vld [vmem:[#allocation5 + $0x1e0] sm:$0xff] }
 0x31d   : > { %v2218_v35 = vsub.f32 %v2186_v53, %v2202_v21  ;;  %v1945_v38 = vadd.f32 %v1944_v3, %v1943_v58  ;;  %4136 = vmatprep.mubr.f32.mxu0 %v2376_v34  ;;  %v2152_v60 = vrot.slane %v2151_v5, 2  ;;  %v2380_v37 = vmul.f32 %v4540_v16, %v2284_v51  ;;  %v2877_v58 = vld [vmem:[#allocation5 + $0x1c8] sm:$0xff]  ;;  %v2882_v51 = vld [vmem:[#allocation5 + $0x1f0] sm:$0xff] }
 0x31e   : > { %v2287_v54 = vsub.f32 %v6217_v1, %v6298_v50  ;;  %v2381_v18 = vmul.f32 %v4540_v16, %v2285_v32  ;;  %v2288_v55 = vsub.f32 %v6241_v24, %v6354_v27  ;;  %v2289_v29 = vsub.f32 %v6239_v10, %v6354_v27  ;;  %v2881_v53 = vld [vmem:[#allocation5 + $0x1e8] sm:$0xff] }
 0x31f   : > { %v2234_v63 = vmax.f32 %v2218_v35, 0.0  ;;  %v1946_v33 = vrot.slane %v1945_v38, 1  ;;  %v2153_v56 = vadd.f32 %v2152_v60, %v2151_v5  ;;  %v4394_v8 = vpack.c.bf16 %v2871_v46, %v2870_v20  ;;  %v2883_v35 = vld [vmem:[#allocation5 + $0x1f8] sm:$0xff]  ;;  %v6456_v46 = vld [vmem:[%s6711_s2 + $0x2] ss:$0 sm:$0xff] }
 0x320   : > { %4137 = vmatmul.mubr.f32.gmra.mrb[108].mxu0 %v2377_v23  ;;  %v2383_v28 = vmul.f32 %v4540_v16, %v2287_v54  ;;  %v2291_v1 = vsub.f32 %v6271_v57, %v6354_v27  ;;  %v2292_v50 = vsub.f32 %v6291_v40, %v6400_v48  ;;  %v2293_v14 = vsub.f32 %v6287_v9, %v6400_v48  ;;  %v2874_v57 = vld [vmem:[#allocation5 + $0x1b0] sm:$0xff] }
 0x321   : > { %v2314_v39 = vadd.f32 1e-05, %v2234_v63  ;;  %v1947_v45 = vadd.f32 %v1946_v33, %v1945_v38  ;;  %4139 = vmatprep.mubr.f32.mxu0 %v2378_v11  ;;  %v2154_v24 = vrot.slane %v2153_v56, 1  ;;  %4395 = vmatprep.subr.bf16.mxu1 %v4394_v8  ;;  %v2295_v16 = vsub.f32 %v6326_v6, %v6400_v48 }
 0x322   : > { %v4542_v15 = vpop.eup %4541  ;;  %v4398_v10 = vpack.c.bf16 %v2873_v42, %v2872_v61  ;;  %4397 = vmatpush3.bf16.msra.mxu1 %v4394_v8  ;;  %v4402_v27 = vpack.c.bf16 %v2875_v19, %v2874_v57  ;;  %v4406_v36 = vpack.c.bf16 %v2877_v58, %v2876_v4  ;;  %v4418_v38 = vpack.c.bf16 %v2883_v35, %v2882_v51 }
 0x323   : > { %4543 = vrsqrt.f32 %v2314_v39  ;;  %v6435_v62 = vmul.f32 0.03125, %v1947_v45  ;;  %v2384_v7 = vmul.f32 %v4542_v15, %v2288_v55  ;;  %v2385_v30 = vmul.f32 %v4542_v15, %v2289_v29 }
 0x324   : > { %v2155_v44 = vadd.f32 %v2154_v24, %v2153_v56  ;;  %4140 = vmatmul.mubr.f32.gmra.mrb[110].mxu0 %v2379_v31  ;;  %v2386_v40 = vmul.f32 %v4542_v15, %v2290_v12  ;;  %v2387_v52 = vmul.f32 %v4542_v15, %v2291_v1  ;;  %4399 = vmatprep.subr.bf16.mxu1 %v4398_v10 }
 0x325   : > { %v2203_v9 = vmul.f32 %v6435_v62, %v6435_v62  ;;  %v2298_v6 = vsub.f32 %v6373_v25, %v6435_v62  ;;  %4142 = vmatprep.mubr.f32.mxu0 %v2380_v37  ;;  %v2296_v47 = vsub.f32 %v6333_v41, %v6435_v62  ;;  %v2297_v34 = vsub.f32 %v6331_v2, %v6435_v62  ;;  %v2878_v25 = vld [vmem:[#allocation5 + $0x1d0] sm:$0xff] }
 0x326   : > { %v2187_v23 = vmul.f32 0.03125, %v2155_v44  ;;  %v2299_v26 = vsub.f32 %v6371_v43, %v6435_v62  ;;  %4401 = vmatpush3.bf16.msra.mxu1 %v4398_v10  ;;  %v4410_v2 = vpack.c.bf16 %v2879_v17, %v2878_v25  ;;  %v4414_v31 = vpack.c.bf16 %v2881_v53, %v2880_v0 }
 0x327   : > { %4403 = vmatprep.subr.bf16.mxu1 %v4402_v27 }
 0x328   : > { %v2219_v12 = vsub.f32 %v2187_v23, %v2203_v9  ;;  %4143 = vmatmul.mubr.f32.gmra.mrb[112].mxu0 %v2381_v18 }
 0x329   : > { %4145 = vmatprep.mubr.f32.mxu0 %v2382_v59 }
 0x32a   : > { %v2235_v11 = vmax.f32 %v2219_v12, 0.0  ;;  %4405 = vmatpush3.bf16.msra.mxu1 %v4402_v27 }
 0x32b   : > { %4407 = vmatprep.subr.bf16.mxu1 %v4406_v36 }
 0x32c   : > { %v2315_v41 = vadd.f32 1e-05, %v2235_v11  ;;  %4146 = vmatmul.mubr.f32.gmra.mrb[114].mxu0 %v2383_v28 }
 0x32d   : > { %v4544_v13 = vpop.eup %4543  ;;  %4148 = vmatprep.mubr.f32.mxu0 %v2384_v7 }
 0x32e   : > { %4545 = vrsqrt.f32 %v2315_v41  ;;  %v2388_v43 = vmul.f32 %v4544_v13, %v2292_v50  ;;  %v2389_v21 = vmul.f32 %v4544_v13, %v2293_v14  ;;  %v2390_v3 = vmul.f32 %v4544_v13, %v2294_v49  ;;  %4409 = vmatpush3.bf16.msra.mxu1 %v4406_v36 }
 0x32f   : > { %v2391_v5 = vmul.f32 %v4544_v13, %v2295_v16  ;;  %4411 = vmatprep.subr.bf16.mxu1 %v4410_v2 }
 0x330   : > { %4149 = vmatmul.mubr.f32.gmra.mrb[116].mxu0 %v2385_v30 }
 0x331   : > { %4151 = vmatprep.mubr.f32.mxu0 %v2386_v40 }
 0x332   : > { %4413 = vmatpush3.bf16.msra.mxu1 %v4410_v2 }
 0x333   : > { %4415 = vmatprep.subr.bf16.mxu1 %v4414_v31 }
 0x334   : > { %4152 = vmatmul.mubr.f32.gmra.mrb[118].mxu0 %v2387_v52 }
 0x335   : > { %4154 = vmatprep.mubr.f32.mxu0 %v2388_v43 }
 0x336   : > { %4417 = vmatpush3.bf16.msra.mxu1 %v4414_v31 }
 0x337   : > { %4419 = vmatprep.subr.bf16.mxu1 %v4418_v38 }
 0x338   : > { %v4546_v32 = vpop.eup %4545  ;;  %4155 = vmatmul.mubr.f32.gmra.mrb[120].mxu0 %v2389_v21 }
 0x339   : > { %4157 = vmatprep.mubr.f32.mxu0 %v2390_v3  ;;  %v2392_v22 = vmul.f32 %v4546_v32, %v2296_v47  ;;  %v2393_v48 = vmul.f32 %v4546_v32, %v2297_v34  ;;  %v2394_v49 = vmul.f32 %v4546_v32, %v2298_v6  ;;  %v2395_v20 = vmul.f32 %v4546_v32, %v2299_v26 }
 0x33a   : > { %4421 = vmatpush3.bf16.msra.mxu1 %v4418_v38 }
 0x33c   : > { %4158 = vmatmul.mubr.f32.gmra.mrb[122].mxu0 %v2391_v5 }
 0x33d   : > { %4160 = vmatprep.mubr.f32.mxu0 %v2392_v22 }
 0x340   : > { %4161 = vmatmul.mubr.f32.gmra.mrb[124].mxu0 %v2393_v48 }
 0x341   : > { %4163 = vmatprep.mubr.f32.mxu0 %v2394_v49 }
 0x344   : > { %4164 = vmatmul.mubr.f32.gmra.mrb[126].mxu0 %v2395_v20 }
 0x369   : > { %v4072_v60 = vpop.f32.mrb[64].mxu0 }
 0x36a   : > { %v2490_v37 = vadd.f32 %v4072_v60, %v6456_v46  ;;  %v2484_v59 = vpop.f32.mrb[65].mxu0 }
 0x36b   : > { %v2485_v54 = vadd.f32 %v6456_v46, %v2484_v59 }
 0x36c   : > { %v2804_v18 = vmax.f32 %v2490_v37, 0.0 }
 0x36d   : > { %v2803_v63 = vmax.f32 %v2485_v54, 0.0  ;;  %v4075_v33 = vpop.f32.mrb[66].mxu0 }
 0x36e   : > { %v2500_v55 = vadd.f32 %v4075_v33, %v6456_v46  ;;  %v2494_v61 = vpop.f32.mrb[67].mxu0 }
 0x36f   : > { %v2495_v42 = vadd.f32 %v6456_v46, %v2494_v61  ;;  %4198 = vmatprep.mubr.f32.mxu1 %v2803_v63 }
 0x370   : > { %4199 = vmatmul.mubr.f32.vlgmr.msra.gmra.mrb[64].mxu1 %v2804_v18  ;;  %v2806_v28 = vmax.f32 %v2500_v55, 0.0 }
 0x371   : > { %v2805_v56 = vmax.f32 %v2495_v42, 0.0 }
 0x373   : > { %4201 = vmatprep.mubr.f32.mxu1 %v2805_v56 }
 0x374   : > { %4202 = vmatmul.mubr.f32.gmra.mrb[66].mxu1 %v2806_v28 }
 0x378   : > { %v4078_v29 = vpop.f32.mrb[68].mxu0 }
 0x379   : > { %v2510_v8 = vadd.f32 %v4078_v29, %v6456_v46  ;;  %v2504_v39 = vpop.f32.mrb[69].mxu0 }
 0x37a   : > { %v2505_v45 = vadd.f32 %v6456_v46, %v2504_v39 }
 0x37b   : > { %v2808_v15 = vmax.f32 %v2510_v8, 0.0 }
 0x37c   : > { %v2807_v1 = vmax.f32 %v2505_v45, 0.0  ;;  %v4081_v50 = vpop.f32.mrb[70].mxu0 }
 0x37d   : > { %v2520_v24 = vadd.f32 %v4081_v50, %v6456_v46  ;;  %v2514_v14 = vpop.f32.mrb[71].mxu0 }
 0x37e   : > { %v2515_v16 = vadd.f32 %v6456_v46, %v2514_v14  ;;  %4204 = vmatprep.mubr.f32.mxu1 %v2807_v1 }
 0x37f   : > { %4205 = vmatmul.mubr.f32.gmra.mrb[68].mxu1 %v2808_v15  ;;  %v2810_v62 = vmax.f32 %v2520_v24, 0.0 }
 0x380   : > { %v2809_v10 = vmax.f32 %v2515_v16, 0.0 }
 0x382   : > { %4207 = vmatprep.mubr.f32.mxu1 %v2809_v10 }
 0x383   : > { %4208 = vmatmul.mubr.f32.gmra.mrb[70].mxu1 %v2810_v62 }
 0x385   : > { %v4084_v7 = vpop.f32.mrb[72].mxu0 }
 0x386   : > { %v2530_v30 = vadd.f32 %v4084_v7, %v6456_v46  ;;  %v2524_v57 = vpop.f32.mrb[73].mxu0 }
 0x387   : > { %v2525_v19 = vadd.f32 %v6456_v46, %v2524_v57 }
 0x388   : > { %v2812_v52 = vmax.f32 %v2530_v30, 0.0 }
 0x389   : > { %v2811_v44 = vmax.f32 %v2525_v19, 0.0  ;;  %v4087_v40 = vpop.f32.mrb[74].mxu0 }
 0x38a   : > { %v2540_v9 = vadd.f32 %v4087_v40, %v6456_v46  ;;  %v2534_v6 = vpop.f32.mrb[75].mxu0 }
 0x38b   : > { %v2535_v47 = vadd.f32 %v6456_v46, %v2534_v6  ;;  %4210 = vmatprep.mubr.f32.mxu1 %v2811_v44 }
 0x38c   : > { %4211 = vmatmul.mubr.f32.gmra.mrb[72].mxu1 %v2812_v52  ;;  %v2814_v4 = vmax.f32 %v2540_v9, 0.0 }
 0x38d   : > { %v2813_v34 = vmax.f32 %v2535_v47, 0.0 }
 0x38f   : > { %4213 = vmatprep.mubr.f32.mxu1 %v2813_v34 }
 0x390   : > { %v4090_v58 = vpop.f32.mrb[76].mxu0  ;;  %4214 = vmatmul.mubr.f32.gmra.mrb[74].mxu1 %v2814_v4 }
 0x391   : > { %v2550_v23 = vadd.f32 %v4090_v58, %v6456_v46  ;;  %v2544_v26 = vpop.f32.mrb[77].mxu0 }
 0x392   : > { %v2545_v27 = vadd.f32 %v6456_v46, %v2544_v26 }
 0x393   : > { %v2816_v25 = vmax.f32 %v2550_v23, 0.0 }
 0x394   : > { %v2815_v12 = vmax.f32 %v2545_v27, 0.0  ;;  %v4093_v36 = vpop.f32.mrb[78].mxu0 }
 0x395   : > { %v2560_v17 = vadd.f32 %v4093_v36, %v6456_v46  ;;  %v2554_v11 = vpop.f32.mrb[79].mxu0 }
 0x396   : > { %v2555_v41 = vadd.f32 %v6456_v46, %v2554_v11  ;;  %4216 = vmatprep.mubr.f32.mxu1 %v2815_v12 }
 0x397   : > { %4217 = vmatmul.mubr.f32.gmra.mrb[76].mxu1 %v2816_v25  ;;  %v2818_v13 = vmax.f32 %v2560_v17, 0.0 }
 0x398   : > { %v2817_v2 = vmax.f32 %v2555_v41, 0.0 }
 0x399   : > { %v4096_v0 = vpop.f32.mrb[80].mxu0 }
 0x39a   : > { %v2570_v53 = vadd.f32 %v4096_v0, %v6456_v46  ;;  %v2564_v43 = vpop.f32.mrb[81].mxu0  ;;  %4219 = vmatprep.mubr.f32.mxu1 %v2817_v2 }
 0x39b   : > { %v2565_v21 = vadd.f32 %v6456_v46, %v2564_v43  ;;  %4220 = vmatmul.mubr.f32.gmra.mrb[78].mxu1 %v2818_v13 }
 0x39c   : > { %v2820_v31 = vmax.f32 %v2570_v53, 0.0 }
 0x39d   : > { %v2819_v3 = vmax.f32 %v2565_v21, 0.0  ;;  %v4099_v5 = vpop.f32.mrb[82].mxu0 }
 0x39e   : > { %v2580_v51 = vadd.f32 %v4099_v5, %v6456_v46  ;;  %v2574_v35 = vpop.f32.mrb[83].mxu0 }
 0x39f   : > { %v2575_v38 = vadd.f32 %v6456_v46, %v2574_v35  ;;  %4222 = vmatprep.mubr.f32.mxu1 %v2819_v3 }
 0x3a0   : > { %4223 = vmatmul.mubr.f32.gmra.mrb[80].mxu1 %v2820_v31  ;;  %v2822_v22 = vmax.f32 %v2580_v51, 0.0 }
 0x3a1   : > { %v2821_v32 = vmax.f32 %v2575_v38, 0.0 }
 0x3a2   : > { %v4102_v48 = vpop.f32.mrb[84].mxu0 }
 0x3a3   : > { %4225 = vmatprep.mubr.f32.mxu1 %v2821_v32  ;;  %v2590_v49 = vadd.f32 %v4102_v48, %v6456_v46  ;;  %v2584_v20 = vpop.f32.mrb[85].mxu0 }
 0x3a4   : > { %4226 = vmatmul.mubr.f32.gmra.mrb[82].mxu1 %v2822_v22  ;;  %v2585_v60 = vadd.f32 %v6456_v46, %v2584_v20 }
 0x3a5   : > { %v2824_v54 = vmax.f32 %v2590_v49, 0.0 }
 0x3a6   : > { %v2823_v37 = vmax.f32 %v2585_v60, 0.0 }
 0x3a7   : > { %v4105_v59 = vpop.f32.mrb[86].mxu0 }
 0x3a8   : > { %v2600_v63 = vadd.f32 %v4105_v59, %v6456_v46  ;;  %v2594_v33 = vpop.f32.mrb[87].mxu0  ;;  %4228 = vmatprep.mubr.f32.mxu1 %v2823_v37 }
 0x3a9   : > { %v2595_v18 = vadd.f32 %v6456_v46, %v2594_v33  ;;  %4229 = vmatmul.mubr.f32.gmra.mrb[84].mxu1 %v2824_v54 }
 0x3aa   : > { %v2826_v61 = vmax.f32 %v2600_v63, 0.0 }
 0x3ab   : > { %v2825_v55 = vmax.f32 %v2595_v18, 0.0 }
 0x3ad   : > { %4231 = vmatprep.mubr.f32.mxu1 %v2825_v55 }
 0x3ae   : > { %4232 = vmatmul.mubr.f32.gmra.mrb[86].mxu1 %v2826_v61 }
 0x3b2   : > { %v4108_v42 = vpop.f32.mrb[88].mxu0 }
 0x3b3   : > { %v2610_v56 = vadd.f32 %v4108_v42, %v6456_v46  ;;  %v2604_v28 = vpop.f32.mrb[89].mxu0 }
 0x3b4   : > { %v2605_v29 = vadd.f32 %v6456_v46, %v2604_v28 }
 0x3b5   : > { %v2828_v39 = vmax.f32 %v2610_v56, 0.0 }
 0x3b6   : > { %v2827_v8 = vmax.f32 %v2605_v29, 0.0 }
 0x3b8   : > { %4234 = vmatprep.mubr.f32.mxu1 %v2827_v8 }
 0x3b9   : > { %4235 = vmatmul.mubr.f32.gmra.mrb[88].mxu1 %v2828_v39 }
 0x3c4   : > { %v4111_v45 = vpop.f32.mrb[90].mxu0 }
 0x3c5   : > { %v2620_v1 = vadd.f32 %v4111_v45, %v6456_v46  ;;  %v2614_v50 = vpop.f32.mrb[91].mxu0 }
 0x3c6   : > { %v2615_v15 = vadd.f32 %v6456_v46, %v2614_v50 }
 0x3c7   : > { %v2830_v14 = vmax.f32 %v2620_v1, 0.0 }
 0x3c8   : > { %v2829_v24 = vmax.f32 %v2615_v15, 0.0 }
 0x3ca   : > { %4237 = vmatprep.mubr.f32.mxu1 %v2829_v24 }
 0x3cb   : > { %4238 = vmatmul.mubr.f32.gmra.mrb[90].mxu1 %v2830_v14 }
 0x3cf   : > { %v4114_v16 = vpop.f32.mrb[92].mxu0 }
 0x3d0   : > { %v2630_v10 = vadd.f32 %v4114_v16, %v6456_v46  ;;  %v2624_v62 = vpop.f32.mrb[93].mxu0 }
 0x3d1   : > { %v2625_v7 = vadd.f32 %v6456_v46, %v2624_v62 }
 0x3d2   : > { %v2832_v19 = vmax.f32 %v2630_v10, 0.0 }
 0x3d3   : > { %v2831_v30 = vmax.f32 %v2625_v7, 0.0  ;;  %v4117_v57 = vpop.f32.mrb[94].mxu0 }
 0x3d4   : > { %v2640_v44 = vadd.f32 %v4117_v57, %v6456_v46  ;;  %v2634_v40 = vpop.f32.mrb[95].mxu0 }
 0x3d5   : > { %v2635_v52 = vadd.f32 %v6456_v46, %v2634_v40  ;;  %4240 = vmatprep.mubr.f32.mxu1 %v2831_v30 }
 0x3d6   : > { %4241 = vmatmul.mubr.f32.gmra.mrb[92].mxu1 %v2832_v19  ;;  %v2834_v6 = vmax.f32 %v2640_v44, 0.0 }
 0x3d7   : > { %v2833_v9 = vmax.f32 %v2635_v52, 0.0 }
 0x3d8   : > { %v4120_v47 = vpop.f32.mrb[96].mxu0 }
 0x3d9   : > { %4243 = vmatprep.mubr.f32.mxu1 %v2833_v9  ;;  %v2650_v34 = vadd.f32 %v4120_v47, %v6456_v46  ;;  %v2644_v4 = vpop.f32.mrb[97].mxu0 }
 0x3da   : > { %4244 = vmatmul.mubr.f32.gmra.mrb[94].mxu1 %v2834_v6  ;;  %v2645_v58 = vadd.f32 %v6456_v46, %v2644_v4 }
 0x3db   : > { %v2836_v27 = vmax.f32 %v2650_v34, 0.0 }
 0x3dc   : > { %v2835_v23 = vmax.f32 %v2645_v58, 0.0  ;;  %v4123_v26 = vpop.f32.mrb[98].mxu0 }
 0x3dd   : > { %v2660_v12 = vadd.f32 %v4123_v26, %v6456_v46  ;;  %v2654_v36 = vpop.f32.mrb[99].mxu0 }
 0x3de   : > { %v2655_v25 = vadd.f32 %v6456_v46, %v2654_v36  ;;  %4246 = vmatprep.mubr.f32.mxu1 %v2835_v23 }
 0x3df   : > { %4247 = vmatmul.mubr.f32.gmra.mrb[96].mxu1 %v2836_v27  ;;  %v2838_v11 = vmax.f32 %v2660_v12, 0.0 }
 0x3e0   : > { %v2837_v17 = vmax.f32 %v2655_v25, 0.0 }
 0x3e2   : > { %4249 = vmatprep.mubr.f32.mxu1 %v2837_v17 }
 0x3e3   : > { %v4126_v41 = vpop.f32.mrb[100].mxu0  ;;  %4250 = vmatmul.mubr.f32.gmra.mrb[98].mxu1 %v2838_v11 }
 0x3e4   : > { %v2670_v2 = vadd.f32 %v4126_v41, %v6456_v46  ;;  %v2664_v13 = vpop.f32.mrb[101].mxu0 }
 0x3e5   : > { %v2665_v0 = vadd.f32 %v6456_v46, %v2664_v13 }
 0x3e6   : > { %v2840_v21 = vmax.f32 %v2670_v2, 0.0 }
 0x3e7   : > { %v2839_v53 = vmax.f32 %v2665_v0, 0.0  ;;  %v4129_v43 = vpop.f32.mrb[102].mxu0 }
 0x3e8   : > { %v2680_v3 = vadd.f32 %v4129_v43, %v6456_v46  ;;  %v2674_v5 = vpop.f32.mrb[103].mxu0 }
 0x3e9   : > { %v2675_v31 = vadd.f32 %v6456_v46, %v2674_v5  ;;  %4252 = vmatprep.mubr.f32.mxu1 %v2839_v53 }
 0x3ea   : > { %4253 = vmatmul.mubr.f32.gmra.mrb[100].mxu1 %v2840_v21  ;;  %v2842_v38 = vmax.f32 %v2680_v3, 0.0 }
 0x3eb   : > { %v2841_v51 = vmax.f32 %v2675_v31, 0.0  ;;  %v4132_v35 = vpop.f32.mrb[104].mxu0 }
 0x3ec   : > { %v2690_v32 = vadd.f32 %v4132_v35, %v6456_v46  ;;  %v2684_v22 = vpop.f32.mrb[105].mxu0 }
 0x3ed   : > { %v2685_v48 = vadd.f32 %v6456_v46, %v2684_v22  ;;  %4255 = vmatprep.mubr.f32.mxu1 %v2841_v51 }
 0x3ee   : > { %4256 = vmatmul.mubr.f32.gmra.mrb[102].mxu1 %v2842_v38  ;;  %v2844_v60 = vmax.f32 %v2690_v32, 0.0 }
 0x3ef   : > { %v2843_v49 = vmax.f32 %v2685_v48, 0.0  ;;  %v4135_v20 = vpop.f32.mrb[106].mxu0 }
 0x3f0   : > { %v2700_v37 = vadd.f32 %v4135_v20, %v6456_v46  ;;  %v2694_v59 = vpop.f32.mrb[107].mxu0 }
 0x3f1   : > { %v2695_v54 = vadd.f32 %v6456_v46, %v2694_v59  ;;  %4258 = vmatprep.mubr.f32.mxu1 %v2843_v49 }
 0x3f2   : > { %4259 = vmatmul.mubr.f32.gmra.mrb[104].mxu1 %v2844_v60  ;;  %v2846_v18 = vmax.f32 %v2700_v37, 0.0 }
 0x3f3   : > { %v2845_v63 = vmax.f32 %v2695_v54, 0.0  ;;  %v4138_v33 = vpop.f32.mrb[108].mxu0  ;;  %v6525_v54 = vld [vmem:[%s6711_s2 + $0x3] ss:$0 sm:$0xff] }
 0x3f4   : > { %v2710_v55 = vadd.f32 %v4138_v33, %v6456_v46  ;;  %v2704_v61 = vpop.f32.mrb[109].mxu0 }
 0x3f5   : > { %v2705_v42 = vadd.f32 %v6456_v46, %v2704_v61  ;;  %4261 = vmatprep.mubr.f32.mxu1 %v2845_v63 }
 0x3f6   : > { %4262 = vmatmul.mubr.f32.gmra.mrb[106].mxu1 %v2846_v18  ;;  %v2848_v29 = vmax.f32 %v2710_v55, 0.0 }
 0x3f7   : > { %v2847_v56 = vmax.f32 %v2705_v42, 0.0  ;;  %v4141_v28 = vpop.f32.mrb[110].mxu0 }
 0x3f8   : > { %v2720_v8 = vadd.f32 %v4141_v28, %v6456_v46  ;;  %v2714_v39 = vpop.f32.mrb[111].mxu0 }
 0x3f9   : > { %v2715_v45 = vadd.f32 %v6456_v46, %v2714_v39  ;;  %4264 = vmatprep.mubr.f32.mxu1 %v2847_v56 }
 0x3fa   : > { %4265 = vmatmul.mubr.f32.gmra.mrb[108].mxu1 %v2848_v29  ;;  %v2850_v15 = vmax.f32 %v2720_v8, 0.0 }
 0x3fb   : > { %v2849_v1 = vmax.f32 %v2715_v45, 0.0  ;;  %v4144_v50 = vpop.f32.mrb[112].mxu0 }
 0x3fc   : > { %v2730_v24 = vadd.f32 %v4144_v50, %v6456_v46  ;;  %v2724_v14 = vpop.f32.mrb[113].mxu0 }
 0x3fd   : > { %v2725_v16 = vadd.f32 %v6456_v46, %v2724_v14  ;;  %4267 = vmatprep.mubr.f32.mxu1 %v2849_v1 }
 0x3fe   : > { %4268 = vmatmul.mubr.f32.gmra.mrb[110].mxu1 %v2850_v15  ;;  %v2852_v7 = vmax.f32 %v2730_v24, 0.0 }
 0x3ff   : > { %v2851_v10 = vmax.f32 %v2725_v16, 0.0  ;;  %v4147_v62 = vpop.f32.mrb[114].mxu0 }
 0x400   : > { %v2740_v30 = vadd.f32 %v4147_v62, %v6456_v46  ;;  %v2734_v57 = vpop.f32.mrb[115].mxu0 }
 0x401   : > { %v2735_v19 = vadd.f32 %v6456_v46, %v2734_v57  ;;  %4270 = vmatprep.mubr.f32.mxu1 %v2851_v10 }
 0x402   : > { %4271 = vmatmul.mubr.f32.gmra.mrb[112].mxu1 %v2852_v7  ;;  %v2854_v52 = vmax.f32 %v2740_v30, 0.0 }
 0x403   : > { %v2853_v44 = vmax.f32 %v2735_v19, 0.0  ;;  %v4150_v40 = vpop.f32.mrb[116].mxu0 }
 0x404   : > { %v2750_v9 = vadd.f32 %v4150_v40, %v6456_v46  ;;  %v2744_v6 = vpop.f32.mrb[117].mxu0 }
 0x405   : > { %v2745_v47 = vadd.f32 %v6456_v46, %v2744_v6  ;;  %4273 = vmatprep.mubr.f32.mxu1 %v2853_v44 }
 0x406   : > { %4274 = vmatmul.mubr.f32.gmra.mrb[114].mxu1 %v2854_v52  ;;  %v2856_v58 = vmax.f32 %v2750_v9, 0.0 }
 0x407   : > { %v2855_v34 = vmax.f32 %v2745_v47, 0.0  ;;  %v4153_v4 = vpop.f32.mrb[118].mxu0 }
 0x408   : > { %v2760_v23 = vadd.f32 %v4153_v4, %v6456_v46  ;;  %v2754_v26 = vpop.f32.mrb[119].mxu0 }
 0x409   : > { %v2755_v27 = vadd.f32 %v6456_v46, %v2754_v26  ;;  %4276 = vmatprep.mubr.f32.mxu1 %v2855_v34 }
 0x40a   : > { %4277 = vmatmul.mubr.f32.gmra.mrb[116].mxu1 %v2856_v58  ;;  %v2858_v25 = vmax.f32 %v2760_v23, 0.0 }
 0x40b   : > { %v2857_v12 = vmax.f32 %v2755_v27, 0.0  ;;  %v4156_v36 = vpop.f32.mrb[120].mxu0 }
 0x40c   : > { %v2770_v17 = vadd.f32 %v4156_v36, %v6456_v46  ;;  %v2764_v11 = vpop.f32.mrb[121].mxu0 }
 0x40d   : > { %v2765_v41 = vadd.f32 %v6456_v46, %v2764_v11  ;;  %4279 = vmatprep.mubr.f32.mxu1 %v2857_v12 }
 0x40e   : > { %4280 = vmatmul.mubr.f32.gmra.mrb[118].mxu1 %v2858_v25  ;;  %v2860_v0 = vmax.f32 %v2770_v17, 0.0 }
 0x40f   : > { %v2859_v2 = vmax.f32 %v2765_v41, 0.0  ;;  %v4159_v13 = vpop.f32.mrb[122].mxu0 }
 0x410   : > { %v2780_v53 = vadd.f32 %v4159_v13, %v6456_v46  ;;  %v2774_v43 = vpop.f32.mrb[123].mxu0 }
 0x411   : > { %v2775_v21 = vadd.f32 %v6456_v46, %v2774_v43  ;;  %4282 = vmatprep.mubr.f32.mxu1 %v2859_v2 }
 0x412   : > { %4283 = vmatmul.mubr.f32.gmra.mrb[120].mxu1 %v2860_v0  ;;  %v2862_v31 = vmax.f32 %v2780_v53, 0.0 }
 0x413   : > { %v2861_v3 = vmax.f32 %v2775_v21, 0.0  ;;  %v4162_v5 = vpop.f32.mrb[124].mxu0 }
 0x414   : > { %v2790_v51 = vadd.f32 %v4162_v5, %v6456_v46  ;;  %v2784_v35 = vpop.f32.mrb[125].mxu0 }
 0x415   : > { %v2785_v38 = vadd.f32 %v6456_v46, %v2784_v35  ;;  %4285 = vmatprep.mubr.f32.mxu1 %v2861_v3 }
 0x416   : > { %4286 = vmatmul.mubr.f32.gmra.mrb[122].mxu1 %v2862_v31  ;;  %v2864_v48 = vmax.f32 %v2790_v51, 0.0 }
 0x417   : > { %v2863_v32 = vmax.f32 %v2785_v38, 0.0  ;;  %v4165_v22 = vpop.f32.mrb[126].mxu0 }
 0x418   : > { %v2800_v49 = vadd.f32 %v4165_v22, %v6456_v46  ;;  %v2794_v20 = vpop.f32.mrb[127].mxu0 }
 0x419   : > { %v2795_v60 = vadd.f32 %v6456_v46, %v2794_v20  ;;  %4288 = vmatprep.mubr.f32.mxu1 %v2863_v32 }
 0x41a   : > { %4289 = vmatmul.mubr.f32.gmra.mrb[124].mxu1 %v2864_v48  ;;  %v2866_v59 = vmax.f32 %v2800_v49, 0.0 }
 0x41b   : > { %v2865_v37 = vmax.f32 %v2795_v60, 0.0 }
 0x41d   : > { %4291 = vmatprep.mubr.f32.mxu1 %v2865_v37 }
 0x41e   : > { %4292 = vmatmul.mubr.f32.gmra.mrb[126].mxu1 %v2866_v59 }
 0x443   : > { %v4200_v63 = vpop.f32.mrb[64].mxu1 }
 0x444   : > { %v2961_v33 = vadd.f32 %v4200_v63, %v6525_v54  ;;  %v2955_v18 = vpop.f32.mrb[65].mxu1 }
 0x445   : > { %v2956_v55 = vadd.f32 %v6525_v54, %v2955_v18 }
 0x446   : > { %3275 = vst [vmem:[%s6531_s30 + $0x8] sm:$0xff] %v2961_v33 }
 0x447   : > { %3274 = vst [vmem:[%s6531_s30] sm:$0xff] %v2956_v55  ;;  %v4203_v46 = vpop.f32.mrb[66].mxu1 }
 0x448   : > { %v2971_v61 = vadd.f32 %v4203_v46, %v6525_v54  ;;  %v2965_v42 = vpop.f32.mrb[67].mxu1 }
 0x449   : > { %v2966_v56 = vadd.f32 %v6525_v54, %v2965_v42 }
 0x44a   : > { %3277 = vst [vmem:[%s6531_s30 + $0x18] sm:$0xff] %v2971_v61 }
 0x44b   : > { %3276 = vst [vmem:[%s6531_s30 + $0x10] sm:$0xff] %v2966_v56 }
 0x452   : > { %v4206_v28 = vpop.f32.mrb[68].mxu1 }
 0x453   : > { %v2981_v29 = vadd.f32 %v4206_v28, %v6525_v54  ;;  %v2975_v8 = vpop.f32.mrb[69].mxu1 }
 0x454   : > { %v2976_v39 = vadd.f32 %v6525_v54, %v2975_v8 }
 0x455   : > { %3279 = vst [vmem:[%s6531_s30 + $0x28] sm:$0xff] %v2981_v29 }
 0x456   : > { %3278 = vst [vmem:[%s6531_s30 + $0x20] sm:$0xff] %v2976_v39  ;;  %v4209_v45 = vpop.f32.mrb[70].mxu1 }
 0x457   : > { %v2991_v1 = vadd.f32 %v4209_v45, %v6525_v54  ;;  %v2985_v50 = vpop.f32.mrb[71].mxu1 }
 0x458   : > { %v2986_v15 = vadd.f32 %v6525_v54, %v2985_v50 }
 0x459   : > { %3281 = vst [vmem:[%s6531_s30 + $0x38] sm:$0xff] %v2991_v1 }
 0x45a   : > { %3280 = vst [vmem:[%s6531_s30 + $0x30] sm:$0xff] %v2986_v15 }
 0x45f   : > { %v4212_v24 = vpop.f32.mrb[72].mxu1 }
 0x460   : > { %v3001_v14 = vadd.f32 %v4212_v24, %v6525_v54  ;;  %v2995_v16 = vpop.f32.mrb[73].mxu1 }
 0x461   : > { %v2996_v10 = vadd.f32 %v6525_v54, %v2995_v16 }
 0x462   : > { %3283 = vst [vmem:[%s6531_s30 + $0x48] sm:$0xff] %v3001_v14 }
 0x463   : > { %3282 = vst [vmem:[%s6531_s30 + $0x40] sm:$0xff] %v2996_v10  ;;  %v4215_v62 = vpop.f32.mrb[74].mxu1 }
 0x464   : > { %v3011_v7 = vadd.f32 %v4215_v62, %v6525_v54  ;;  %v3005_v30 = vpop.f32.mrb[75].mxu1 }
 0x465   : > { %v3006_v57 = vadd.f32 %v6525_v54, %v3005_v30 }
 0x466   : > { %3285 = vst [vmem:[%s6531_s30 + $0x58] sm:$0xff] %v3011_v7 }
 0x467   : > { %3284 = vst [vmem:[%s6531_s30 + $0x50] sm:$0xff] %v3006_v57 }
 0x46a   : > { %v4218_v19 = vpop.f32.mrb[76].mxu1 }
 0x46b   : > { %v3021_v44 = vadd.f32 %v4218_v19, %v6525_v54  ;;  %v3015_v40 = vpop.f32.mrb[77].mxu1 }
 0x46c   : > { %v3016_v52 = vadd.f32 %v6525_v54, %v3015_v40 }
 0x46d   : > { %3287 = vst [vmem:[%s6531_s30 + $0x68] sm:$0xff] %v3021_v44 }
 0x46e   : > { %3286 = vst [vmem:[%s6531_s30 + $0x60] sm:$0xff] %v3016_v52  ;;  %v4221_v9 = vpop.f32.mrb[78].mxu1 }
 0x46f   : > { %v3031_v6 = vadd.f32 %v4221_v9, %v6525_v54  ;;  %v3025_v47 = vpop.f32.mrb[79].mxu1 }
 0x470   : > { %v3026_v34 = vadd.f32 %v6525_v54, %v3025_v47 }
 0x471   : > { %3289 = vst [vmem:[%s6531_s30 + $0x78] sm:$0xff] %v3031_v6 }
 0x472   : > { %3288 = vst [vmem:[%s6531_s30 + $0x70] sm:$0xff] %v3026_v34 }
 0x473   : > { %v4224_v4 = vpop.f32.mrb[80].mxu1 }
 0x474   : > { %v3041_v58 = vadd.f32 %v4224_v4, %v6525_v54  ;;  %v3035_v23 = vpop.f32.mrb[81].mxu1 }
 0x475   : > { %v3036_v26 = vadd.f32 %v6525_v54, %v3035_v23 }
 0x476   : > { %3291 = vst [vmem:[%s6531_s30 + $0x88] sm:$0xff] %v3041_v58 }
 0x477   : > { %3290 = vst [vmem:[%s6531_s30 + $0x80] sm:$0xff] %v3036_v26  ;;  %v4227_v27 = vpop.f32.mrb[82].mxu1 }
 0x478   : > { %v3051_v12 = vadd.f32 %v4227_v27, %v6525_v54  ;;  %v3045_v36 = vpop.f32.mrb[83].mxu1 }
 0x479   : > { %v3046_v25 = vadd.f32 %v6525_v54, %v3045_v36 }
 0x47a   : > { %3293 = vst [vmem:[%s6531_s30 + $0x98] sm:$0xff] %v3051_v12 }
 0x47b   : > { %3292 = vst [vmem:[%s6531_s30 + $0x90] sm:$0xff] %v3046_v25 }
 0x47c   : > { %v4230_v17 = vpop.f32.mrb[84].mxu1 }
 0x47d   : > { %v3061_v11 = vadd.f32 %v4230_v17, %v6525_v54  ;;  %v3055_v41 = vpop.f32.mrb[85].mxu1 }
 0x47e   : > { %v3056_v2 = vadd.f32 %v6525_v54, %v3055_v41 }
 0x47f   : > { %3295 = vst [vmem:[%s6531_s30 + $0xa8] sm:$0xff] %v3061_v11 }
 0x480   : > { %3294 = vst [vmem:[%s6531_s30 + $0xa0] sm:$0xff] %v3056_v2 }
 0x481   : > { %v4233_v13 = vpop.f32.mrb[86].mxu1 }
 0x482   : > { %v3071_v0 = vadd.f32 %v4233_v13, %v6525_v54  ;;  %v3065_v53 = vpop.f32.mrb[87].mxu1 }
 0x483   : > { %v3066_v43 = vadd.f32 %v6525_v54, %v3065_v53 }
 0x484   : > { %3297 = vst [vmem:[%s6531_s30 + $0xb8] sm:$0xff] %v3071_v0 }
 0x485   : > { %3296 = vst [vmem:[%s6531_s30 + $0xb0] sm:$0xff] %v3066_v43 }
 0x48c   : > { %v4236_v21 = vpop.f32.mrb[88].mxu1 }
 0x48d   : > { %v3081_v3 = vadd.f32 %v4236_v21, %v6525_v54  ;;  %v3075_v5 = vpop.f32.mrb[89].mxu1 }
 0x48e   : > { %v3076_v31 = vadd.f32 %v6525_v54, %v3075_v5 }
 0x48f   : > { %3299 = vst [vmem:[%s6531_s30 + $0xc8] sm:$0xff] %v3081_v3 }
 0x490   : > { %3298 = vst [vmem:[%s6531_s30 + $0xc0] sm:$0xff] %v3076_v31 }
 0x49e   : > { %v4239_v51 = vpop.f32.mrb[90].mxu1 }
 0x49f   : > { %v3091_v35 = vadd.f32 %v4239_v51, %v6525_v54  ;;  %v3085_v38 = vpop.f32.mrb[91].mxu1 }
 0x4a0   : > { %v3086_v32 = vadd.f32 %v6525_v54, %v3085_v38 }
 0x4a1   : > { %3301 = vst [vmem:[%s6531_s30 + $0xd8] sm:$0xff] %v3091_v35 }
 0x4a2   : > { %3300 = vst [vmem:[%s6531_s30 + $0xd0] sm:$0xff] %v3086_v32 }
 0x4a9   : > { %v4242_v22 = vpop.f32.mrb[92].mxu1 }
 0x4aa   : > { %v3101_v48 = vadd.f32 %v4242_v22, %v6525_v54  ;;  %v3095_v49 = vpop.f32.mrb[93].mxu1 }
 0x4ab   : > { %v3096_v20 = vadd.f32 %v6525_v54, %v3095_v49 }
 0x4ac   : > { %3303 = vst [vmem:[%s6531_s30 + $0xe8] sm:$0xff] %v3101_v48 }
 0x4ad   : > { %3302 = vst [vmem:[%s6531_s30 + $0xe0] sm:$0xff] %v3096_v20  ;;  %v4245_v60 = vpop.f32.mrb[94].mxu1 }
 0x4ae   : > { %v3111_v37 = vadd.f32 %v4245_v60, %v6525_v54  ;;  %v3105_v59 = vpop.f32.mrb[95].mxu1 }
 0x4af   : > { %v3106_v63 = vadd.f32 %v6525_v54, %v3105_v59 }
 0x4b0   : > { %3305 = vst [vmem:[%s6531_s30 + $0xf8] sm:$0xff] %v3111_v37 }
 0x4b1   : > { %3304 = vst [vmem:[%s6531_s30 + $0xf0] sm:$0xff] %v3106_v63 }
 0x4b2   : > { %v4248_v33 = vpop.f32.mrb[96].mxu1 }
 0x4b3   : > { %v3121_v18 = vadd.f32 %v4248_v33, %v6525_v54  ;;  %v3115_v55 = vpop.f32.mrb[97].mxu1 }
 0x4b4   : > { %v3116_v46 = vadd.f32 %v6525_v54, %v3115_v55 }
 0x4b5   : > { %3307 = vst [vmem:[%s6531_s30 + $0x108] sm:$0xff] %v3121_v18 }
 0x4b6   : > { %3306 = vst [vmem:[%s6531_s30 + $0x100] sm:$0xff] %v3116_v46  ;;  %v4251_v61 = vpop.f32.mrb[98].mxu1 }
 0x4b7   : > { %v3131_v42 = vadd.f32 %v4251_v61, %v6525_v54  ;;  %v3125_v56 = vpop.f32.mrb[99].mxu1 }
 0x4b8   : > { %v3126_v28 = vadd.f32 %v6525_v54, %v3125_v56 }
 0x4b9   : > { %3309 = vst [vmem:[%s6531_s30 + $0x118] sm:$0xff] %v3131_v42 }
 0x4ba   : > { %3308 = vst [vmem:[%s6531_s30 + $0x110] sm:$0xff] %v3126_v28 }
 0x4bd   : > { %v4254_v29 = vpop.f32.mrb[100].mxu1 }
 0x4be   : > { %v3141_v8 = vadd.f32 %v4254_v29, %v6525_v54  ;;  %v3135_v39 = vpop.f32.mrb[101].mxu1 }
 0x4bf   : > { %v3136_v45 = vadd.f32 %v6525_v54, %v3135_v39 }
 0x4c0   : > { %3311 = vst [vmem:[%s6531_s30 + $0x128] sm:$0xff] %v3141_v8 }
 0x4c1   : > { %3310 = vst [vmem:[%s6531_s30 + $0x120] sm:$0xff] %v3136_v45  ;;  %v4257_v1 = vpop.f32.mrb[102].mxu1 }
 0x4c2   : > { %v3151_v50 = vadd.f32 %v4257_v1, %v6525_v54  ;;  %v3145_v15 = vpop.f32.mrb[103].mxu1 }
 0x4c3   : > { %v3146_v24 = vadd.f32 %v6525_v54, %v3145_v15 }
 0x4c4   : > { %3313 = vst [vmem:[%s6531_s30 + $0x138] sm:$0xff] %v3151_v50 }
 0x4c5   : > { %3312 = vst [vmem:[%s6531_s30 + $0x130] sm:$0xff] %v3146_v24  ;;  %v4260_v14 = vpop.f32.mrb[104].mxu1 }
 0x4c6   : > { %v3161_v16 = vadd.f32 %v4260_v14, %v6525_v54  ;;  %v3155_v10 = vpop.f32.mrb[105].mxu1 }
 0x4c7   : > { %v3156_v62 = vadd.f32 %v6525_v54, %v3155_v10 }
 0x4c8   : > { %3315 = vst [vmem:[%s6531_s30 + $0x148] sm:$0xff] %v3161_v16 }
 0x4c9   : > { %3314 = vst [vmem:[%s6531_s30 + $0x140] sm:$0xff] %v3156_v62  ;;  %v4263_v7 = vpop.f32.mrb[106].mxu1 }
 0x4ca   : > { %v3171_v30 = vadd.f32 %v4263_v7, %v6525_v54  ;;  %v3165_v57 = vpop.f32.mrb[107].mxu1 }
 0x4cb   : > { %v3166_v19 = vadd.f32 %v6525_v54, %v3165_v57 }
 0x4cc   : > { %3317 = vst [vmem:[%s6531_s30 + $0x158] sm:$0xff] %v3171_v30 }
 0x4cd   : > { %3316 = vst [vmem:[%s6531_s30 + $0x150] sm:$0xff] %v3166_v19  ;;  %v4266_v44 = vpop.f32.mrb[108].mxu1 }
 0x4ce   : > { %v3181_v40 = vadd.f32 %v4266_v44, %v6525_v54  ;;  %v3175_v52 = vpop.f32.mrb[109].mxu1 }
 0x4cf   : > { %v3176_v9 = vadd.f32 %v6525_v54, %v3175_v52 }
 0x4d0   : > { %3319 = vst [vmem:[%s6531_s30 + $0x168] sm:$0xff] %v3181_v40 }
 0x4d1   : > { %3318 = vst [vmem:[%s6531_s30 + $0x160] sm:$0xff] %v3176_v9  ;;  %v4269_v6 = vpop.f32.mrb[110].mxu1 }
 0x4d2   : > { %v3191_v47 = vadd.f32 %v4269_v6, %v6525_v54  ;;  %v3185_v34 = vpop.f32.mrb[111].mxu1 }
 0x4d3   : > { %v3186_v4 = vadd.f32 %v6525_v54, %v3185_v34 }
 0x4d4   : > { %3321 = vst [vmem:[%s6531_s30 + $0x178] sm:$0xff] %v3191_v47 }
 0x4d5   : > { %3320 = vst [vmem:[%s6531_s30 + $0x170] sm:$0xff] %v3186_v4  ;;  %v4272_v58 = vpop.f32.mrb[112].mxu1 }
 0x4d6   : > { %v3201_v23 = vadd.f32 %v4272_v58, %v6525_v54  ;;  %v3195_v26 = vpop.f32.mrb[113].mxu1 }
 0x4d7   : > { %v3196_v27 = vadd.f32 %v6525_v54, %v3195_v26 }
 0x4d8   : > { %3323 = vst [vmem:[%s6531_s30 + $0x188] sm:$0xff] %v3201_v23 }
 0x4d9   : > { %3322 = vst [vmem:[%s6531_s30 + $0x180] sm:$0xff] %v3196_v27  ;;  %v4275_v12 = vpop.f32.mrb[114].mxu1 }
 0x4da   : > { %v3211_v36 = vadd.f32 %v4275_v12, %v6525_v54  ;;  %v3205_v25 = vpop.f32.mrb[115].mxu1 }
 0x4db   : > { %v3206_v17 = vadd.f32 %v6525_v54, %v3205_v25 }
 0x4dc   : > { %3325 = vst [vmem:[%s6531_s30 + $0x198] sm:$0xff] %v3211_v36 }
 0x4dd   : > { %3324 = vst [vmem:[%s6531_s30 + $0x190] sm:$0xff] %v3206_v17  ;;  %v4278_v11 = vpop.f32.mrb[116].mxu1 }
 0x4de   : > { %v3221_v41 = vadd.f32 %v4278_v11, %v6525_v54  ;;  %v3215_v2 = vpop.f32.mrb[117].mxu1 }
 0x4df   : > { %v3216_v13 = vadd.f32 %v6525_v54, %v3215_v2 }
 0x4e0   : > { %3327 = vst [vmem:[%s6531_s30 + $0x1a8] sm:$0xff] %v3221_v41 }
 0x4e1   : > { %3326 = vst [vmem:[%s6531_s30 + $0x1a0] sm:$0xff] %v3216_v13  ;;  %v4281_v0 = vpop.f32.mrb[118].mxu1 }
 0x4e2   : > { %v3231_v53 = vadd.f32 %v4281_v0, %v6525_v54  ;;  %v3225_v43 = vpop.f32.mrb[119].mxu1 }
 0x4e3   : > { %v3226_v21 = vadd.f32 %v6525_v54, %v3225_v43 }
 0x4e4   : > { %3329 = vst [vmem:[%s6531_s30 + $0x1b8] sm:$0xff] %v3231_v53 }
 0x4e5   : > { %3328 = vst [vmem:[%s6531_s30 + $0x1b0] sm:$0xff] %v3226_v21  ;;  %v4284_v3 = vpop.f32.mrb[120].mxu1 }
 0x4e6   : > { %v3241_v5 = vadd.f32 %v4284_v3, %v6525_v54  ;;  %v3235_v31 = vpop.f32.mrb[121].mxu1 }
 0x4e7   : > { %v3236_v51 = vadd.f32 %v6525_v54, %v3235_v31 }
 0x4e8   : > { %3331 = vst [vmem:[%s6531_s30 + $0x1c8] sm:$0xff] %v3241_v5 }
 0x4e9   : > { %3330 = vst [vmem:[%s6531_s30 + $0x1c0] sm:$0xff] %v3236_v51  ;;  %v4287_v35 = vpop.f32.mrb[122].mxu1 }
 0x4ea   : > { %v3251_v38 = vadd.f32 %v4287_v35, %v6525_v54  ;;  %v3245_v32 = vpop.f32.mrb[123].mxu1 }
 0x4eb   : > { %v3246_v22 = vadd.f32 %v6525_v54, %v3245_v32 }
 0x4ec   : > { %3333 = vst [vmem:[%s6531_s30 + $0x1d8] sm:$0xff] %v3251_v38 }
 0x4ed   : > { %3332 = vst [vmem:[%s6531_s30 + $0x1d0] sm:$0xff] %v3246_v22  ;;  %v4290_v48 = vpop.f32.mrb[124].mxu1 }
 0x4ee   : > { %v3261_v49 = vadd.f32 %v4290_v48, %v6525_v54  ;;  %v3255_v20 = vpop.f32.mrb[125].mxu1 }
 0x4ef   : > { %v3256_v60 = vadd.f32 %v6525_v54, %v3255_v20 }
 0x4f0   : > { %3335 = vst [vmem:[%s6531_s30 + $0x1e8] sm:$0xff] %v3261_v49 }
 0x4f1   : > { %3334 = vst [vmem:[%s6531_s30 + $0x1e0] sm:$0xff] %v3256_v60  ;;  %v4293_v37 = vpop.f32.mrb[126].mxu1 }
 0x4f2   : > { %v3271_v59 = vadd.f32 %v4293_v37, %v6525_v54  ;;  %v3265_v63 = vpop.f32.mrb[127].mxu1 }
 0x4f3   : > { %v3266_v33 = vadd.f32 %v6525_v54, %v3265_v63 }
 0x4f4   : > { %3337 = vst [vmem:[%s6531_s30 + $0x1f8] sm:$0xff] %v3271_v59 }
 0x4f5   : > { %3336 = vst [vmem:[%s6531_s30 + $0x1f0] sm:$0xff] %v3266_v33 }
 0x4f6   : > { %4620 = shalt.err (!%p4617_p7)
}
 0x4f7   : > { %s4621_s25 = scalar_lea.hbm %s6661_s18, 8192  ;;  %s4625_s27 = scalar_lea.hbm %s6712_s3, 24576 }
 0x4f8   : > { %p4622_p9 = scmp.ne.s32.totalorder %s6661_s18, %s4621_s25  ;;  %p4626_p5 = scmp.lt.u32.totalorder %s6661_s18, %s6712_s3 }
 0x4f9   : > { %p4627_p10 = scmp.lt.u32.totalorder %s4625_s27, %s4621_s25  ;;  %p4629_p4 = scmp.lt.u32.totalorder %s4621_s25, %s6661_s18 }
 0x4fa   : > { %p4623_p1 = pnand %p4622_p9, %p4792_p12 }
 0x4fb   : > { %p4628_p2 = por %p4627_p10, %p4626_p5 }
 0x4fc   : > { %p4624_p0 = pneg %p4623_p1 }
 0x4fd   : > { %p4630_p6 = por %p4629_p4, %p4628_p2 }
 0x4ff   : > { %p4631_p8 = pnand %p4630_p6, %p4624_p0 }
 0x501   : > { %4634 = shalt.err (!%p4631_p8)
}
 0x502   : > { %s4684_s29 = smov 128   ;;  %s4685_s30 = smov 8  }
 0x503   : > { %4428 = dma.vmem_to_hbm [thread:$0]  (%p4792_p12), %s6663_s7, 8192, %s6661_s18, %s3339_s16, %s4684_s29, %s4684_s29, %s4685_s30  }
 0x504 PF: > { %p4445_p11 = scmp.ge.s32.totalorder %s4677_s15, 2  ;;  %s3368_s22 = sand.u32 1, %s4665_s12  }
 0x505   : > { %p6750_p13 = scmp.ne.s32.totalorder %s6722_s19, 0  ;;  %s3369_s10 = scalar_lea.sflag [#allocation4], %s3368_s22 }
 0x507   : > { %p4439_p3 = pnand %p4445_p11, %p6750_p13 }
 0x509   : > { %4660 = dma.done.wait (!%p4439_p3), %s3369_s10, 8192  }
 0x50a   : > { %4662 = vsyncadd (!%p4439_p3), %s3369_s10, 4294959104  ;;  %p17_p7 = scmp.ge.s32.totalorder %s4759_s24, 5   ;;  %s6751_s12 = smov %s4669_s13 }
 0x50b   : > { %s6752_s13 = smov %s4673_s14  ;;  %s6753_s14 = smov %s4788_s17 }
 0x50c   : > { %s6754_s15 = smov %s4759_s24  ;;  %19 = sbr.rel (!%p17_p7) target bundleno = 6 (0x6), region = 84 }
 0x513   :  { %3374 = vsyncpa [#allocation3], 1 }
 0x514   :  { %3376 = vsyncpa [#allocation3 + $0x1], 1 }
 0x515   :  { %3377 = vsyncpa [#allocation6], 1 }
 0x516   :  { %3378 = vsyncpa [#allocation4], 1 }
 0x517   :  { %3380 = vsyncpa [#allocation4 + $0x1], 1 }

</bundles_post_ra>
